<compile_context>
chip_gen: v5e
topology: v5e:2x2
jax: 0.10.0
libtpu: 0.0.40
codegen_flags: <defaults>
</compile_context>

<pallas_src>
import jax
import jax.numpy as jnp
from jax import lax
from jax.experimental import pallas as pl
from jax.experimental.pallas import tpu as pltpu


def gene_lstm_kernel(maxlen_ref,   # SMEM (1,)  i32   max(lengths)   (scalar prefetch)
                     lenm1_ref,    # VMEM (B,1) i32   lengths - 1
                     gx_ref,       # VMEM (Tt*B, 4H) f32  pre-projected gates, time-major chunk
                     whh_ref,      # VMEM (H, 4H)    bf16 W_hh^T, gate cols permuted [i|f|o|g]
                     wf_ref,       # VMEM (H, 1)     f32  linear.weight^T
                     bf_ref,       # VMEM (1, 1)     f32  linear.bias
                     out_ref,      # VMEM (B, 1)     f32
                     h_s, c_s, hf_s):  # VMEM (B, H) f32 persistent state across chunks
    chunk = pl.program_id(0)
    n_chunks = pl.num_programs(0)
    Bp, Hh = h_s.shape
    Tt = gx_ref.shape[0] // Bp

    @pl.when(chunk == 0)
    def _init():
        h_s[...] = jnp.zeros_like(h_s)
        c_s[...] = jnp.zeros_like(c_s)
        hf_s[...] = jnp.zeros_like(hf_s)

    t0 = chunk * Tt

    # Skip chunks that lie entirely past max(lengths). Inside an active chunk the
    # loop trip count is the *static* Tt (unrolled); extra pad steps are harmless.
    @pl.when(t0 < maxlen_ref[0])
    def _chunk():
        lenm1 = lenm1_ref[...]                       # (B, 1), hoisted out of the loop

        def step(t, carry):
            h, c, hf = carry
            row = pl.multiple_of(t * Bp, Bp)
            gates = gx_ref[pl.ds(row, Bp), :] + jnp.dot(
                h.astype(jnp.bfloat16), whh_ref[...],
                preferred_element_type=jnp.float32)              # (B, 4H) f32
            # Gate order permuted offline to [i | f | o | g]:
            ifo = jax.nn.sigmoid(gates[:, 0:3 * Hh])             # one contiguous slab
            g_g = jnp.tanh(gates[:, 3 * Hh:4 * Hh])
            i_g = ifo[:, 0:Hh]
            f_g = ifo[:, Hh:2 * Hh]
            o_g = ifo[:, 2 * Hh:3 * Hh]
            c = f_g * c + i_g * g_g
            h = o_g * jnp.tanh(c)
            # Keep the hidden state produced at the last *valid* time step per row.
            hf = jnp.where(lenm1 == (t0 + t), h, hf)
            return h, c, hf

        h, c, hf = lax.fori_loop(0, Tt, step,
                                 (h_s[...], c_s[...], hf_s[...]),
                                 unroll=True)                    # static trip count
        h_s[...] = h
        c_s[...] = c
        hf_s[...] = hf

    @pl.when(chunk == n_chunks - 1)
    def _final():
        out_ref[...] = (jnp.dot(hf_s[...], wf_ref[...],
                                preferred_element_type=jnp.float32) + bf_ref[...])


def gene_lstm_forward(tokens, lengths, params, *, time_chunk=128):
    """tokens: (B, T) int32 token ids, lengths: (B,) int32 valid lengths."""
    B, T = tokens.shape
    gx_table = params["gx_table"]                       # (V, 4H) f32
    H4 = gx_table.shape[1]
    H = H4 // 4
    pad_idx = params["pad_idx"]

    lengths = jnp.clip(lengths.astype(jnp.int32), 1, T)          # guard

    # Pad batch to the sublane granule (8); padded rows are sliced off at the end.
    B_pad = ((B + 7) // 8) * 8
    if B_pad != B:
        tokens = jnp.pad(tokens, ((0, B_pad - B), (0, 0)), constant_values=pad_idx)
        lengths = jnp.pad(lengths, (0, B_pad - B), constant_values=1)

    # Pad T up to a multiple of the time chunk (padded steps lie beyond max(lengths)).
    Tt = min(time_chunk, T)
    n_chunks = pl.cdiv(T, Tt)
    T_pad = n_chunks * Tt
    if T_pad != T:
        tokens = jnp.pad(tokens, ((0, 0), (0, T_pad - T)), constant_values=pad_idx)

    # Fused embedding + input projection (XLA glue): one gather from the (V, 4H)
    # gate lookup table replaces the in-kernel (Tt*B, E) @ (E, 4H) matmul.
    gx = jnp.take(gx_table, tokens, axis=0)                       # (B_pad, T_pad, 4H)
    gx_tm = jnp.transpose(gx, (1, 0, 2)).reshape(T_pad * B_pad, H4)

    lenm1 = (lengths - 1).reshape(B_pad, 1)
    maxlen = jnp.max(lengths).reshape(1)

    grid_spec = pltpu.PrefetchScalarGridSpec(
        num_scalar_prefetch=1,
        grid=(n_chunks,),
        in_specs=[
            pl.BlockSpec((B_pad, 1), lambda t, ml: (0, 0)),        # lengths - 1
            pl.BlockSpec((Tt * B_pad, H4), lambda t, ml: (t, 0)),  # streamed gx chunk
            pl.BlockSpec((H, H4), lambda t, ml: (0, 0)),           # W_hh^T (bf16)
            pl.BlockSpec((H, 1), lambda t, ml: (0, 0)),            # linear.weight^T
            pl.BlockSpec((1, 1), lambda t, ml: (0, 0)),            # linear.bias
        ],
        out_specs=pl.BlockSpec((B_pad, 1), lambda t, ml: (0, 0)),
        scratch_shapes=[
            pltpu.VMEM((B_pad, H), jnp.float32),          # h
            pltpu.VMEM((B_pad, H), jnp.float32),          # c
            pltpu.VMEM((B_pad, H), jnp.float32),          # h at lengths-1
        ],
    )

    out = pl.pallas_call(
        gene_lstm_kernel,
        out_shape=jax.ShapeDtypeStruct((B_pad, 1), jnp.float32),
        grid_spec=grid_spec,
        compiler_params=pltpu.CompilerParams(
            dimension_semantics=("arbitrary",),   # sequential recurrence over chunks
            vmem_limit_bytes=32 * 1024 * 1024,    # v5e default scoped limit is 16 MiB
        ),
    )(maxlen, lenm1, gx_tm,
      params["w_hh_t_bf16"], params["wf_t"], params["bf"])
    return out[:B]


def _permute_gates_ifog(x_4h_rows):
    """Reorder the PyTorch LSTM gate axis [i|f|g|o] -> [i|f|o|g] (axis 0)."""
    H = x_4h_rows.shape[0] // 4
    i, f, g, o = (x_4h_rows[0:H], x_4h_rows[H:2 * H],
                  x_4h_rows[2 * H:3 * H], x_4h_rows[3 * H:4 * H])
    return jnp.concatenate([i, f, o, g], axis=0)


def make_params(key, vocab_size, emb_dim, pad_idx):
    H = 4 * emb_dim
    ks = jax.random.split(key, 8)
    s = 0.1
    emb = jax.random.normal(ks[0], (vocab_size, emb_dim), jnp.float32) * s
    emb = emb.at[pad_idx].set(0.0)                          # padding_idx row is zero
    w_ih = jax.random.normal(ks[1], (4 * H, emb_dim), jnp.float32) * s
    w_hh = jax.random.normal(ks[2], (4 * H, H), jnp.float32) * s
    b_ih = jax.random.normal(ks[3], (4 * H,), jnp.float32) * s
    b_hh = jax.random.normal(ks[4], (4 * H,), jnp.float32) * s
    w_fc = jax.random.normal(ks[5], (1, H), jnp.float32) * s
    b_fc = jax.random.normal(ks[6], (1,), jnp.float32) * s

    # Gate-permuted ([i|f|o|g]) packed weights for the kernel.
    w_ih_p = _permute_gates_ifog(w_ih)                                # (4H, E)
    w_hh_p = _permute_gates_ifog(w_hh)                                # (4H, H)
    b_p = _permute_gates_ifog((b_ih + b_hh).reshape(4 * H, 1)).reshape(1, 4 * H)

    # Fused embedding + input-projection lookup table (tiny: (V, 4H)), kept in f32.
    gx_table = emb @ w_ih_p.T + b_p                                   # (V, 4H)

    return {
        "pad_idx": pad_idx,
        "embedding": emb,
        "gx_table": gx_table,
        "w_hh_t_bf16": w_hh_p.T.astype(jnp.bfloat16),                 # (H, 4H) bf16
        "wf_t": w_fc.T,                                               # (H, 1)
        "bf": b_fc.reshape(1, 1),
        "_raw": (w_ih, w_hh, b_ih, b_hh, w_fc, b_fc),                 # for the reference
    }


def reference_forward(tokens, lengths, params):
    """Pure-JAX f32 reference (lax.scan LSTM) mirroring the PyTorch forward (eval)."""
    w_ih, w_hh, b_ih, b_hh, w_fc, b_fc = params["_raw"]
    emb = jnp.take(params["embedding"], tokens, axis=0).astype(jnp.float32)
    B, T, E = emb.shape
    H = 4 * E

    def cell(carry, x_t):
        h, c = carry
        gates = x_t @ w_ih.T + b_ih + h @ w_hh.T + b_hh
        i = jax.nn.sigmoid(gates[:, 0 * H:1 * H])
        f = jax.nn.sigmoid(gates[:, 1 * H:2 * H])
        g = jnp.tanh(gates[:, 2 * H:3 * H])
        o = jax.nn.sigmoid(gates[:, 3 * H:4 * H])
        c = f * c + i * g
        h = o * jnp.tanh(c)
        return (h, c), h

    h0 = jnp.zeros((B, H), jnp.float32)
    _, hs = lax.scan(cell, (h0, h0), jnp.transpose(emb, (1, 0, 2)))   # (T, B, H)
    hs = jnp.transpose(hs, (1, 0, 2))                                 # (B, T, H)
    h_final = hs[jnp.arange(B), lengths - 1]                          # (B, H)
    return h_final @ w_fc.T + b_fc


if __name__ == "__main__":
    # Gene-recognition vocabulary: pad + 4 nucleotides.
    vocab = {"pad": 0, "a": 1, "c": 2, "g": 3, "t": 4}
    V = len(vocab)
    E = 32                 # embedding_dimension -> hidden_size = 128
    B, T = 8, 16

    key = jax.random.PRNGKey(0)
    kp, kt = jax.random.split(key)
    params = make_params(kp, V, E, vocab["pad"])

    # lengths sorted descending (pack_padded_sequence default enforce_sorted=True)
    lengths = jnp.array([16, 14, 13, 11, 9, 6, 4, 2], dtype=jnp.int32)
    tokens = jax.random.randint(kt, (B, T), 1, V, dtype=jnp.int32)
    pos = jnp.arange(T)[None, :]
    tokens = jnp.where(pos < lengths[:, None], tokens, vocab["pad"]).astype(jnp.int32)

    out = gene_lstm_forward(tokens, lengths, params)
    out = jax.block_until_ready(out)

    ref = reference_forward(tokens, lengths, params)
    assert out.shape == (B, 1)
    # bf16 MXU inputs on the recurrent matmul -> loosened tolerance vs the f32 reference.
    assert jnp.allclose(out, ref, atol=1e-2, rtol=5e-2), (out, ref)

    print("KERNEL_OK")
</pallas_src>

<mosaic_0001>
module attributes {stable_mosaic.version = 11 : i64} {
  func.func @gene_lstm_kernel(%arg0: i32, %arg1: memref<1xi32, #tpu.memory_space<smem>>, %arg2: memref<8x1xi32, #tpu.memory_space<vmem>>, %arg3: memref<128x512xf32, #tpu.memory_space<vmem>>, %arg4: memref<128x512xbf16, #tpu.memory_space<vmem>>, %arg5: memref<128x1xf32, #tpu.memory_space<vmem>>, %arg6: memref<1x1xf32, #tpu.memory_space<vmem>>, %arg7: memref<8x1xf32, #tpu.memory_space<vmem>>, %arg8: memref<8x128xf32, #tpu.memory_space<vmem>>, %arg9: memref<8x128xf32, #tpu.memory_space<vmem>>, %arg10: memref<8x128xf32, #tpu.memory_space<vmem>>) attributes {dimension_semantics = [#tpu.dimension_semantics<arbitrary>], iteration_bounds = array<i64: 1>, scalar_prefetch = 1 : i64, scratch_operands = 3 : i64, tpu.core_type = #tpu.core_type<tc>, window_params = [{pipeline_mode = #tpu.pipeline_mode<synchronous>, transform_indices = @transform_0, window_bounds = array<i64: 8, 1>}, {transform_indices = @transform_1, window_bounds = array<i64: 128, 512>}, {pipeline_mode = #tpu.pipeline_mode<synchronous>, transform_indices = @transform_2, window_bounds = array<i64: 128, 512>}, {pipeline_mode = #tpu.pipeline_mode<synchronous>, transform_indices = @transform_3, window_bounds = array<i64: 128, 1>}, {pipeline_mode = #tpu.pipeline_mode<synchronous>, transform_indices = @transform_4, window_bounds = array<i64: 1, 1>}, {pipeline_mode = #tpu.pipeline_mode<synchronous>, transform_indices = @transform_5, window_bounds = array<i64: 8, 1>}]} {
    %c0_i32 = arith.constant 0 : i32
    %0 = arith.cmpi eq, %arg0, %c0_i32 : i32
    %1 = arith.extui %0 : i1 to i32
    %c0_i32_0 = arith.constant 0 : i32
    %2 = arith.cmpi ne, %1, %c0_i32_0 : i32
    scf.if %2 {
      %cst = arith.constant 0.000000e+00 : f32
      %11 = vector.broadcast %cst : f32 to vector<8x128xf32>
      %c0_4 = arith.constant 0 : index
      %c0_5 = arith.constant 0 : index
      %12 = vector.load %arg8[%c0_4, %c0_5] : memref<8x128xf32, #tpu.memory_space<vmem>>, vector<8x128xf32>
      tpu.vector_store %arg8[%c0_4, %c0_5], %11 {strides = array<i32>} : memref<8x128xf32, #tpu.memory_space<vmem>>, vector<8x128xf32>,
      %cst_6 = arith.constant 0.000000e+00 : f32
      %13 = vector.broadcast %cst_6 : f32 to vector<8x128xf32>
      %c0_7 = arith.constant 0 : index
      %c0_8 = arith.constant 0 : index
      %14 = vector.load %arg9[%c0_7, %c0_8] : memref<8x128xf32, #tpu.memory_space<vmem>>, vector<8x128xf32>
      tpu.vector_store %arg9[%c0_7, %c0_8], %13 {strides = array<i32>} : memref<8x128xf32, #tpu.memory_space<vmem>>, vector<8x128xf32>,
      %cst_9 = arith.constant 0.000000e+00 : f32
      %15 = vector.broadcast %cst_9 : f32 to vector<8x128xf32>
      %c0_10 = arith.constant 0 : index
      %c0_11 = arith.constant 0 : index
      %16 = vector.load %arg10[%c0_10, %c0_11] : memref<8x128xf32, #tpu.memory_space<vmem>>, vector<8x128xf32>
      tpu.vector_store %arg10[%c0_10, %c0_11], %15 {strides = array<i32>} : memref<8x128xf32, #tpu.memory_space<vmem>>, vector<8x128xf32>,
    } else {
    }
    %c16_i32 = arith.constant 16 : i32
    %3 = arith.muli %arg0, %c16_i32 : i32
    %c0 = arith.constant 0 : index
    %4 = memref.load %arg1[%c0] : memref<1xi32, #tpu.memory_space<smem>>
    %5 = arith.cmpi slt, %3, %4 : i32
    %6 = arith.extui %5 : i1 to i32
    %c0_i32_1 = arith.constant 0 : i32
    %7 = arith.cmpi ne, %6, %c0_i32_1 : i32
    scf.if %7 {
      %c0_4 = arith.constant 0 : index
      %c0_5 = arith.constant 0 : index
      %11 = vector.load %arg2[%c0_4, %c0_5] : memref<8x1xi32, #tpu.memory_space<vmem>>, vector<8x1xi32>
      %c0_6 = arith.constant 0 : index
      %c0_7 = arith.constant 0 : index
      %12 = vector.load %arg8[%c0_6, %c0_7] : memref<8x128xf32, #tpu.memory_space<vmem>>, vector<8x128xf32>
      %c0_8 = arith.constant 0 : index
      %c0_9 = arith.constant 0 : index
      %13 = vector.load %arg9[%c0_8, %c0_9] : memref<8x128xf32, #tpu.memory_space<vmem>>, vector<8x128xf32>
      %c0_10 = arith.constant 0 : index
      %c0_11 = arith.constant 0 : index
      %14 = vector.load %arg10[%c0_10, %c0_11] : memref<8x128xf32, #tpu.memory_space<vmem>>, vector<8x128xf32>
      %c0_i32_12 = arith.constant 0 : i32
      %c8_i32 = arith.constant 8 : i32
      %15 = arith.muli %c0_i32_12, %c8_i32 : i32
      %16 = tpu.assume_multiple %15, 8 : i32
      %17 = arith.index_cast %16 : i32 to index
      %c0_13 = arith.constant 0 : index
      %18 = vector.load %arg3[%17, %c0_13] : memref<128x512xf32, #tpu.memory_space<vmem>>, vector<8x512xf32>
      %19 = arith.truncf %12 : vector<8x128xf32> to vector<8x128xbf16>
      %c0_14 = arith.constant 0 : index
      %c0_15 = arith.constant 0 : index
      %20 = vector.load %arg4[%c0_14, %c0_15] : memref<128x512xbf16, #tpu.memory_space<vmem>>, vector<128x512xbf16>
      %cst = arith.constant dense<0.000000e+00> : vector<8x512xf32>
      %21 = tpu.matmul %19, %20, %cst {dimension_numbers = #tpu.dot_dimension_numbers<[1], [0], [0], [1], [0, 0, 1, 1], [], []>} : vector<8x128xbf16>, vector<128x512xbf16>, vector<8x512xf32> -> vector<8x512xf32>
      %22 = arith.addf %18, %21 : vector<8x512xf32>
      %23 = vector.extract_strided_slice %22 {offsets = [0, 0], sizes = [8, 384], strides = [1, 1]} : vector<8x512xf32> to vector<8x384xf32>
      %24 = arith.negf %23 : vector<8x384xf32>
      %25 = math.exp %24 : vector<8x384xf32>
      %cst_16 = arith.constant 1.000000e+00 : f32
      %26 = vector.broadcast %cst_16 : f32 to vector<8x384xf32>
      %27 = arith.addf %26, %25 : vector<8x384xf32>
      %28 = arith.divf %26, %27 : vector<8x384xf32>
      %29 = vector.extract_strided_slice %22 {offsets = [0, 384], sizes = [8, 128], strides = [1, 1]} : vector<8x512xf32> to vector<8x128xf32>
      %30 = math.tanh %29 : vector<8x128xf32>
      %31 = vector.extract_strided_slice %28 {offsets = [0, 0], sizes = [8, 128], strides = [1, 1]} : vector<8x384xf32> to vector<8x128xf32>
      %32 = vector.extract_strided_slice %28 {offsets = [0, 128], sizes = [8, 128], strides = [1, 1]} : vector<8x384xf32> to vector<8x128xf32>
      %33 = vector.extract_strided_slice %28 {offsets = [0, 256], sizes = [8, 128], strides = [1, 1]} : vector<8x384xf32> to vector<8x128xf32>
      %34 = arith.mulf %32, %13 : vector<8x128xf32>
      %35 = arith.mulf %31, %30 : vector<8x128xf32>
      %36 = arith.addf %34, %35 : vector<8x128xf32>
      %37 = math.tanh %36 : vector<8x128xf32>
      %38 = arith.mulf %33, %37 : vector<8x128xf32>
      %39 = arith.addi %3, %c0_i32_12 : i32
      %40 = vector.broadcast %39 : i32 to vector<8x1xi32>
      %41 = arith.cmpi eq, %11, %40 : vector<8x1xi32>
      %42 = vector.shape_cast %41 : vector<8x1xi1> to vector<8x1xi1>
      %43 = vector.broadcast %42 : vector<8x1xi1> to vector<8x128xi1>
      %44 = arith.select %43, %38, %14 : vector<8x128xi1>, vector<8x128xf32>
      %c1_i32 = arith.constant 1 : i32
      %c8_i32_17 = arith.constant 8 : i32
      %45 = arith.muli %c1_i32, %c8_i32_17 : i32
      %46 = tpu.assume_multiple %45, 8 : i32
      %47 = arith.index_cast %46 : i32 to index
      %c0_18 = arith.constant 0 : index
      %48 = vector.load %arg3[%47, %c0_18] : memref<128x512xf32, #tpu.memory_space<vmem>>, vector<8x512xf32>
      %49 = arith.truncf %38 : vector<8x128xf32> to vector<8x128xbf16>
      %c0_19 = arith.constant 0 : index
      %c0_20 = arith.constant 0 : index
      %50 = vector.load %arg4[%c0_19, %c0_20] : memref<128x512xbf16, #tpu.memory_space<vmem>>, vector<128x512xbf16>
      %cst_21 = arith.constant dense<0.000000e+00> : vector<8x512xf32>
      %51 = tpu.matmul %49, %50, %cst_21 {dimension_numbers = #tpu.dot_dimension_numbers<[1], [0], [0], [1], [0, 0, 1, 1], [], []>} : vector<8x128xbf16>, vector<128x512xbf16>, vector<8x512xf32> -> vector<8x512xf32>
      %52 = arith.addf %48, %51 : vector<8x512xf32>
      %53 = vector.extract_strided_slice %52 {offsets = [0, 0], sizes = [8, 384], strides = [1, 1]} : vector<8x512xf32> to vector<8x384xf32>
      %54 = arith.negf %53 : vector<8x384xf32>
      %55 = math.exp %54 : vector<8x384xf32>
      %cst_22 = arith.constant 1.000000e+00 : f32
      %56 = vector.broadcast %cst_22 : f32 to vector<8x384xf32>
      %57 = arith.addf %56, %55 : vector<8x384xf32>
      %58 = arith.divf %56, %57 : vector<8x384xf32>
      %59 = vector.extract_strided_slice %52 {offsets = [0, 384], sizes = [8, 128], strides = [1, 1]} : vector<8x512xf32> to vector<8x128xf32>
      %60 = math.tanh %59 : vector<8x128xf32>
      %61 = vector.extract_strided_slice %58 {offsets = [0, 0], sizes = [8, 128], strides = [1, 1]} : vector<8x384xf32> to vector<8x128xf32>
      %62 = vector.extract_strided_slice %58 {offsets = [0, 128], sizes = [8, 128], strides = [1, 1]} : vector<8x384xf32> to vector<8x128xf32>
      %63 = vector.extract_strided_slice %58 {offsets = [0, 256], sizes = [8, 128], strides = [1, 1]} : vector<8x384xf32> to vector<8x128xf32>
      %64 = arith.mulf %62, %36 : vector<8x128xf32>
      %65 = arith.mulf %61, %60 : vector<8x128xf32>
      %66 = arith.addf %64, %65 : vector<8x128xf32>
      %67 = math.tanh %66 : vector<8x128xf32>
      %68 = arith.mulf %63, %67 : vector<8x128xf32>
      %69 = arith.addi %3, %c1_i32 : i32
      %70 = vector.broadcast %69 : i32 to vector<8x1xi32>
      %71 = arith.cmpi eq, %11, %70 : vector<8x1xi32>
      %72 = vector.shape_cast %71 : vector<8x1xi1> to vector<8x1xi1>
      %73 = vector.broadcast %72 : vector<8x1xi1> to vector<8x128xi1>
      %74 = arith.select %73, %68, %44 : vector<8x128xi1>, vector<8x128xf32>
      %c2_i32 = arith.constant 2 : i32
      %c8_i32_23 = arith.constant 8 : i32
      %75 = arith.muli %c2_i32, %c8_i32_23 : i32
      %76 = tpu.assume_multiple %75, 8 : i32
      %77 = arith.index_cast %76 : i32 to index
      %c0_24 = arith.constant 0 : index
      %78 = vector.load %arg3[%77, %c0_24] : memref<128x512xf32, #tpu.memory_space<vmem>>, vector<8x512xf32>
      %79 = arith.truncf %68 : vector<8x128xf32> to vector<8x128xbf16>
      %c0_25 = arith.constant 0 : index
      %c0_26 = arith.constant 0 : index
      %80 = vector.load %arg4[%c0_25, %c0_26] : memref<128x512xbf16, #tpu.memory_space<vmem>>, vector<128x512xbf16>
      %cst_27 = arith.constant dense<0.000000e+00> : vector<8x512xf32>
      %81 = tpu.matmul %79, %80, %cst_27 {dimension_numbers = #tpu.dot_dimension_numbers<[1], [0], [0], [1], [0, 0, 1, 1], [], []>} : vector<8x128xbf16>, vector<128x512xbf16>, vector<8x512xf32> -> vector<8x512xf32>
      %82 = arith.addf %78, %81 : vector<8x512xf32>
      %83 = vector.extract_strided_slice %82 {offsets = [0, 0], sizes = [8, 384], strides = [1, 1]} : vector<8x512xf32> to vector<8x384xf32>
      %84 = arith.negf %83 : vector<8x384xf32>
      %85 = math.exp %84 : vector<8x384xf32>
      %cst_28 = arith.constant 1.000000e+00 : f32
      %86 = vector.broadcast %cst_28 : f32 to vector<8x384xf32>
      %87 = arith.addf %86, %85 : vector<8x384xf32>
      %88 = arith.divf %86, %87 : vector<8x384xf32>
      %89 = vector.extract_strided_slice %82 {offsets = [0, 384], sizes = [8, 128], strides = [1, 1]} : vector<8x512xf32> to vector<8x128xf32>
      %90 = math.tanh %89 : vector<8x128xf32>
      %91 = vector.extract_strided_slice %88 {offsets = [0, 0], sizes = [8, 128], strides = [1, 1]} : vector<8x384xf32> to vector<8x128xf32>
      %92 = vector.extract_strided_slice %88 {offsets = [0, 128], sizes = [8, 128], strides = [1, 1]} : vector<8x384xf32> to vector<8x128xf32>
      %93 = vector.extract_strided_slice %88 {offsets = [0, 256], sizes = [8, 128], strides = [1, 1]} : vector<8x384xf32> to vector<8x128xf32>
      %94 = arith.mulf %92, %66 : vector<8x128xf32>
      %95 = arith.mulf %91, %90 : vector<8x128xf32>
      %96 = arith.addf %94, %95 : vector<8x128xf32>
      %97 = math.tanh %96 : vector<8x128xf32>
      %98 = arith.mulf %93, %97 : vector<8x128xf32>
      %99 = arith.addi %3, %c2_i32 : i32
      %100 = vector.broadcast %99 : i32 to vector<8x1xi32>
      %101 = arith.cmpi eq, %11, %100 : vector<8x1xi32>
      %102 = vector.shape_cast %101 : vector<8x1xi1> to vector<8x1xi1>
      %103 = vector.broadcast %102 : vector<8x1xi1> to vector<8x128xi1>
      %104 = arith.select %103, %98, %74 : vector<8x128xi1>, vector<8x128xf32>
      %c3_i32 = arith.constant 3 : i32
      %c8_i32_29 = arith.constant 8 : i32
      %105 = arith.muli %c3_i32, %c8_i32_29 : i32
      %106 = tpu.assume_multiple %105, 8 : i32
      %107 = arith.index_cast %106 : i32 to index
      %c0_30 = arith.constant 0 : index
      %108 = vector.load %arg3[%107, %c0_30] : memref<128x512xf32, #tpu.memory_space<vmem>>, vector<8x512xf32>
      %109 = arith.truncf %98 : vector<8x128xf32> to vector<8x128xbf16>
      %c0_31 = arith.constant 0 : index
      %c0_32 = arith.constant 0 : index
      %110 = vector.load %arg4[%c0_31, %c0_32] : memref<128x512xbf16, #tpu.memory_space<vmem>>, vector<128x512xbf16>
      %cst_33 = arith.constant dense<0.000000e+00> : vector<8x512xf32>
      %111 = tpu.matmul %109, %110, %cst_33 {dimension_numbers = #tpu.dot_dimension_numbers<[1], [0], [0], [1], [0, 0, 1, 1], [], []>} : vector<8x128xbf16>, vector<128x512xbf16>, vector<8x512xf32> -> vector<8x512xf32>
      %112 = arith.addf %108, %111 : vector<8x512xf32>
      %113 = vector.extract_strided_slice %112 {offsets = [0, 0], sizes = [8, 384], strides = [1, 1]} : vector<8x512xf32> to vector<8x384xf32>
      %114 = arith.negf %113 : vector<8x384xf32>
      %115 = math.exp %114 : vector<8x384xf32>
      %cst_34 = arith.constant 1.000000e+00 : f32
      %116 = vector.broadcast %cst_34 : f32 to vector<8x384xf32>
      %117 = arith.addf %116, %115 : vector<8x384xf32>
      %118 = arith.divf %116, %117 : vector<8x384xf32>
      %119 = vector.extract_strided_slice %112 {offsets = [0, 384], sizes = [8, 128], strides = [1, 1]} : vector<8x512xf32> to vector<8x128xf32>
      %120 = math.tanh %119 : vector<8x128xf32>
      %121 = vector.extract_strided_slice %118 {offsets = [0, 0], sizes = [8, 128], strides = [1, 1]} : vector<8x384xf32> to vector<8x128xf32>
      %122 = vector.extract_strided_slice %118 {offsets = [0, 128], sizes = [8, 128], strides = [1, 1]} : vector<8x384xf32> to vector<8x128xf32>
      %123 = vector.extract_strided_slice %118 {offsets = [0, 256], sizes = [8, 128], strides = [1, 1]} : vector<8x384xf32> to vector<8x128xf32>
      %124 = arith.mulf %122, %96 : vector<8x128xf32>
      %125 = arith.mulf %121, %120 : vector<8x128xf32>
      %126 = arith.addf %124, %125 : vector<8x128xf32>
      %127 = math.tanh %126 : vector<8x128xf32>
      %128 = arith.mulf %123, %127 : vector<8x128xf32>
      %129 = arith.addi %3, %c3_i32 : i32
      %130 = vector.broadcast %129 : i32 to vector<8x1xi32>
      %131 = arith.cmpi eq, %11, %130 : vector<8x1xi32>
      %132 = vector.shape_cast %131 : vector<8x1xi1> to vector<8x1xi1>
      %133 = vector.broadcast %132 : vector<8x1xi1> to vector<8x128xi1>
      %134 = arith.select %133, %128, %104 : vector<8x128xi1>, vector<8x128xf32>
      %c4_i32 = arith.constant 4 : i32
      %c8_i32_35 = arith.constant 8 : i32
      %135 = arith.muli %c4_i32, %c8_i32_35 : i32
      %136 = tpu.assume_multiple %135, 8 : i32
      %137 = arith.index_cast %136 : i32 to index
      %c0_36 = arith.constant 0 : index
      %138 = vector.load %arg3[%137, %c0_36] : memref<128x512xf32, #tpu.memory_space<vmem>>, vector<8x512xf32>
      %139 = arith.truncf %128 : vector<8x128xf32> to vector<8x128xbf16>
      %c0_37 = arith.constant 0 : index
      %c0_38 = arith.constant 0 : index
      %140 = vector.load %arg4[%c0_37, %c0_38] : memref<128x512xbf16, #tpu.memory_space<vmem>>, vector<128x512xbf16>
      %cst_39 = arith.constant dense<0.000000e+00> : vector<8x512xf32>
      %141 = tpu.matmul %139, %140, %cst_39 {dimension_numbers = #tpu.dot_dimension_numbers<[1], [0], [0], [1], [0, 0, 1, 1], [], []>} : vector<8x128xbf16>, vector<128x512xbf16>, vector<8x512xf32> -> vector<8x512xf32>
      %142 = arith.addf %138, %141 : vector<8x512xf32>
      %143 = vector.extract_strided_slice %142 {offsets = [0, 0], sizes = [8, 384], strides = [1, 1]} : vector<8x512xf32> to vector<8x384xf32>
      %144 = arith.negf %143 : vector<8x384xf32>
      %145 = math.exp %144 : vector<8x384xf32>
      %cst_40 = arith.constant 1.000000e+00 : f32
      %146 = vector.broadcast %cst_40 : f32 to vector<8x384xf32>
      %147 = arith.addf %146, %145 : vector<8x384xf32>
      %148 = arith.divf %146, %147 : vector<8x384xf32>
      %149 = vector.extract_strided_slice %142 {offsets = [0, 384], sizes = [8, 128], strides = [1, 1]} : vector<8x512xf32> to vector<8x128xf32>
      %150 = math.tanh %149 : vector<8x128xf32>
      %151 = vector.extract_strided_slice %148 {offsets = [0, 0], sizes = [8, 128], strides = [1, 1]} : vector<8x384xf32> to vector<8x128xf32>
      %152 = vector.extract_strided_slice %148 {offsets = [0, 128], sizes = [8, 128], strides = [1, 1]} : vector<8x384xf32> to vector<8x128xf32>
      %153 = vector.extract_strided_slice %148 {offsets = [0, 256], sizes = [8, 128], strides = [1, 1]} : vector<8x384xf32> to vector<8x128xf32>
      %154 = arith.mulf %152, %126 : vector<8x128xf32>
      %155 = arith.mulf %151, %150 : vector<8x128xf32>
      %156 = arith.addf %154, %155 : vector<8x128xf32>
      %157 = math.tanh %156 : vector<8x128xf32>
      %158 = arith.mulf %153, %157 : vector<8x128xf32>
      %159 = arith.addi %3, %c4_i32 : i32
      %160 = vector.broadcast %159 : i32 to vector<8x1xi32>
      %161 = arith.cmpi eq, %11, %160 : vector<8x1xi32>
      %162 = vector.shape_cast %161 : vector<8x1xi1> to vector<8x1xi1>
      %163 = vector.broadcast %162 : vector<8x1xi1> to vector<8x128xi1>
      %164 = arith.select %163, %158, %134 : vector<8x128xi1>, vector<8x128xf32>
      %c5_i32 = arith.constant 5 : i32
      %c8_i32_41 = arith.constant 8 : i32
      %165 = arith.muli %c5_i32, %c8_i32_41 : i32
      %166 = tpu.assume_multiple %165, 8 : i32
      %167 = arith.index_cast %166 : i32 to index
      %c0_42 = arith.constant 0 : index
      %168 = vector.load %arg3[%167, %c0_42] : memref<128x512xf32, #tpu.memory_space<vmem>>, vector<8x512xf32>
      %169 = arith.truncf %158 : vector<8x128xf32> to vector<8x128xbf16>
      %c0_43 = arith.constant 0 : index
      %c0_44 = arith.constant 0 : index
      %170 = vector.load %arg4[%c0_43, %c0_44] : memref<128x512xbf16, #tpu.memory_space<vmem>>, vector<128x512xbf16>
      %cst_45 = arith.constant dense<0.000000e+00> : vector<8x512xf32>
      %171 = tpu.matmul %169, %170, %cst_45 {dimension_numbers = #tpu.dot_dimension_numbers<[1], [0], [0], [1], [0, 0, 1, 1], [], []>} : vector<8x128xbf16>, vector<128x512xbf16>, vector<8x512xf32> -> vector<8x512xf32>
      %172 = arith.addf %168, %171 : vector<8x512xf32>
      %173 = vector.extract_strided_slice %172 {offsets = [0, 0], sizes = [8, 384], strides = [1, 1]} : vector<8x512xf32> to vector<8x384xf32>
      %174 = arith.negf %173 : vector<8x384xf32>
      %175 = math.exp %174 : vector<8x384xf32>
      %cst_46 = arith.constant 1.000000e+00 : f32
      %176 = vector.broadcast %cst_46 : f32 to vector<8x384xf32>
      %177 = arith.addf %176, %175 : vector<8x384xf32>
      %178 = arith.divf %176, %177 : vector<8x384xf32>
      %179 = vector.extract_strided_slice %172 {offsets = [0, 384], sizes = [8, 128], strides = [1, 1]} : vector<8x512xf32> to vector<8x128xf32>
      %180 = math.tanh %179 : vector<8x128xf32>
      %181 = vector.extract_strided_slice %178 {offsets = [0, 0], sizes = [8, 128], strides = [1, 1]} : vector<8x384xf32> to vector<8x128xf32>
      %182 = vector.extract_strided_slice %178 {offsets = [0, 128], sizes = [8, 128], strides = [1, 1]} : vector<8x384xf32> to vector<8x128xf32>
      %183 = vector.extract_strided_slice %178 {offsets = [0, 256], sizes = [8, 128], strides = [1, 1]} : vector<8x384xf32> to vector<8x128xf32>
      %184 = arith.mulf %182, %156 : vector<8x128xf32>
      %185 = arith.mulf %181, %180 : vector<8x128xf32>
      %186 = arith.addf %184, %185 : vector<8x128xf32>
      %187 = math.tanh %186 : vector<8x128xf32>
      %188 = arith.mulf %183, %187 : vector<8x128xf32>
      %189 = arith.addi %3, %c5_i32 : i32
      %190 = vector.broadcast %189 : i32 to vector<8x1xi32>
      %191 = arith.cmpi eq, %11, %190 : vector<8x1xi32>
      %192 = vector.shape_cast %191 : vector<8x1xi1> to vector<8x1xi1>
      %193 = vector.broadcast %192 : vector<8x1xi1> to vector<8x128xi1>
      %194 = arith.select %193, %188, %164 : vector<8x128xi1>, vector<8x128xf32>
      %c6_i32 = arith.constant 6 : i32
      %c8_i32_47 = arith.constant 8 : i32
      %195 = arith.muli %c6_i32, %c8_i32_47 : i32
      %196 = tpu.assume_multiple %195, 8 : i32
      %197 = arith.index_cast %196 : i32 to index
      %c0_48 = arith.constant 0 : index
      %198 = vector.load %arg3[%197, %c0_48] : memref<128x512xf32, #tpu.memory_space<vmem>>, vector<8x512xf32>
      %199 = arith.truncf %188 : vector<8x128xf32> to vector<8x128xbf16>
      %c0_49 = arith.constant 0 : index
      %c0_50 = arith.constant 0 : index
      %200 = vector.load %arg4[%c0_49, %c0_50] : memref<128x512xbf16, #tpu.memory_space<vmem>>, vector<128x512xbf16>
      %cst_51 = arith.constant dense<0.000000e+00> : vector<8x512xf32>
      %201 = tpu.matmul %199, %200, %cst_51 {dimension_numbers = #tpu.dot_dimension_numbers<[1], [0], [0], [1], [0, 0, 1, 1], [], []>} : vector<8x128xbf16>, vector<128x512xbf16>, vector<8x512xf32> -> vector<8x512xf32>
      %202 = arith.addf %198, %201 : vector<8x512xf32>
      %203 = vector.extract_strided_slice %202 {offsets = [0, 0], sizes = [8, 384], strides = [1, 1]} : vector<8x512xf32> to vector<8x384xf32>
      %204 = arith.negf %203 : vector<8x384xf32>
      %205 = math.exp %204 : vector<8x384xf32>
      %cst_52 = arith.constant 1.000000e+00 : f32
      %206 = vector.broadcast %cst_52 : f32 to vector<8x384xf32>
      %207 = arith.addf %206, %205 : vector<8x384xf32>
      %208 = arith.divf %206, %207 : vector<8x384xf32>
      %209 = vector.extract_strided_slice %202 {offsets = [0, 384], sizes = [8, 128], strides = [1, 1]} : vector<8x512xf32> to vector<8x128xf32>
      %210 = math.tanh %209 : vector<8x128xf32>
      %211 = vector.extract_strided_slice %208 {offsets = [0, 0], sizes = [8, 128], strides = [1, 1]} : vector<8x384xf32> to vector<8x128xf32>
      %212 = vector.extract_strided_slice %208 {offsets = [0, 128], sizes = [8, 128], strides = [1, 1]} : vector<8x384xf32> to vector<8x128xf32>
      %213 = vector.extract_strided_slice %208 {offsets = [0, 256], sizes = [8, 128], strides = [1, 1]} : vector<8x384xf32> to vector<8x128xf32>
      %214 = arith.mulf %212, %186 : vector<8x128xf32>
      %215 = arith.mulf %211, %210 : vector<8x128xf32>
      %216 = arith.addf %214, %215 : vector<8x128xf32>
      %217 = math.tanh %216 : vector<8x128xf32>
      %218 = arith.mulf %213, %217 : vector<8x128xf32>
      %219 = arith.addi %3, %c6_i32 : i32
      %220 = vector.broadcast %219 : i32 to vector<8x1xi32>
      %221 = arith.cmpi eq, %11, %220 : vector<8x1xi32>
      %222 = vector.shape_cast %221 : vector<8x1xi1> to vector<8x1xi1>
      %223 = vector.broadcast %222 : vector<8x1xi1> to vector<8x128xi1>
      %224 = arith.select %223, %218, %194 : vector<8x128xi1>, vector<8x128xf32>
      %c7_i32 = arith.constant 7 : i32
      %c8_i32_53 = arith.constant 8 : i32
      %225 = arith.muli %c7_i32, %c8_i32_53 : i32
      %226 = tpu.assume_multiple %225, 8 : i32
      %227 = arith.index_cast %226 : i32 to index
      %c0_54 = arith.constant 0 : index
      %228 = vector.load %arg3[%227, %c0_54] : memref<128x512xf32, #tpu.memory_space<vmem>>, vector<8x512xf32>
      %229 = arith.truncf %218 : vector<8x128xf32> to vector<8x128xbf16>
      %c0_55 = arith.constant 0 : index
      %c0_56 = arith.constant 0 : index
      %230 = vector.load %arg4[%c0_55, %c0_56] : memref<128x512xbf16, #tpu.memory_space<vmem>>, vector<128x512xbf16>
      %cst_57 = arith.constant dense<0.000000e+00> : vector<8x512xf32>
      %231 = tpu.matmul %229, %230, %cst_57 {dimension_numbers = #tpu.dot_dimension_numbers<[1], [0], [0], [1], [0, 0, 1, 1], [], []>} : vector<8x128xbf16>, vector<128x512xbf16>, vector<8x512xf32> -> vector<8x512xf32>
      %232 = arith.addf %228, %231 : vector<8x512xf32>
      %233 = vector.extract_strided_slice %232 {offsets = [0, 0], sizes = [8, 384], strides = [1, 1]} : vector<8x512xf32> to vector<8x384xf32>
      %234 = arith.negf %233 : vector<8x384xf32>
      %235 = math.exp %234 : vector<8x384xf32>
      %cst_58 = arith.constant 1.000000e+00 : f32
      %236 = vector.broadcast %cst_58 : f32 to vector<8x384xf32>
      %237 = arith.addf %236, %235 : vector<8x384xf32>
      %238 = arith.divf %236, %237 : vector<8x384xf32>
      %239 = vector.extract_strided_slice %232 {offsets = [0, 384], sizes = [8, 128], strides = [1, 1]} : vector<8x512xf32> to vector<8x128xf32>
      %240 = math.tanh %239 : vector<8x128xf32>
      %241 = vector.extract_strided_slice %238 {offsets = [0, 0], sizes = [8, 128], strides = [1, 1]} : vector<8x384xf32> to vector<8x128xf32>
      %242 = vector.extract_strided_slice %238 {offsets = [0, 128], sizes = [8, 128], strides = [1, 1]} : vector<8x384xf32> to vector<8x128xf32>
      %243 = vector.extract_strided_slice %238 {offsets = [0, 256], sizes = [8, 128], strides = [1, 1]} : vector<8x384xf32> to vector<8x128xf32>
      %244 = arith.mulf %242, %216 : vector<8x128xf32>
      %245 = arith.mulf %241, %240 : vector<8x128xf32>
      %246 = arith.addf %244, %245 : vector<8x128xf32>
      %247 = math.tanh %246 : vector<8x128xf32>
      %248 = arith.mulf %243, %247 : vector<8x128xf32>
      %249 = arith.addi %3, %c7_i32 : i32
      %250 = vector.broadcast %249 : i32 to vector<8x1xi32>
      %251 = arith.cmpi eq, %11, %250 : vector<8x1xi32>
      %252 = vector.shape_cast %251 : vector<8x1xi1> to vector<8x1xi1>
      %253 = vector.broadcast %252 : vector<8x1xi1> to vector<8x128xi1>
      %254 = arith.select %253, %248, %224 : vector<8x128xi1>, vector<8x128xf32>
      %c8_i32_59 = arith.constant 8 : i32
      %c8_i32_60 = arith.constant 8 : i32
      %255 = arith.muli %c8_i32_59, %c8_i32_60 : i32
      %256 = tpu.assume_multiple %255, 8 : i32
      %257 = arith.index_cast %256 : i32 to index
      %c0_61 = arith.constant 0 : index
      %258 = vector.load %arg3[%257, %c0_61] : memref<128x512xf32, #tpu.memory_space<vmem>>, vector<8x512xf32>
      %259 = arith.truncf %248 : vector<8x128xf32> to vector<8x128xbf16>
      %c0_62 = arith.constant 0 : index
      %c0_63 = arith.constant 0 : index
      %260 = vector.load %arg4[%c0_62, %c0_63] : memref<128x512xbf16, #tpu.memory_space<vmem>>, vector<128x512xbf16>
      %cst_64 = arith.constant dense<0.000000e+00> : vector<8x512xf32>
      %261 = tpu.matmul %259, %260, %cst_64 {dimension_numbers = #tpu.dot_dimension_numbers<[1], [0], [0], [1], [0, 0, 1, 1], [], []>} : vector<8x128xbf16>, vector<128x512xbf16>, vector<8x512xf32> -> vector<8x512xf32>
      %262 = arith.addf %258, %261 : vector<8x512xf32>
      %263 = vector.extract_strided_slice %262 {offsets = [0, 0], sizes = [8, 384], strides = [1, 1]} : vector<8x512xf32> to vector<8x384xf32>
      %264 = arith.negf %263 : vector<8x384xf32>
      %265 = math.exp %264 : vector<8x384xf32>
      %cst_65 = arith.constant 1.000000e+00 : f32
      %266 = vector.broadcast %cst_65 : f32 to vector<8x384xf32>
      %267 = arith.addf %266, %265 : vector<8x384xf32>
      %268 = arith.divf %266, %267 : vector<8x384xf32>
      %269 = vector.extract_strided_slice %262 {offsets = [0, 384], sizes = [8, 128], strides = [1, 1]} : vector<8x512xf32> to vector<8x128xf32>
      %270 = math.tanh %269 : vector<8x128xf32>
      %271 = vector.extract_strided_slice %268 {offsets = [0, 0], sizes = [8, 128], strides = [1, 1]} : vector<8x384xf32> to vector<8x128xf32>
      %272 = vector.extract_strided_slice %268 {offsets = [0, 128], sizes = [8, 128], strides = [1, 1]} : vector<8x384xf32> to vector<8x128xf32>
      %273 = vector.extract_strided_slice %268 {offsets = [0, 256], sizes = [8, 128], strides = [1, 1]} : vector<8x384xf32> to vector<8x128xf32>
      %274 = arith.mulf %272, %246 : vector<8x128xf32>
      %275 = arith.mulf %271, %270 : vector<8x128xf32>
      %276 = arith.addf %274, %275 : vector<8x128xf32>
      %277 = math.tanh %276 : vector<8x128xf32>
      %278 = arith.mulf %273, %277 : vector<8x128xf32>
      %279 = arith.addi %3, %c8_i32_59 : i32
      %280 = vector.broadcast %279 : i32 to vector<8x1xi32>
      %281 = arith.cmpi eq, %11, %280 : vector<8x1xi32>
      %282 = vector.shape_cast %281 : vector<8x1xi1> to vector<8x1xi1>
      %283 = vector.broadcast %282 : vector<8x1xi1> to vector<8x128xi1>
      %284 = arith.select %283, %278, %254 : vector<8x128xi1>, vector<8x128xf32>
      %c9_i32 = arith.constant 9 : i32
      %c8_i32_66 = arith.constant 8 : i32
      %285 = arith.muli %c9_i32, %c8_i32_66 : i32
      %286 = tpu.assume_multiple %285, 8 : i32
      %287 = arith.index_cast %286 : i32 to index
      %c0_67 = arith.constant 0 : index
      %288 = vector.load %arg3[%287, %c0_67] : memref<128x512xf32, #tpu.memory_space<vmem>>, vector<8x512xf32>
      %289 = arith.truncf %278 : vector<8x128xf32> to vector<8x128xbf16>
      %c0_68 = arith.constant 0 : index
      %c0_69 = arith.constant 0 : index
      %290 = vector.load %arg4[%c0_68, %c0_69] : memref<128x512xbf16, #tpu.memory_space<vmem>>, vector<128x512xbf16>
      %cst_70 = arith.constant dense<0.000000e+00> : vector<8x512xf32>
      %291 = tpu.matmul %289, %290, %cst_70 {dimension_numbers = #tpu.dot_dimension_numbers<[1], [0], [0], [1], [0, 0, 1, 1], [], []>} : vector<8x128xbf16>, vector<128x512xbf16>, vector<8x512xf32> -> vector<8x512xf32>
      %292 = arith.addf %288, %291 : vector<8x512xf32>
      %293 = vector.extract_strided_slice %292 {offsets = [0, 0], sizes = [8, 384], strides = [1, 1]} : vector<8x512xf32> to vector<8x384xf32>
      %294 = arith.negf %293 : vector<8x384xf32>
      %295 = math.exp %294 : vector<8x384xf32>
      %cst_71 = arith.constant 1.000000e+00 : f32
      %296 = vector.broadcast %cst_71 : f32 to vector<8x384xf32>
      %297 = arith.addf %296, %295 : vector<8x384xf32>
      %298 = arith.divf %296, %297 : vector<8x384xf32>
      %299 = vector.extract_strided_slice %292 {offsets = [0, 384], sizes = [8, 128], strides = [1, 1]} : vector<8x512xf32> to vector<8x128xf32>
      %300 = math.tanh %299 : vector<8x128xf32>
      %301 = vector.extract_strided_slice %298 {offsets = [0, 0], sizes = [8, 128], strides = [1, 1]} : vector<8x384xf32> to vector<8x128xf32>
      %302 = vector.extract_strided_slice %298 {offsets = [0, 128], sizes = [8, 128], strides = [1, 1]} : vector<8x384xf32> to vector<8x128xf32>
      %303 = vector.extract_strided_slice %298 {offsets = [0, 256], sizes = [8, 128], strides = [1, 1]} : vector<8x384xf32> to vector<8x128xf32>
      %304 = arith.mulf %302, %276 : vector<8x128xf32>
      %305 = arith.mulf %301, %300 : vector<8x128xf32>
      %306 = arith.addf %304, %305 : vector<8x128xf32>
      %307 = math.tanh %306 : vector<8x128xf32>
      %308 = arith.mulf %303, %307 : vector<8x128xf32>
      %309 = arith.addi %3, %c9_i32 : i32
      %310 = vector.broadcast %309 : i32 to vector<8x1xi32>
      %311 = arith.cmpi eq, %11, %310 : vector<8x1xi32>
      %312 = vector.shape_cast %311 : vector<8x1xi1> to vector<8x1xi1>
      %313 = vector.broadcast %312 : vector<8x1xi1> to vector<8x128xi1>
      %314 = arith.select %313, %308, %284 : vector<8x128xi1>, vector<8x128xf32>
      %c10_i32 = arith.constant 10 : i32
      %c8_i32_72 = arith.constant 8 : i32
      %315 = arith.muli %c10_i32, %c8_i32_72 : i32
      %316 = tpu.assume_multiple %315, 8 : i32
      %317 = arith.index_cast %316 : i32 to index
      %c0_73 = arith.constant 0 : index
      %318 = vector.load %arg3[%317, %c0_73] : memref<128x512xf32, #tpu.memory_space<vmem>>, vector<8x512xf32>
      %319 = arith.truncf %308 : vector<8x128xf32> to vector<8x128xbf16>
      %c0_74 = arith.constant 0 : index
      %c0_75 = arith.constant 0 : index
      %320 = vector.load %arg4[%c0_74, %c0_75] : memref<128x512xbf16, #tpu.memory_space<vmem>>, vector<128x512xbf16>
      %cst_76 = arith.constant dense<0.000000e+00> : vector<8x512xf32>
      %321 = tpu.matmul %319, %320, %cst_76 {dimension_numbers = #tpu.dot_dimension_numbers<[1], [0], [0], [1], [0, 0, 1, 1], [], []>} : vector<8x128xbf16>, vector<128x512xbf16>, vector<8x512xf32> -> vector<8x512xf32>
      %322 = arith.addf %318, %321 : vector<8x512xf32>
      %323 = vector.extract_strided_slice %322 {offsets = [0, 0], sizes = [8, 384], strides = [1, 1]} : vector<8x512xf32> to vector<8x384xf32>
      %324 = arith.negf %323 : vector<8x384xf32>
      %325 = math.exp %324 : vector<8x384xf32>
      %cst_77 = arith.constant 1.000000e+00 : f32
      %326 = vector.broadcast %cst_77 : f32 to vector<8x384xf32>
      %327 = arith.addf %326, %325 : vector<8x384xf32>
      %328 = arith.divf %326, %327 : vector<8x384xf32>
      %329 = vector.extract_strided_slice %322 {offsets = [0, 384], sizes = [8, 128], strides = [1, 1]} : vector<8x512xf32> to vector<8x128xf32>
      %330 = math.tanh %329 : vector<8x128xf32>
      %331 = vector.extract_strided_slice %328 {offsets = [0, 0], sizes = [8, 128], strides = [1, 1]} : vector<8x384xf32> to vector<8x128xf32>
      %332 = vector.extract_strided_slice %328 {offsets = [0, 128], sizes = [8, 128], strides = [1, 1]} : vector<8x384xf32> to vector<8x128xf32>
      %333 = vector.extract_strided_slice %328 {offsets = [0, 256], sizes = [8, 128], strides = [1, 1]} : vector<8x384xf32> to vector<8x128xf32>
      %334 = arith.mulf %332, %306 : vector<8x128xf32>
      %335 = arith.mulf %331, %330 : vector<8x128xf32>
      %336 = arith.addf %334, %335 : vector<8x128xf32>
      %337 = math.tanh %336 : vector<8x128xf32>
      %338 = arith.mulf %333, %337 : vector<8x128xf32>
      %339 = arith.addi %3, %c10_i32 : i32
      %340 = vector.broadcast %339 : i32 to vector<8x1xi32>
      %341 = arith.cmpi eq, %11, %340 : vector<8x1xi32>
      %342 = vector.shape_cast %341 : vector<8x1xi1> to vector<8x1xi1>
      %343 = vector.broadcast %342 : vector<8x1xi1> to vector<8x128xi1>
      %344 = arith.select %343, %338, %314 : vector<8x128xi1>, vector<8x128xf32>
      %c11_i32 = arith.constant 11 : i32
      %c8_i32_78 = arith.constant 8 : i32
      %345 = arith.muli %c11_i32, %c8_i32_78 : i32
      %346 = tpu.assume_multiple %345, 8 : i32
      %347 = arith.index_cast %346 : i32 to index
      %c0_79 = arith.constant 0 : index
      %348 = vector.load %arg3[%347, %c0_79] : memref<128x512xf32, #tpu.memory_space<vmem>>, vector<8x512xf32>
      %349 = arith.truncf %338 : vector<8x128xf32> to vector<8x128xbf16>
      %c0_80 = arith.constant 0 : index
      %c0_81 = arith.constant 0 : index
      %350 = vector.load %arg4[%c0_80, %c0_81] : memref<128x512xbf16, #tpu.memory_space<vmem>>, vector<128x512xbf16>
      %cst_82 = arith.constant dense<0.000000e+00> : vector<8x512xf32>
      %351 = tpu.matmul %349, %350, %cst_82 {dimension_numbers = #tpu.dot_dimension_numbers<[1], [0], [0], [1], [0, 0, 1, 1], [], []>} : vector<8x128xbf16>, vector<128x512xbf16>, vector<8x512xf32> -> vector<8x512xf32>
      %352 = arith.addf %348, %351 : vector<8x512xf32>
      %353 = vector.extract_strided_slice %352 {offsets = [0, 0], sizes = [8, 384], strides = [1, 1]} : vector<8x512xf32> to vector<8x384xf32>
      %354 = arith.negf %353 : vector<8x384xf32>
      %355 = math.exp %354 : vector<8x384xf32>
      %cst_83 = arith.constant 1.000000e+00 : f32
      %356 = vector.broadcast %cst_83 : f32 to vector<8x384xf32>
      %357 = arith.addf %356, %355 : vector<8x384xf32>
      %358 = arith.divf %356, %357 : vector<8x384xf32>
      %359 = vector.extract_strided_slice %352 {offsets = [0, 384], sizes = [8, 128], strides = [1, 1]} : vector<8x512xf32> to vector<8x128xf32>
      %360 = math.tanh %359 : vector<8x128xf32>
      %361 = vector.extract_strided_slice %358 {offsets = [0, 0], sizes = [8, 128], strides = [1, 1]} : vector<8x384xf32> to vector<8x128xf32>
      %362 = vector.extract_strided_slice %358 {offsets = [0, 128], sizes = [8, 128], strides = [1, 1]} : vector<8x384xf32> to vector<8x128xf32>
      %363 = vector.extract_strided_slice %358 {offsets = [0, 256], sizes = [8, 128], strides = [1, 1]} : vector<8x384xf32> to vector<8x128xf32>
      %364 = arith.mulf %362, %336 : vector<8x128xf32>
      %365 = arith.mulf %361, %360 : vector<8x128xf32>
      %366 = arith.addf %364, %365 : vector<8x128xf32>
      %367 = math.tanh %366 : vector<8x128xf32>
      %368 = arith.mulf %363, %367 : vector<8x128xf32>
      %369 = arith.addi %3, %c11_i32 : i32
      %370 = vector.broadcast %369 : i32 to vector<8x1xi32>
      %371 = arith.cmpi eq, %11, %370 : vector<8x1xi32>
      %372 = vector.shape_cast %371 : vector<8x1xi1> to vector<8x1xi1>
      %373 = vector.broadcast %372 : vector<8x1xi1> to vector<8x128xi1>
      %374 = arith.select %373, %368, %344 : vector<8x128xi1>, vector<8x128xf32>
      %c12_i32 = arith.constant 12 : i32
      %c8_i32_84 = arith.constant 8 : i32
      %375 = arith.muli %c12_i32, %c8_i32_84 : i32
      %376 = tpu.assume_multiple %375, 8 : i32
      %377 = arith.index_cast %376 : i32 to index
      %c0_85 = arith.constant 0 : index
      %378 = vector.load %arg3[%377, %c0_85] : memref<128x512xf32, #tpu.memory_space<vmem>>, vector<8x512xf32>
      %379 = arith.truncf %368 : vector<8x128xf32> to vector<8x128xbf16>
      %c0_86 = arith.constant 0 : index
      %c0_87 = arith.constant 0 : index
      %380 = vector.load %arg4[%c0_86, %c0_87] : memref<128x512xbf16, #tpu.memory_space<vmem>>, vector<128x512xbf16>
      %cst_88 = arith.constant dense<0.000000e+00> : vector<8x512xf32>
      %381 = tpu.matmul %379, %380, %cst_88 {dimension_numbers = #tpu.dot_dimension_numbers<[1], [0], [0], [1], [0, 0, 1, 1], [], []>} : vector<8x128xbf16>, vector<128x512xbf16>, vector<8x512xf32> -> vector<8x512xf32>
      %382 = arith.addf %378, %381 : vector<8x512xf32>
      %383 = vector.extract_strided_slice %382 {offsets = [0, 0], sizes = [8, 384], strides = [1, 1]} : vector<8x512xf32> to vector<8x384xf32>
      %384 = arith.negf %383 : vector<8x384xf32>
      %385 = math.exp %384 : vector<8x384xf32>
      %cst_89 = arith.constant 1.000000e+00 : f32
      %386 = vector.broadcast %cst_89 : f32 to vector<8x384xf32>
      %387 = arith.addf %386, %385 : vector<8x384xf32>
      %388 = arith.divf %386, %387 : vector<8x384xf32>
      %389 = vector.extract_strided_slice %382 {offsets = [0, 384], sizes = [8, 128], strides = [1, 1]} : vector<8x512xf32> to vector<8x128xf32>
      %390 = math.tanh %389 : vector<8x128xf32>
      %391 = vector.extract_strided_slice %388 {offsets = [0, 0], sizes = [8, 128], strides = [1, 1]} : vector<8x384xf32> to vector<8x128xf32>
      %392 = vector.extract_strided_slice %388 {offsets = [0, 128], sizes = [8, 128], strides = [1, 1]} : vector<8x384xf32> to vector<8x128xf32>
      %393 = vector.extract_strided_slice %388 {offsets = [0, 256], sizes = [8, 128], strides = [1, 1]} : vector<8x384xf32> to vector<8x128xf32>
      %394 = arith.mulf %392, %366 : vector<8x128xf32>
      %395 = arith.mulf %391, %390 : vector<8x128xf32>
      %396 = arith.addf %394, %395 : vector<8x128xf32>
      %397 = math.tanh %396 : vector<8x128xf32>
      %398 = arith.mulf %393, %397 : vector<8x128xf32>
      %399 = arith.addi %3, %c12_i32 : i32
      %400 = vector.broadcast %399 : i32 to vector<8x1xi32>
      %401 = arith.cmpi eq, %11, %400 : vector<8x1xi32>
      %402 = vector.shape_cast %401 : vector<8x1xi1> to vector<8x1xi1>
      %403 = vector.broadcast %402 : vector<8x1xi1> to vector<8x128xi1>
      %404 = arith.select %403, %398, %374 : vector<8x128xi1>, vector<8x128xf32>
      %c13_i32 = arith.constant 13 : i32
      %c8_i32_90 = arith.constant 8 : i32
      %405 = arith.muli %c13_i32, %c8_i32_90 : i32
      %406 = tpu.assume_multiple %405, 8 : i32
      %407 = arith.index_cast %406 : i32 to index
      %c0_91 = arith.constant 0 : index
      %408 = vector.load %arg3[%407, %c0_91] : memref<128x512xf32, #tpu.memory_space<vmem>>, vector<8x512xf32>
      %409 = arith.truncf %398 : vector<8x128xf32> to vector<8x128xbf16>
      %c0_92 = arith.constant 0 : index
      %c0_93 = arith.constant 0 : index
      %410 = vector.load %arg4[%c0_92, %c0_93] : memref<128x512xbf16, #tpu.memory_space<vmem>>, vector<128x512xbf16>
      %cst_94 = arith.constant dense<0.000000e+00> : vector<8x512xf32>
      %411 = tpu.matmul %409, %410, %cst_94 {dimension_numbers = #tpu.dot_dimension_numbers<[1], [0], [0], [1], [0, 0, 1, 1], [], []>} : vector<8x128xbf16>, vector<128x512xbf16>, vector<8x512xf32> -> vector<8x512xf32>
      %412 = arith.addf %408, %411 : vector<8x512xf32>
      %413 = vector.extract_strided_slice %412 {offsets = [0, 0], sizes = [8, 384], strides = [1, 1]} : vector<8x512xf32> to vector<8x384xf32>
      %414 = arith.negf %413 : vector<8x384xf32>
      %415 = math.exp %414 : vector<8x384xf32>
      %cst_95 = arith.constant 1.000000e+00 : f32
      %416 = vector.broadcast %cst_95 : f32 to vector<8x384xf32>
      %417 = arith.addf %416, %415 : vector<8x384xf32>
      %418 = arith.divf %416, %417 : vector<8x384xf32>
      %419 = vector.extract_strided_slice %412 {offsets = [0, 384], sizes = [8, 128], strides = [1, 1]} : vector<8x512xf32> to vector<8x128xf32>
      %420 = math.tanh %419 : vector<8x128xf32>
      %421 = vector.extract_strided_slice %418 {offsets = [0, 0], sizes = [8, 128], strides = [1, 1]} : vector<8x384xf32> to vector<8x128xf32>
      %422 = vector.extract_strided_slice %418 {offsets = [0, 128], sizes = [8, 128], strides = [1, 1]} : vector<8x384xf32> to vector<8x128xf32>
      %423 = vector.extract_strided_slice %418 {offsets = [0, 256], sizes = [8, 128], strides = [1, 1]} : vector<8x384xf32> to vector<8x128xf32>
      %424 = arith.mulf %422, %396 : vector<8x128xf32>
      %425 = arith.mulf %421, %420 : vector<8x128xf32>
      %426 = arith.addf %424, %425 : vector<8x128xf32>
      %427 = math.tanh %426 : vector<8x128xf32>
      %428 = arith.mulf %423, %427 : vector<8x128xf32>
      %429 = arith.addi %3, %c13_i32 : i32
      %430 = vector.broadcast %429 : i32 to vector<8x1xi32>
      %431 = arith.cmpi eq, %11, %430 : vector<8x1xi32>
      %432 = vector.shape_cast %431 : vector<8x1xi1> to vector<8x1xi1>
      %433 = vector.broadcast %432 : vector<8x1xi1> to vector<8x128xi1>
      %434 = arith.select %433, %428, %404 : vector<8x128xi1>, vector<8x128xf32>
      %c14_i32 = arith.constant 14 : i32
      %c8_i32_96 = arith.constant 8 : i32
      %435 = arith.muli %c14_i32, %c8_i32_96 : i32
      %436 = tpu.assume_multiple %435, 8 : i32
      %437 = arith.index_cast %436 : i32 to index
      %c0_97 = arith.constant 0 : index
      %438 = vector.load %arg3[%437, %c0_97] : memref<128x512xf32, #tpu.memory_space<vmem>>, vector<8x512xf32>
      %439 = arith.truncf %428 : vector<8x128xf32> to vector<8x128xbf16>
      %c0_98 = arith.constant 0 : index
      %c0_99 = arith.constant 0 : index
      %440 = vector.load %arg4[%c0_98, %c0_99] : memref<128x512xbf16, #tpu.memory_space<vmem>>, vector<128x512xbf16>
      %cst_100 = arith.constant dense<0.000000e+00> : vector<8x512xf32>
      %441 = tpu.matmul %439, %440, %cst_100 {dimension_numbers = #tpu.dot_dimension_numbers<[1], [0], [0], [1], [0, 0, 1, 1], [], []>} : vector<8x128xbf16>, vector<128x512xbf16>, vector<8x512xf32> -> vector<8x512xf32>
      %442 = arith.addf %438, %441 : vector<8x512xf32>
      %443 = vector.extract_strided_slice %442 {offsets = [0, 0], sizes = [8, 384], strides = [1, 1]} : vector<8x512xf32> to vector<8x384xf32>
      %444 = arith.negf %443 : vector<8x384xf32>
      %445 = math.exp %444 : vector<8x384xf32>
      %cst_101 = arith.constant 1.000000e+00 : f32
      %446 = vector.broadcast %cst_101 : f32 to vector<8x384xf32>
      %447 = arith.addf %446, %445 : vector<8x384xf32>
      %448 = arith.divf %446, %447 : vector<8x384xf32>
      %449 = vector.extract_strided_slice %442 {offsets = [0, 384], sizes = [8, 128], strides = [1, 1]} : vector<8x512xf32> to vector<8x128xf32>
      %450 = math.tanh %449 : vector<8x128xf32>
      %451 = vector.extract_strided_slice %448 {offsets = [0, 0], sizes = [8, 128], strides = [1, 1]} : vector<8x384xf32> to vector<8x128xf32>
      %452 = vector.extract_strided_slice %448 {offsets = [0, 128], sizes = [8, 128], strides = [1, 1]} : vector<8x384xf32> to vector<8x128xf32>
      %453 = vector.extract_strided_slice %448 {offsets = [0, 256], sizes = [8, 128], strides = [1, 1]} : vector<8x384xf32> to vector<8x128xf32>
      %454 = arith.mulf %452, %426 : vector<8x128xf32>
      %455 = arith.mulf %451, %450 : vector<8x128xf32>
      %456 = arith.addf %454, %455 : vector<8x128xf32>
      %457 = math.tanh %456 : vector<8x128xf32>
      %458 = arith.mulf %453, %457 : vector<8x128xf32>
      %459 = arith.addi %3, %c14_i32 : i32
      %460 = vector.broadcast %459 : i32 to vector<8x1xi32>
      %461 = arith.cmpi eq, %11, %460 : vector<8x1xi32>
      %462 = vector.shape_cast %461 : vector<8x1xi1> to vector<8x1xi1>
      %463 = vector.broadcast %462 : vector<8x1xi1> to vector<8x128xi1>
      %464 = arith.select %463, %458, %434 : vector<8x128xi1>, vector<8x128xf32>
      %c15_i32 = arith.constant 15 : i32
      %c8_i32_102 = arith.constant 8 : i32
      %465 = arith.muli %c15_i32, %c8_i32_102 : i32
      %466 = tpu.assume_multiple %465, 8 : i32
      %467 = arith.index_cast %466 : i32 to index
      %c0_103 = arith.constant 0 : index
      %468 = vector.load %arg3[%467, %c0_103] : memref<128x512xf32, #tpu.memory_space<vmem>>, vector<8x512xf32>
      %469 = arith.truncf %458 : vector<8x128xf32> to vector<8x128xbf16>
      %c0_104 = arith.constant 0 : index
      %c0_105 = arith.constant 0 : index
      %470 = vector.load %arg4[%c0_104, %c0_105] : memref<128x512xbf16, #tpu.memory_space<vmem>>, vector<128x512xbf16>
      %cst_106 = arith.constant dense<0.000000e+00> : vector<8x512xf32>
      %471 = tpu.matmul %469, %470, %cst_106 {dimension_numbers = #tpu.dot_dimension_numbers<[1], [0], [0], [1], [0, 0, 1, 1], [], []>} : vector<8x128xbf16>, vector<128x512xbf16>, vector<8x512xf32> -> vector<8x512xf32>
      %472 = arith.addf %468, %471 : vector<8x512xf32>
      %473 = vector.extract_strided_slice %472 {offsets = [0, 0], sizes = [8, 384], strides = [1, 1]} : vector<8x512xf32> to vector<8x384xf32>
      %474 = arith.negf %473 : vector<8x384xf32>
      %475 = math.exp %474 : vector<8x384xf32>
      %cst_107 = arith.constant 1.000000e+00 : f32
      %476 = vector.broadcast %cst_107 : f32 to vector<8x384xf32>
      %477 = arith.addf %476, %475 : vector<8x384xf32>
      %478 = arith.divf %476, %477 : vector<8x384xf32>
      %479 = vector.extract_strided_slice %472 {offsets = [0, 384], sizes = [8, 128], strides = [1, 1]} : vector<8x512xf32> to vector<8x128xf32>
      %480 = math.tanh %479 : vector<8x128xf32>
      %481 = vector.extract_strided_slice %478 {offsets = [0, 0], sizes = [8, 128], strides = [1, 1]} : vector<8x384xf32> to vector<8x128xf32>
      %482 = vector.extract_strided_slice %478 {offsets = [0, 128], sizes = [8, 128], strides = [1, 1]} : vector<8x384xf32> to vector<8x128xf32>
      %483 = vector.extract_strided_slice %478 {offsets = [0, 256], sizes = [8, 128], strides = [1, 1]} : vector<8x384xf32> to vector<8x128xf32>
      %484 = arith.mulf %482, %456 : vector<8x128xf32>
      %485 = arith.mulf %481, %480 : vector<8x128xf32>
      %486 = arith.addf %484, %485 : vector<8x128xf32>
      %487 = math.tanh %486 : vector<8x128xf32>
      %488 = arith.mulf %483, %487 : vector<8x128xf32>
      %489 = arith.addi %3, %c15_i32 : i32
      %490 = vector.broadcast %489 : i32 to vector<8x1xi32>
      %491 = arith.cmpi eq, %11, %490 : vector<8x1xi32>
      %492 = vector.shape_cast %491 : vector<8x1xi1> to vector<8x1xi1>
      %493 = vector.broadcast %492 : vector<8x1xi1> to vector<8x128xi1>
      %494 = arith.select %493, %488, %464 : vector<8x128xi1>, vector<8x128xf32>
      %c16_i32_108 = arith.constant 16 : i32
      %c0_109 = arith.constant 0 : index
      %c0_110 = arith.constant 0 : index
      %495 = vector.load %arg8[%c0_109, %c0_110] : memref<8x128xf32, #tpu.memory_space<vmem>>, vector<8x128xf32>
      tpu.vector_store %arg8[%c0_109, %c0_110], %488 {strides = array<i32>} : memref<8x128xf32, #tpu.memory_space<vmem>>, vector<8x128xf32>,
      %c0_111 = arith.constant 0 : index
      %c0_112 = arith.constant 0 : index
      %496 = vector.load %arg9[%c0_111, %c0_112] : memref<8x128xf32, #tpu.memory_space<vmem>>, vector<8x128xf32>
      tpu.vector_store %arg9[%c0_111, %c0_112], %486 {strides = array<i32>} : memref<8x128xf32, #tpu.memory_space<vmem>>, vector<8x128xf32>,
      %c0_113 = arith.constant 0 : index
      %c0_114 = arith.constant 0 : index
      %497 = vector.load %arg10[%c0_113, %c0_114] : memref<8x128xf32, #tpu.memory_space<vmem>>, vector<8x128xf32>
      tpu.vector_store %arg10[%c0_113, %c0_114], %494 {strides = array<i32>} : memref<8x128xf32, #tpu.memory_space<vmem>>, vector<8x128xf32>,
    } else {
    }
    %c0_i32_2 = arith.constant 0 : i32
    %8 = arith.cmpi eq, %arg0, %c0_i32_2 : i32
    %9 = arith.extui %8 : i1 to i32
    %c0_i32_3 = arith.constant 0 : i32
    %10 = arith.cmpi ne, %9, %c0_i32_3 : i32
    scf.if %10 {
      %c0_4 = arith.constant 0 : index
      %c0_5 = arith.constant 0 : index
      %11 = vector.load %arg10[%c0_4, %c0_5] : memref<8x128xf32, #tpu.memory_space<vmem>>, vector<8x128xf32>
      %c0_6 = arith.constant 0 : index
      %c0_7 = arith.constant 0 : index
      %12 = vector.load %arg5[%c0_6, %c0_7] : memref<128x1xf32, #tpu.memory_space<vmem>>, vector<128x1xf32>
      %cst = arith.constant dense<0.000000e+00> : vector<8x1xf32>
      %13 = tpu.matmul %11, %12, %cst {dimension_numbers = #tpu.dot_dimension_numbers<[1], [0], [0], [1], [0, 0, 1, 1], [], []>} : vector<8x128xf32>, vector<128x1xf32>, vector<8x1xf32> -> vector<8x1xf32>
      %c0_8 = arith.constant 0 : index
      %c0_9 = arith.constant 0 : index
      %14 = vector.load %arg6[%c0_8, %c0_9] : memref<1x1xf32, #tpu.memory_space<vmem>>, vector<1x1xf32>
      %15 = vector.broadcast %14 : vector<1x1xf32> to vector<8x1xf32>
      %16 = arith.addf %13, %15 : vector<8x1xf32>
      %c0_10 = arith.constant 0 : index
      %c0_11 = arith.constant 0 : index
      %17 = vector.load %arg7[%c0_10, %c0_11] : memref<8x1xf32, #tpu.memory_space<vmem>>, vector<8x1xf32>
      tpu.vector_store %arg7[%c0_10, %c0_11], %16 {strides = array<i32>} : memref<8x1xf32, #tpu.memory_space<vmem>>, vector<8x1xf32>,
    } else {
    }
    return
  }
  func.func @transform_0(%arg0: i32, %arg1: memref<1xi32, #tpu.memory_space<smem>>) -> (i32, i32) {
    %c0_i32 = arith.constant 0 : i32
    %c0_i32_0 = arith.constant 0 : i32
    %c0_i32_1 = arith.constant 0 : i32
    return %c0_i32, %c0_i32_0 : i32, i32
  }
  func.func @transform_1(%arg0: i32, %arg1: memref<1xi32, #tpu.memory_space<smem>>) -> (i32, i32) {
    %c0_i32 = arith.constant 0 : i32
    %c0_i32_0 = arith.constant 0 : i32
    return %arg0, %c0_i32 : i32, i32
  }
  func.func @transform_2(%arg0: i32, %arg1: memref<1xi32, #tpu.memory_space<smem>>) -> (i32, i32) {
    %c0_i32 = arith.constant 0 : i32
    %c0_i32_0 = arith.constant 0 : i32
    %c0_i32_1 = arith.constant 0 : i32
    return %c0_i32, %c0_i32_0 : i32, i32
  }
  func.func @transform_3(%arg0: i32, %arg1: memref<1xi32, #tpu.memory_space<smem>>) -> (i32, i32) {
    %c0_i32 = arith.constant 0 : i32
    %c0_i32_0 = arith.constant 0 : i32
    %c0_i32_1 = arith.constant 0 : i32
    return %c0_i32, %c0_i32_0 : i32, i32
  }
  func.func @transform_4(%arg0: i32, %arg1: memref<1xi32, #tpu.memory_space<smem>>) -> (i32, i32) {
    %c0_i32 = arith.constant 0 : i32
    %c0_i32_0 = arith.constant 0 : i32
    %c0_i32_1 = arith.constant 0 : i32
    return %c0_i32, %c0_i32_0 : i32, i32
  }
  func.func @transform_5(%arg0: i32, %arg1: memref<1xi32, #tpu.memory_space<smem>>) -> (i32, i32) {
    %c0_i32 = arith.constant 0 : i32
    %c0_i32_0 = arith.constant 0 : i32
    %c0_i32_1 = arith.constant 0 : i32
    return %c0_i32, %c0_i32_0 : i32, i32
  }
}

</mosaic_0001>

<bundles_post_ra>
// kernel: tpu_custom_call.1
= control target key start
LH: loop header
LB: loop body
LE: loop exit
PB: predicated region body
PF: predicated region fallthrough
CT: control target
= control target key end

     0   :  { %s3884_s0 = inlined_call_operand.<no memory space> [shape: s32[1], index: 0, kind: input, shape index: {}]   ;;  %s3885_s1 = inlined_call_operand.vmem [shape: s32[8,1], index: 1, kind: input, shape index: {}]   ;;  %s3886_s2 = inlined_call_operand.hbm [shape: f32[128,512], index: 2, kind: input, shape index: {}]   ;;  %s3887_s3 = inlined_call_operand.hbm [shape: bf16[128,512], index: 3, kind: input, shape index: {}]   ;;  %s3888_s4 = inlined_call_operand.vmem [shape: f32[128,1], index: 4, kind: input, shape index: {}]   ;;  %s3889_s5 = inlined_call_operand.<no memory space> [shape: f32[1,1], index: 5, kind: input, shape index: {}]   ;;  %s3890_s6 = inlined_call_operand.vmem [shape: f32[8,1], index: 6, kind: output, shape index: {}]  }
   0x1   :  { %v12_v0 = vstv %s3889_s5 }
   0x2   :  { %13 = vst [vmem:[#allocation7] sm:$0x1] %v12_v0 }
   0x3   :  { %14 = vsyncpa [#allocation9], 0  ;;  %s22_s25 = sshll.u32 %s3886_s2, 4  ;;  %s23_s25 = int_to_ptr.hbm [resolvable:$true] %s22_s25 }
   0x4   :  { %15 = vsyncpa [#allocation11], 0  ;;  %s3043_s26 = smov [#allocation8]   ;;  %s35_s30 = sshll.u32 %s3887_s3, 4  ;;  %s36_s30 = int_to_ptr.hbm [resolvable:$true] %s35_s30 }
   0x5   :  { %s24_s27 = sshll.u32 %s3043_s26, 4  ;;  %s3044_s7 = smov 512   ;;  %s25_s27 = int_to_ptr.vmem [resolvable:$true] %s24_s27 }
   0x6   :  { %s3045_s8 = smov 32   ;;  %s3046_s5 = smov [#allocation10]  }
   0x7   :  { %30 = dma.hbm_to_vmem [thread:$0]  %s23_s25, 8192, %s25_s27, [#allocation9], %s3044_s7, %s3044_s7, %s3045_s8  }
   0x8   :  { %s37_s9 = sshll.u32 %s3046_s5, 4  ;;  %s3047_s10 = smov 256   ;;  %s38_s9 = int_to_ptr.vmem [resolvable:$true] %s37_s9 }
   0x9   :  { %s3048_s11 = smov 16  }
   0xa   :  { %43 = dma.hbm_to_vmem [thread:$0]  %s36_s30, 4096, %s38_s9, [#allocation11], %s3047_s10, %s3047_s10, %s3048_s11  }
   0xb   :  { %3039 = dma.done.wait [#allocation9], 8192  }
   0xc   :  { %3040 = vsyncadd [#allocation9], 4294959104 }
   0xd   :  { %3041 = dma.done.wait [#allocation11], 4096  }
   0xe   :  { %3042 = vsyncadd [#allocation11], 4294963200  ;;  %v3049_v1 = vmov 0.0   ;;  %p2511_p0 = scmp.le.s32.totalorder %s3884_s0, 0 }
   0xf   :  { %60 = vst [vmem:[#allocation2] sm:$0xff] %v3049_v1 }
  0x10   :  { %61 = vst [vmem:[#allocation3] sm:$0xff] %v3049_v1  ;;  %68 = sbr.rel (%p2511_p0) target bundleno = 2808 (0xaf8), region = 37 }
  0x11   :  { %62 = vst [vmem:[#allocation4] sm:$0xff] %v3049_v1 }
  0x15   :  { %v2626_v2 = vld [vmem:[#allocation10 + $0xe0] sm:$0xf]  ;;  %v2718_v3 = vld [vmem:[#allocation10 + $0xec] sm:$0xf0]  ;;  %v2716_v4 = vld [vmem:[#allocation10 + $0xe4] sm:$0xf] }
  0x16   :  { %v3098_v5 = vor.u32 %v2718_v3, %v2626_v2  ;;  %v2628_v6 = vld [vmem:[#allocation10 + $0xf0] sm:$0xf0]  ;;  %v2634_v7 = vld [vmem:[#allocation10 + $0xe8] sm:$0xf]  ;;  %v2719_v8 = vld [vmem:[#allocation10 + $0xf4] sm:$0xf0] }
  0x17   :  { %v3100_v9 = vor.u32 %v2716_v4, %v2628_v6  ;;  %v3102_v10 = vor.u32 %v2719_v8, %v2634_v7  ;;  %v2610_v11 = vld [vmem:[#allocation10 + $0xc0] sm:$0xf]  ;;  %v2714_v12 = vld [vmem:[#allocation10 + $0xcc] sm:$0xf0]  ;;  %v2712_v13 = vld [vmem:[#allocation10 + $0xc4] sm:$0xf] }
  0x18   :  { %273 = vmatpush.bf16.msra.mxu0 %v3098_v5  ;;  %v3105_v14 = vor.u32 %v2714_v12, %v2610_v11  ;;  %v2612_v15 = vld [vmem:[#allocation10 + $0xd0] sm:$0xf0]  ;;  %v2618_v16 = vld [vmem:[#allocation10 + $0xc8] sm:$0xf]  ;;  %v2715_v17 = vld [vmem:[#allocation10 + $0xd4] sm:$0xf0] }
  0x19   :  { %286 = vmatpush.bf16.msra.mxu1 %v3100_v9  ;;  %299 = vmatpush.bf16.msra.mxu2 %v3102_v10  ;;  %v3109_v18 = vor.u32 %v2712_v13, %v2612_v15  ;;  %v3111_v19 = vor.u32 %v2715_v17, %v2618_v16  ;;  %v2717_v20 = vld [vmem:[#allocation10 + $0xec] sm:$0xf]  ;;  %v2636_v21 = vld [vmem:[#allocation10 + $0xf8] sm:$0xf0]  ;;  %v2594_v22 = vld [vmem:[#allocation10 + $0xa0] sm:$0xf] }
  0x1a   :  { %v3113_v23 = vor.u32 %v2717_v20, %v2636_v21  ;;  %v2710_v24 = vld [vmem:[#allocation10 + $0xac] sm:$0xf0]  ;;  %v2708_v25 = vld [vmem:[#allocation10 + $0xa4] sm:$0xf]  ;;  %v2596_v26 = vld [vmem:[#allocation10 + $0xb0] sm:$0xf0] }
  0x1b   :  { %v2602_v27 = vld [vmem:[#allocation10 + $0xa8] sm:$0xf]  ;;  %v2711_v28 = vld [vmem:[#allocation10 + $0xb4] sm:$0xf0]  ;;  %v2713_v29 = vld [vmem:[#allocation10 + $0xcc] sm:$0xf]  ;;  %v3117_v30 = vor.u32 %v2710_v24, %v2594_v22  ;;  %v3121_v34 = vor.u32 %v2708_v25, %v2596_v26 }
  0x1c   :  { %274 = vmatpush.bf16.msra.mxu0 %v3105_v14  ;;  %312 = vmatpush.bf16.msra.mxu3 %v3113_v23  ;;  %v2620_v31 = vld [vmem:[#allocation10 + $0xd8] sm:$0xf0]  ;;  %v2578_v32 = vld [vmem:[#allocation10 + $0x80] sm:$0xf]  ;;  %v2706_v33 = vld [vmem:[#allocation10 + $0x8c] sm:$0xf0]  ;;  %v3123_v35 = vor.u32 %v2711_v28, %v2602_v27 }
  0x1d   :  { %287 = vmatpush.bf16.msra.mxu1 %v3109_v18  ;;  %300 = vmatpush.bf16.msra.mxu2 %v3111_v19  ;;  %v3125_v36 = vor.u32 %v2713_v29, %v2620_v31  ;;  %v2704_v37 = vld [vmem:[#allocation10 + $0x84] sm:$0xf]  ;;  %v2580_v38 = vld [vmem:[#allocation10 + $0x90] sm:$0xf0]  ;;  %v2586_v39 = vld [vmem:[#allocation10 + $0x88] sm:$0xf]  ;;  %v3129_v43 = vor.u32 %v2706_v33, %v2578_v32 }
  0x1e   :  { %v2707_v40 = vld [vmem:[#allocation10 + $0x94] sm:$0xf0]  ;;  %v2709_v41 = vld [vmem:[#allocation10 + $0xac] sm:$0xf]  ;;  %v2604_v42 = vld [vmem:[#allocation10 + $0xb8] sm:$0xf0]  ;;  %v3135_v47 = vor.u32 %v2704_v37, %v2580_v38 }
  0x1f   :  { %v3131_v44 = vor.u32 %v2709_v41, %v2604_v42  ;;  %v2562_v45 = vld [vmem:[#allocation10 + $0x60] sm:$0xf]  ;;  %v2702_v46 = vld [vmem:[#allocation10 + $0x6c] sm:$0xf0]  ;;  %v3137_v48 = vor.u32 %v2707_v40, %v2586_v39  ;;  %v2700_v49 = vld [vmem:[#allocation10 + $0x64] sm:$0xf] }
  0x20   :  { %275 = vmatpush.bf16.msra.mxu0 %v3117_v30  ;;  %313 = vmatpush.bf16.msra.mxu3 %v3125_v36  ;;  %v2705_v50 = vld [vmem:[#allocation10 + $0x8c] sm:$0xf]  ;;  %v2588_v51 = vld [vmem:[#allocation10 + $0x98] sm:$0xf0]  ;;  %v2564_v52 = vld [vmem:[#allocation10 + $0x70] sm:$0xf0]  ;;  %v3141_v55 = vor.u32 %v2702_v46, %v2562_v45 }
  0x21   :  { %288 = vmatpush.bf16.msra.mxu1 %v3121_v34  ;;  %301 = vmatpush.bf16.msra.mxu2 %v3123_v35  ;;  %v2570_v53 = vld [vmem:[#allocation10 + $0x68] sm:$0xf]  ;;  %v2703_v54 = vld [vmem:[#allocation10 + $0x74] sm:$0xf0]  ;;  %v3143_v56 = vor.u32 %v2705_v50, %v2588_v51  ;;  %v2546_v57 = vld [vmem:[#allocation10 + $0x40] sm:$0xf]  ;;  %v3147_v59 = vor.u32 %v2700_v49, %v2564_v52 }
  0x22   :  { %v2698_v58 = vld [vmem:[#allocation10 + $0x4c] sm:$0xf0]  ;;  %v3149_v60 = vor.u32 %v2703_v54, %v2570_v53  ;;  %v2696_v61 = vld [vmem:[#allocation10 + $0x44] sm:$0xf]  ;;  %v2701_v62 = vld [vmem:[#allocation10 + $0x6c] sm:$0xf] }
  0x23   :  { %v2572_v63 = vld [vmem:[#allocation10 + $0x78] sm:$0xf0]  ;;  %v2548_v0 = vld [vmem:[#allocation10 + $0x50] sm:$0xf0]  ;;  %v2554_v1 = vld [vmem:[#allocation10 + $0x48] sm:$0xf]  ;;  %v3153_v4 = vor.u32 %v2698_v58, %v2546_v57 }
  0x24   :  { %276 = vmatpush.bf16.msra.mxu0 %v3129_v43  ;;  %314 = vmatpush.bf16.msra.mxu3 %v3131_v44  ;;  %v2699_v2 = vld [vmem:[#allocation10 + $0x54] sm:$0xf0]  ;;  %v2530_v3 = vld [vmem:[#allocation10 + $0x20] sm:$0xf]  ;;  %v3155_v6 = vor.u32 %v2701_v62, %v2572_v63  ;;  %v2694_v7 = vld [vmem:[#allocation10 + $0x2c] sm:$0xf0]  ;;  %v3159_v12 = vor.u32 %v2696_v61, %v2548_v0 }
  0x25   :  { %289 = vmatpush.bf16.msra.mxu1 %v3135_v47  ;;  %302 = vmatpush.bf16.msra.mxu2 %v3137_v48  ;;  %v2692_v8 = vld [vmem:[#allocation10 + $0x24] sm:$0xf]  ;;  %v2532_v11 = vld [vmem:[#allocation10 + $0x30] sm:$0xf0]  ;;  %v3161_v13 = vor.u32 %v2699_v2, %v2554_v1  ;;  %v2697_v15 = vld [vmem:[#allocation10 + $0x4c] sm:$0xf]  ;;  %v3174_v24 = vor.u32 %v2694_v7, %v2530_v3 }
  0x26   :  { %v2556_v16 = vld [vmem:[#allocation10 + $0x58] sm:$0xf0]  ;;  %v2538_v17 = vld [vmem:[#allocation10 + $0x28] sm:$0xf]  ;;  %v2695_v20 = vld [vmem:[#allocation10 + $0x34] sm:$0xf0]  ;;  %v3181_v29 = vor.u32 %v2692_v8, %v2532_v11 }
  0x27   :  { %v3050_v21 = vmov 0   ;;  %v3167_v22 = vld [vmem:[%s3885_s1] sm:$0xff]  ;;  %v3176_v25 = vor.u32 %v2697_v15, %v2556_v16  ;;  %v2514_v26 = vld [vmem:[#allocation10] sm:$0xf]  ;;  %v2690_v27 = vld [vmem:[#allocation10 + $0xc] sm:$0xf0]  ;;  %v3183_v31 = vor.u32 %v2695_v20, %v2538_v17 }
  0x28   :  { %277 = vmatpush.bf16.msra.mxu0 %v3141_v55  ;;  %315 = vmatpush.bf16.msra.mxu3 %v3143_v56  ;;  %vm393_vm0 = vcmp.eq.s32.totalorder %v3167_v22, 0  ;;  %v2688_v32 = vld [vmem:[#allocation10 + $0x4] sm:$0xf]  ;;  %v2693_v33 = vld [vmem:[#allocation10 + $0x2c] sm:$0xf]  ;;  %v3187_v41 = vor.u32 %v2690_v27, %v2514_v26  ;;  %v78_v2 = vld [vmem:[#allocation8 + $0x10] sm:$0xff] }
  0x29   :  { %290 = vmatpush.bf16.msra.mxu1 %v3147_v59  ;;  %303 = vmatpush.bf16.msra.mxu2 %v3149_v60  ;;  %v394_v28 = vsel %vm393_vm0, 1, %v3050_v21  ;;  %v2540_v37 = vld [vmem:[#allocation10 + $0x38] sm:$0xf0]  ;;  %v2516_v38 = vld [vmem:[#allocation10 + $0x10] sm:$0xf0]  ;;  %v70_v42 = vld [vmem:[#allocation2] sm:$0xff] }
  0x2a   :  { %2728 = vset.pattern.permute.xlu0 %v3050_v21  ;;  %2729 = vset.pattern.permute.xlu1 %v3050_v21  ;;  %v2522_v39 = vld [vmem:[#allocation10 + $0x8] sm:$0xf]  ;;  %v2691_v40 = vld [vmem:[#allocation10 + $0x14] sm:$0xf0]  ;;  %v3189_v45 = vor.u32 %v2693_v33, %v2540_v37  ;;  %v3193_v46 = vor.u32 %v2688_v32, %v2516_v38  ;;  %v2689_v50 = vld [vmem:[#allocation10 + $0xc] sm:$0xf]  ;;  %v80_v52 = vpack.c.bf16 %v70_v42, %v70_v42 }
  0x2b   :  { %2730 = vset.pattern.permute.xlu2 %v3050_v21  ;;  %396 = vperm.xlu0 %2728, %v394_v28   ;;  %v3195_v49 = vor.u32 %v2691_v40, %v2522_v39  ;;  %v2524_v51 = vld [vmem:[#allocation10 + $0x18] sm:$0xf0]  ;;  %v76_v54 = vld [vmem:[#allocation8] sm:$0xff]  ;;  %v77_v57 = vld [vmem:[#allocation8 + $0x8] sm:$0xff]  ;;  %vm529_vm1 = vcmp.eq.s32.totalorder %v3167_v22, 1  ;;  %vm665_vm14 = vcmp.eq.s32.totalorder %v3167_v22, 2 }
  0x2c   :  { %278 = vmatpush.bf16.msra.mxu0 %v3153_v4  ;;  %316 = vmatpush.bf16.msra.mxu3 %v3155_v6  ;;  %v3201_v53 = vor.u32 %v2689_v50, %v2524_v51  ;;  %v79_v28 = vld [vmem:[#allocation8 + $0x18] sm:$0xff]  ;;  %v530_v33 = vsel %vm529_vm1, 1, %v3050_v21 }
  0x2d   :  { %291 = vmatpush.bf16.msra.mxu1 %v3159_v12  ;;  %304 = vmatpush.bf16.msra.mxu2 %v3161_v13 }
  0x30   :  { %279 = vmatpush.bf16.msra.mxu0 %v3174_v24  ;;  %317 = vmatpush.bf16.msra.mxu3 %v3176_v25 }
  0x31   :  { %292 = vmatpush.bf16.msra.mxu1 %v3181_v29  ;;  %305 = vmatpush.bf16.msra.mxu2 %v3183_v31 }
  0x33   :  { %532 = vperm.xlu0 %2728, %v530_v33  }
  0x34   :  { %280 = vmatpush.bf16.msra.mxu0 %v3187_v41  ;;  %318 = vmatpush.bf16.msra.mxu3 %v3189_v45 }
  0x35   :  { %293 = vmatpush.bf16.msra.mxu1 %v3193_v46  ;;  %306 = vmatpush.bf16.msra.mxu2 %v3195_v49 }
  0x37   :  { %281 = vmatmul.bf16.vlgmr.msra.gmra.mxu0 %v80_v52 }
  0x38   :  { %408 = vmatpush.bf16.msrb.mxu0 %v3098_v5  ;;  %294 = vmatmul.bf16.vlgmr.msra.gmra.mxu1 %v80_v52 }
  0x39   :  { %421 = vmatpush.bf16.msrb.mxu1 %v3100_v9  ;;  %434 = vmatpush.bf16.msrb.mxu2 %v3102_v10 }
  0x3a   :  { %307 = vmatmul.bf16.vlgmr.msra.gmra.mxu2 %v80_v52  ;;  %319 = vmatpush.bf16.msra.mxu3 %v3201_v53 }
  0x3c   :  { %409 = vmatpush.bf16.msrb.mxu0 %v3105_v14 }
  0x3d   :  { %422 = vmatpush.bf16.msrb.mxu1 %v3109_v18  ;;  %435 = vmatpush.bf16.msrb.mxu2 %v3111_v19 }
  0x3e   :  { %447 = vmatpush.bf16.msrb.mxu3 %v3113_v23 }
  0x3f   :  { %320 = vmatmul.bf16.vlgmr.msra.gmra.mxu3 %v80_v52 }
  0x40   :  { %410 = vmatpush.bf16.msrb.mxu0 %v3117_v30 }
  0x41   :  { %423 = vmatpush.bf16.msrb.mxu1 %v3121_v34  ;;  %436 = vmatpush.bf16.msrb.mxu2 %v3123_v35 }
  0x42   :  { %448 = vmatpush.bf16.msrb.mxu3 %v3125_v36 }
  0x44   :  { %411 = vmatpush.bf16.msrb.mxu0 %v3129_v43 }
  0x45   :  { %424 = vmatpush.bf16.msrb.mxu1 %v3135_v47  ;;  %437 = vmatpush.bf16.msrb.mxu2 %v3137_v48 }
  0x46   :  { %449 = vmatpush.bf16.msrb.mxu3 %v3131_v44 }
  0x48   :  { %412 = vmatpush.bf16.msrb.mxu0 %v3141_v55 }
  0x49   :  { %425 = vmatpush.bf16.msrb.mxu1 %v3147_v59  ;;  %438 = vmatpush.bf16.msrb.mxu2 %v3149_v60 }
  0x4a   :  { %450 = vmatpush.bf16.msrb.mxu3 %v3143_v56 }
  0x4c   :  { %413 = vmatpush.bf16.msrb.mxu0 %v3153_v4 }
  0x4d   :  { %426 = vmatpush.bf16.msrb.mxu1 %v3159_v12  ;;  %439 = vmatpush.bf16.msrb.mxu2 %v3161_v13 }
  0x4e   :  { %451 = vmatpush.bf16.msrb.mxu3 %v3155_v6 }
  0x50   :  { %414 = vmatpush.bf16.msrb.mxu0 %v3174_v24 }
  0x51   :  { %427 = vmatpush.bf16.msrb.mxu1 %v3181_v29  ;;  %440 = vmatpush.bf16.msrb.mxu2 %v3183_v31 }
  0x52   :  { %452 = vmatpush.bf16.msrb.mxu3 %v3176_v25 }
  0x54   :  { %415 = vmatpush.bf16.msrb.mxu0 %v3187_v41 }
  0x55   :  { %428 = vmatpush.bf16.msrb.mxu1 %v3193_v46  ;;  %441 = vmatpush.bf16.msrb.mxu2 %v3195_v49 }
  0x56   :  { %453 = vmatpush.bf16.msrb.mxu3 %v3189_v45 }
  0x58   :  { %544 = vmatpush.bf16.msra.mxu0 %v3098_v5 }
  0x59   :  { %557 = vmatpush.bf16.msra.mxu1 %v3100_v9  ;;  %570 = vmatpush.bf16.msra.mxu2 %v3102_v10 }
  0x5a   :  { %454 = vmatpush.bf16.msrb.mxu3 %v3201_v53 }
  0x5c   :  { %545 = vmatpush.bf16.msra.mxu0 %v3105_v14 }
  0x5d   :  { %558 = vmatpush.bf16.msra.mxu1 %v3109_v18  ;;  %571 = vmatpush.bf16.msra.mxu2 %v3111_v19 }
  0x5e   :  { %583 = vmatpush.bf16.msra.mxu3 %v3113_v23 }
  0x60   :  { %546 = vmatpush.bf16.msra.mxu0 %v3117_v30 }
  0x61   :  { %559 = vmatpush.bf16.msra.mxu1 %v3121_v34  ;;  %572 = vmatpush.bf16.msra.mxu2 %v3123_v35 }
  0x62   :  { %584 = vmatpush.bf16.msra.mxu3 %v3125_v36 }
  0x64   :  { %547 = vmatpush.bf16.msra.mxu0 %v3129_v43 }
  0x65   :  { %560 = vmatpush.bf16.msra.mxu1 %v3135_v47  ;;  %573 = vmatpush.bf16.msra.mxu2 %v3137_v48 }
  0x66   :  { %585 = vmatpush.bf16.msra.mxu3 %v3131_v44 }
  0x68   :  { %548 = vmatpush.bf16.msra.mxu0 %v3141_v55 }
  0x69   :  { %561 = vmatpush.bf16.msra.mxu1 %v3147_v59  ;;  %574 = vmatpush.bf16.msra.mxu2 %v3149_v60 }
  0x6a   :  { %586 = vmatpush.bf16.msra.mxu3 %v3143_v56 }
  0x6c   :  { %549 = vmatpush.bf16.msra.mxu0 %v3153_v4 }
  0x6d   :  { %562 = vmatpush.bf16.msra.mxu1 %v3159_v12  ;;  %575 = vmatpush.bf16.msra.mxu2 %v3161_v13 }
  0x6e   :  { %587 = vmatpush.bf16.msra.mxu3 %v3155_v6 }
  0x70   :  { %550 = vmatpush.bf16.msra.mxu0 %v3174_v24 }
  0x71   :  { %563 = vmatpush.bf16.msra.mxu1 %v3181_v29  ;;  %576 = vmatpush.bf16.msra.mxu2 %v3183_v31 }
  0x72   :  { %588 = vmatpush.bf16.msra.mxu3 %v3176_v25 }
  0x74   :  { %551 = vmatpush.bf16.msra.mxu0 %v3187_v41 }
  0x75   :  { %564 = vmatpush.bf16.msra.mxu1 %v3193_v46  ;;  %577 = vmatpush.bf16.msra.mxu2 %v3195_v49 }
  0x76   :  { %589 = vmatpush.bf16.msra.mxu3 %v3189_v45 }
  0x7a   :  { %590 = vmatpush.bf16.msra.mxu3 %v3201_v53 }
  0xb4   :  { %v282_v58 = vpop.f32.mrf.mxu0 }
  0xb5   :  { %v325_v61 = vadd.f32 %v282_v58, %v76_v54  ;;  %v295_v62 = vpop.f32.mrf.mxu1 }
  0xb6   :  { %v326_v63 = vadd.f32 %v295_v62, %v77_v57 }
  0xb7   :  { %v2640_v0 = vmul.f32 -1.442695, %v325_v61 }
  0xb8   :  { %v2641_v1 = vmul.f32 -1.442695, %v326_v63 }
  0xb9   :  { %2731 = vpow2.f32 %v2640_v0 }
  0xba   :  { %2733 = vpow2.f32 %v2641_v1 }
  0xbc   :  { %v284_v8 = vpop.f32.mrf.mxu0 }
  0xbd   :  { %v308_v3 = vpop.f32.mrf.mxu2  ;;  %v297_v11 = vpop.f32.mrf.mxu1 }
  0xbe   :  { %v327_v7 = vadd.f32 %v308_v3, %v78_v2 }
  0xbf   :  { %v2732_v16 = vpop.eup %2731 }
  0xc0   :  { %v2642_v15 = vmul.f32 -1.442695, %v327_v7  ;;  %v2734_v20 = vpop.eup %2733  ;;  %v338_v26 = vadd.f32 1.0, %v2732_v16 }
  0xc1   :  { %v339_v27 = vadd.f32 1.0, %v2734_v20 }
  0xc2   :  { %v321_v17 = vpop.f32.mrf.mxu3  ;;  %2735 = vpow2.f32 %v2642_v15  ;;  %v352_v58 = vand.u32 2147483648, %v338_v26  ;;  %v350_v63 = vand.u32 2147483647, %v338_v26  ;;  %vm346_vm4 = vweird.f32 %v338_v26 }
  0xc3   :  { %2737 = vrcp.f32 %v338_v26  ;;  %v328_v38 = vadd.f32 %v321_v17, %v79_v28  ;;  %v367_v61 = vand.u32 2147483648, %v339_v27  ;;  %v365_v1 = vand.u32 2147483647, %v339_v27  ;;  %v71_v17 = vld [vmem:[#allocation3] sm:$0xff] }
  0xc4   :  { %2739 = vrcp.f32 %v339_v27  ;;  %vm361_vm5 = vweird.f32 %v339_v27  ;;  %v353_v11 = vor.u32 1.1754944e-38, %v352_v58  ;;  %vm351_vm8 = vcmp.eq.f32.partialorder %v350_v63, 8.507059e+37  ;;  %v404_v63 = vld [vmem:[#allocation8 + $0x28] sm:$0xff] }
  0xc5   :  { %v310_v32 = vpop.f32.mrf.mxu2  ;;  %v368_v16 = vor.u32 1.1754944e-38, %v367_v61  ;;  %vm366_vm9 = vcmp.eq.f32.partialorder %v365_v1, 8.507059e+37 }
  0xc8   :  { %v2736_v37 = vpop.eup %2735 }
  0xc9   :  { %v340_v39 = vadd.f32 1.0, %v2736_v37  ;;  %v2738_v42 = vpop.eup %2737 }
  0xca   :  { %v323_v40 = vpop.f32.mrf.mxu3  ;;  %v2740_v50 = vpop.eup %2739  ;;  %v342_v51 = vmul.f32 %v2738_v42, %v338_v26  ;;  %vm347_vm2 = vweird.f32 %v2738_v42 }
  0xcb   :  { %2741 = vrcp.f32 %v340_v39  ;;  %v357_v52 = vmul.f32 %v2740_v50, %v339_v27  ;;  %vm362_vm3 = vweird.f32 %v2740_v50  ;;  %vm348_vm6 = vmor %vm346_vm4, %vm347_vm2  ;;  %vm376_vm11 = vweird.f32 %v340_v39 }
  0xcc   :  { %2743 = vtanh.f32 %v328_v38  ;;  %v343_v54 = vsub.f32 1.0, %v342_v51  ;;  %vm363_vm7 = vmor %vm361_vm5, %vm362_vm3 }
  0xcd   :  { %v358_v57 = vsub.f32 1.0, %v357_v52  ;;  %v382_v52 = vand.u32 2147483648, %v340_v39 }
  0xce   :  { %v344_v62 = vmul.f32 %v2738_v42, %v343_v54  ;;  %v380_v54 = vand.u32 2147483647, %v340_v39 }
  0xcf   :  { %v359_v0 = vmul.f32 %v2740_v50, %v358_v57  ;;  %v383_v57 = vor.u32 1.1754944e-38, %v382_v52  ;;  %v406_v52 = vld [vmem:[#allocation8 + $0x38] sm:$0xff] }
  0xd0   :  { %v345_v3 = vadd.f32 %v2738_v42, %v344_v62  ;;  %vm381_vm13 = vcmp.eq.f32.partialorder %v380_v54, 8.507059e+37  ;;  %v666_v54 = vsel %vm665_vm14, 1, %v3050_v21 }
  0xd1   :  { %v2742_v2 = vpop.eup %2741  ;;  %v360_v15 = vadd.f32 %v2740_v50, %v359_v0  ;;  %668 = vperm.xlu1 %2729, %v666_v54  }
  0xd2   :  { %v2744_v7 = vpop.eup %2743  ;;  %v372_v8 = vmul.f32 %v2742_v2, %v340_v39  ;;  %v349_v20 = vsel %vm348_vm6, %v2738_v42, %v345_v3  ;;  %vm377_vm10 = vweird.f32 %v2742_v2  ;;  %v403_v39 = vld [vmem:[#allocation8 + $0x20] sm:$0xff] }
  0xd3   :  { %v354_v32 = vsel %vm351_vm8, %v353_v11, %v349_v20  ;;  %v364_v33 = vsel %vm363_vm7, %v2740_v50, %v360_v15  ;;  %vm378_vm12 = vmor %vm376_vm11, %vm377_vm10  ;;  %v405_v11 = vld [vmem:[#allocation8 + $0x30] sm:$0xff] }
  0xd4   :  { %v373_v28 = vsub.f32 1.0, %v372_v8  ;;  %v369_v37 = vsel %vm366_vm9, %v368_v16, %v364_v33  ;;  %v388_v38 = vmul.f32 %v2744_v7, %v354_v32 }
  0xd5   :  { %v387_v40 = vmul.f32 %v369_v37, %v71_v17 }
  0xd6   :  { %v374_v51 = vmul.f32 %v2742_v2, %v373_v28 }
  0xd7   :  { %v3270_v26 = vadd.f32 %v388_v38, %v387_v40 }
  0xd8   :  { %v375_v27 = vadd.f32 %v2742_v2, %v374_v51 }
  0xd9   :  { %2745 = vtanh.f32 %v3270_v26 }
  0xda   :  { %v379_v42 = vsel %vm378_vm12, %v2742_v2, %v375_v27 }
  0xdb   :  { %v384_v50 = vsel %vm381_vm13, %v383_v57, %v379_v42  ;;  %vm801_vm13 = vcmp.eq.s32.totalorder %v3167_v22, 3 }
  0xdf   :  { %v2746_v58 = vpop.eup %2745 }
  0xe0   :  { %v3273_v61 = vmul.f32 %v2746_v58, %v384_v50 }
  0xe2   :  { %v407_v62 = vpack.c.bf16 %v3273_v61, %v3273_v61 }
  0xe4   :  { %416 = vmatmul.bf16.vlgmr.msrb.gmra.mxu0 %v407_v62  ;;  %429 = vmatmul.bf16.vlgmr.msrb.gmra.mxu1 %v407_v62 }
  0xe5   :  { %442 = vmatmul.bf16.vlgmr.msrb.gmra.mxu2 %v407_v62  ;;  %455 = vmatmul.bf16.vlgmr.msrb.gmra.mxu3 %v407_v62 }
  0xe6   :  { %680 = vmatpush.bf16.msrb.mxu0 %v3098_v5  ;;  %693 = vmatpush.bf16.msrb.mxu1 %v3100_v9 }
  0xe7   :  { %706 = vmatpush.bf16.msrb.mxu2 %v3102_v10  ;;  %719 = vmatpush.bf16.msrb.mxu3 %v3113_v23 }
  0xea   :  { %681 = vmatpush.bf16.msrb.mxu0 %v3105_v14  ;;  %694 = vmatpush.bf16.msrb.mxu1 %v3109_v18 }
  0xeb   :  { %707 = vmatpush.bf16.msrb.mxu2 %v3111_v19  ;;  %720 = vmatpush.bf16.msrb.mxu3 %v3125_v36 }
  0xee   :  { %682 = vmatpush.bf16.msrb.mxu0 %v3117_v30  ;;  %695 = vmatpush.bf16.msrb.mxu1 %v3121_v34 }
  0xef   :  { %708 = vmatpush.bf16.msrb.mxu2 %v3123_v35  ;;  %721 = vmatpush.bf16.msrb.mxu3 %v3131_v44 }
  0xf2   :  { %683 = vmatpush.bf16.msrb.mxu0 %v3129_v43  ;;  %696 = vmatpush.bf16.msrb.mxu1 %v3135_v47 }
  0xf3   :  { %709 = vmatpush.bf16.msrb.mxu2 %v3137_v48  ;;  %722 = vmatpush.bf16.msrb.mxu3 %v3143_v56 }
  0xf6   :  { %684 = vmatpush.bf16.msrb.mxu0 %v3141_v55  ;;  %697 = vmatpush.bf16.msrb.mxu1 %v3147_v59 }
  0xf7   :  { %710 = vmatpush.bf16.msrb.mxu2 %v3149_v60  ;;  %723 = vmatpush.bf16.msrb.mxu3 %v3155_v6 }
  0xfa   :  { %685 = vmatpush.bf16.msrb.mxu0 %v3153_v4  ;;  %698 = vmatpush.bf16.msrb.mxu1 %v3159_v12 }
  0xfb   :  { %711 = vmatpush.bf16.msrb.mxu2 %v3161_v13  ;;  %724 = vmatpush.bf16.msrb.mxu3 %v3176_v25 }
  0xfe   :  { %686 = vmatpush.bf16.msrb.mxu0 %v3174_v24  ;;  %699 = vmatpush.bf16.msrb.mxu1 %v3181_v29 }
  0xff   :  { %712 = vmatpush.bf16.msrb.mxu2 %v3183_v31  ;;  %725 = vmatpush.bf16.msrb.mxu3 %v3189_v45 }
 0x102   :  { %687 = vmatpush.bf16.msrb.mxu0 %v3187_v41  ;;  %700 = vmatpush.bf16.msrb.mxu1 %v3193_v46 }
 0x103   :  { %713 = vmatpush.bf16.msrb.mxu2 %v3195_v49  ;;  %726 = vmatpush.bf16.msrb.mxu3 %v3201_v53 }
 0x161   :  { %v417_v0 = vpop.f32.mrf.mxu0  ;;  %v430_v1 = vpop.f32.mrf.mxu1 }
 0x162   :  { %v460_v2 = vadd.f32 %v417_v0, %v403_v39  ;;  %v461_v3 = vadd.f32 %v430_v1, %v404_v63 }
 0x164   :  { %v2643_v7 = vmul.f32 -1.442695, %v460_v2  ;;  %v2644_v8 = vmul.f32 -1.442695, %v461_v3 }
 0x166   :  { %2747 = vpow2.f32 %v2643_v7 }
 0x167   :  { %2749 = vpow2.f32 %v2644_v8 }
 0x168   :  { %v443_v15 = vpop.f32.mrf.mxu2  ;;  %v456_v16 = vpop.f32.mrf.mxu3 }
 0x169   :  { %v462_v17 = vadd.f32 %v443_v15, %v405_v11  ;;  %v419_v20 = vpop.f32.mrf.mxu0  ;;  %v432_v28 = vpop.f32.mrf.mxu1  ;;  %v463_v50 = vadd.f32 %v456_v16, %v406_v52 }
 0x16b   :  { %v2645_v32 = vmul.f32 -1.442695, %v462_v17 }
 0x16c   :  { %v2748_v33 = vpop.eup %2747 }
 0x16d   :  { %v2750_v37 = vpop.eup %2749  ;;  %v473_v38 = vadd.f32 1.0, %v2748_v33  ;;  %2751 = vpow2.f32 %v2645_v32 }
 0x16e   :  { %v474_v40 = vadd.f32 1.0, %v2750_v37 }
 0x16f   :  { %2753 = vrcp.f32 %v473_v38  ;;  %v487_v2 = vand.u32 2147483648, %v473_v38  ;;  %v485_v8 = vand.u32 2147483647, %v473_v38  ;;  %vm481_vm1 = vweird.f32 %v473_v38 }
 0x170   :  { %2755 = vrcp.f32 %v474_v40  ;;  %v445_v51 = vpop.f32.mrf.mxu2  ;;  %v458_v27 = vpop.f32.mrf.mxu3  ;;  %v502_v3 = vand.u32 2147483648, %v474_v40  ;;  %v500_v15 = vand.u32 2147483647, %v474_v40  ;;  %vm496_vm2 = vweird.f32 %v474_v40 }
 0x171   :  { %v488_v28 = vor.u32 1.1754944e-38, %v487_v2  ;;  %vm486_vm5 = vcmp.eq.f32.partialorder %v485_v8, 8.507059e+37 }
 0x172   :  { %v503_v33 = vor.u32 1.1754944e-38, %v502_v3  ;;  %vm501_vm6 = vcmp.eq.f32.partialorder %v500_v15, 8.507059e+37 }
 0x173   :  { %v2752_v42 = vpop.eup %2751 }
 0x174   :  { %v475_v57 = vadd.f32 1.0, %v2752_v42  ;;  %v397_v42 = vpop.permute.xlu0 %396 }
 0x175   :  { %v2754_v58 = vpop.eup %2753  ;;  %vm398_vm10 = vcmp.eq.s32.totalorder %v397_v42, 1 }
 0x176   :  { %v2756_v62 = vpop.eup %2755  ;;  %v477_v39 = vmul.f32 %v2754_v58, %v473_v38  ;;  %2757 = vrcp.f32 %v475_v57  ;;  %vm482_vm15 = vweird.f32 %v2754_v58  ;;  %vm511_vm8 = vweird.f32 %v475_v57 }
 0x177   :  { %v492_v63 = vmul.f32 %v2756_v62, %v474_v40  ;;  %2759 = vtanh.f32 %v463_v50  ;;  %vm497_vm0 = vweird.f32 %v2756_v62  ;;  %vm483_vm3 = vmor %vm481_vm1, %vm482_vm15 }
 0x178   :  { %v478_v0 = vsub.f32 1.0, %v477_v39  ;;  %vm498_vm4 = vmor %vm496_vm2, %vm497_vm0 }
 0x179   :  { %v493_v1 = vsub.f32 1.0, %v492_v63 }
 0x17a   :  { %v479_v7 = vmul.f32 %v2754_v58, %v478_v0 }
 0x17b   :  { %v494_v11 = vmul.f32 %v2756_v62, %v493_v1  ;;  %v517_v1 = vand.u32 2147483648, %v475_v57 }
 0x17c   :  { %v2758_v17 = vpop.eup %2757  ;;  %v480_v20 = vadd.f32 %v2754_v58, %v479_v7  ;;  %v533_v3 = vpop.permute.xlu0 %532  ;;  %v72_v7 = vld [vmem:[#allocation4] sm:$0xff] }
 0x17d   :  { %v507_v16 = vmul.f32 %v2758_v17, %v475_v57  ;;  %v495_v32 = vadd.f32 %v2756_v62, %v494_v11  ;;  %v2760_v51 = vpop.eup %2759  ;;  %vm512_vm7 = vweird.f32 %v2758_v17  ;;  %vm534_vm12 = vcmp.eq.s32.totalorder %v533_v3, 1 }
 0x17e   :  { %v484_v37 = vsel %vm483_vm3, %v2754_v58, %v480_v20  ;;  %v515_v58 = vand.u32 2147483647, %v475_v57  ;;  %vm513_vm9 = vmor %vm511_vm8, %vm512_vm7  ;;  %v399_v15 = vsel %vm398_vm10, %v3273_v61, %v72_v7  ;;  %v539_v61 = vld [vmem:[#allocation8 + $0x40] sm:$0xff]  ;;  %v540_v57 = vld [vmem:[#allocation8 + $0x48] sm:$0xff]  ;;  %v802_v7 = vsel %vm801_vm13, 1, %v3050_v21 }
 0x17f   :  { %v508_v27 = vsub.f32 1.0, %v507_v16  ;;  %v489_v52 = vsel %vm486_vm5, %v488_v28, %v484_v37  ;;  %v499_v54 = vsel %vm498_vm4, %v2756_v62, %v495_v32  ;;  %v518_v62 = vor.u32 1.1754944e-38, %v517_v1  ;;  %804 = vperm.xlu1 %2729, %v802_v7  }
 0x180   :  { %v504_v50 = vsel %vm501_vm6, %v503_v33, %v499_v54  ;;  %v523_v39 = vmul.f32 %v2760_v51, %v489_v52  ;;  %vm516_vm11 = vcmp.eq.f32.partialorder %v515_v58, 8.507059e+37 }
 0x181   :  { %v522_v63 = vmul.f32 %v504_v50, %v3270_v26  ;;  %v509_v38 = vmul.f32 %v2758_v17, %v508_v27  ;;  %v541_v27 = vld [vmem:[#allocation8 + $0x50] sm:$0xff] }
 0x183   :  { %v3312_v40 = vadd.f32 %v523_v39, %v522_v63  ;;  %v510_v0 = vadd.f32 %v2758_v17, %v509_v38 }
 0x185   :  { %2761 = vtanh.f32 %v3312_v40  ;;  %v514_v2 = vsel %vm513_vm9, %v2758_v17, %v510_v0 }
 0x186   :  { %v519_v11 = vsel %vm516_vm11, %v518_v62, %v514_v2  ;;  %v542_v62 = vld [vmem:[#allocation8 + $0x58] sm:$0xff]  ;;  %vm937_vm11 = vcmp.eq.s32.totalorder %v3167_v22, 4 }
 0x18b   :  { %v2762_v8 = vpop.eup %2761 }
 0x18c   :  { %v526_v26 = vmul.f32 %v2762_v8, %v519_v11 }
 0x18e   :  { %v3316_v20 = vsel %vm534_vm12, %v526_v26, %v399_v15  ;;  %v543_v16 = vpack.c.bf16 %v526_v26, %v526_v26 }
 0x190   :  { %552 = vmatmul.bf16.vlgmr.msra.gmra.mxu0 %v543_v16  ;;  %565 = vmatmul.bf16.vlgmr.msra.gmra.mxu1 %v543_v16 }
 0x191   :  { %578 = vmatmul.bf16.vlgmr.msra.gmra.mxu2 %v543_v16  ;;  %591 = vmatmul.bf16.vlgmr.msra.gmra.mxu3 %v543_v16 }
 0x192   :  { %816 = vmatpush.bf16.msra.mxu0 %v3098_v5  ;;  %829 = vmatpush.bf16.msra.mxu1 %v3100_v9 }
 0x193   :  { %842 = vmatpush.bf16.msra.mxu2 %v3102_v10  ;;  %855 = vmatpush.bf16.msra.mxu3 %v3113_v23 }
 0x196   :  { %817 = vmatpush.bf16.msra.mxu0 %v3105_v14  ;;  %830 = vmatpush.bf16.msra.mxu1 %v3109_v18 }
 0x197   :  { %843 = vmatpush.bf16.msra.mxu2 %v3111_v19  ;;  %856 = vmatpush.bf16.msra.mxu3 %v3125_v36 }
 0x19a   :  { %818 = vmatpush.bf16.msra.mxu0 %v3117_v30  ;;  %831 = vmatpush.bf16.msra.mxu1 %v3121_v34 }
 0x19b   :  { %844 = vmatpush.bf16.msra.mxu2 %v3123_v35  ;;  %857 = vmatpush.bf16.msra.mxu3 %v3131_v44 }
 0x19e   :  { %819 = vmatpush.bf16.msra.mxu0 %v3129_v43  ;;  %832 = vmatpush.bf16.msra.mxu1 %v3135_v47 }
 0x19f   :  { %845 = vmatpush.bf16.msra.mxu2 %v3137_v48  ;;  %858 = vmatpush.bf16.msra.mxu3 %v3143_v56 }
 0x1a2   :  { %820 = vmatpush.bf16.msra.mxu0 %v3141_v55  ;;  %833 = vmatpush.bf16.msra.mxu1 %v3147_v59 }
 0x1a3   :  { %846 = vmatpush.bf16.msra.mxu2 %v3149_v60  ;;  %859 = vmatpush.bf16.msra.mxu3 %v3155_v6 }
 0x1a6   :  { %821 = vmatpush.bf16.msra.mxu0 %v3153_v4  ;;  %834 = vmatpush.bf16.msra.mxu1 %v3159_v12 }
 0x1a7   :  { %847 = vmatpush.bf16.msra.mxu2 %v3161_v13  ;;  %860 = vmatpush.bf16.msra.mxu3 %v3176_v25 }
 0x1aa   :  { %822 = vmatpush.bf16.msra.mxu0 %v3174_v24  ;;  %835 = vmatpush.bf16.msra.mxu1 %v3181_v29 }
 0x1ab   :  { %848 = vmatpush.bf16.msra.mxu2 %v3183_v31  ;;  %861 = vmatpush.bf16.msra.mxu3 %v3189_v45 }
 0x1ae   :  { %823 = vmatpush.bf16.msra.mxu0 %v3187_v41  ;;  %836 = vmatpush.bf16.msra.mxu1 %v3193_v46 }
 0x1af   :  { %849 = vmatpush.bf16.msra.mxu2 %v3195_v49  ;;  %862 = vmatpush.bf16.msra.mxu3 %v3201_v53 }
 0x20d   :  { %v553_v17 = vpop.f32.mrf.mxu0  ;;  %v566_v28 = vpop.f32.mrf.mxu1 }
 0x20e   :  { %v596_v32 = vadd.f32 %v553_v17, %v539_v61  ;;  %v597_v33 = vadd.f32 %v566_v28, %v540_v57 }
 0x210   :  { %v2646_v37 = vmul.f32 -1.442695, %v596_v32  ;;  %v2647_v51 = vmul.f32 -1.442695, %v597_v33 }
 0x212   :  { %2763 = vpow2.f32 %v2646_v37 }
 0x213   :  { %2765 = vpow2.f32 %v2647_v51 }
 0x214   :  { %v579_v52 = vpop.f32.mrf.mxu2  ;;  %v592_v54 = vpop.f32.mrf.mxu3 }
 0x215   :  { %v598_v42 = vadd.f32 %v579_v52, %v541_v27  ;;  %v555_v50 = vpop.f32.mrf.mxu0  ;;  %v568_v39 = vpop.f32.mrf.mxu1  ;;  %v599_v15 = vadd.f32 %v592_v54, %v542_v62 }
 0x217   :  { %v2648_v63 = vmul.f32 -1.442695, %v598_v42 }
 0x218   :  { %v2764_v38 = vpop.eup %2763 }
 0x219   :  { %v2766_v0 = vpop.eup %2765  ;;  %v609_v1 = vadd.f32 1.0, %v2764_v38  ;;  %2767 = vpow2.f32 %v2648_v63 }
 0x21a   :  { %v610_v58 = vadd.f32 1.0, %v2766_v0 }
 0x21b   :  { %2769 = vrcp.f32 %v609_v1  ;;  %v623_v32 = vand.u32 2147483648, %v609_v1  ;;  %v621_v51 = vand.u32 2147483647, %v609_v1  ;;  %vm617_vm0 = vweird.f32 %v609_v1 }
 0x21c   :  { %2771 = vrcp.f32 %v610_v58  ;;  %v581_v2 = vpop.f32.mrf.mxu2  ;;  %v594_v3 = vpop.f32.mrf.mxu3  ;;  %v638_v33 = vand.u32 2147483648, %v610_v58  ;;  %v636_v52 = vand.u32 2147483647, %v610_v58  ;;  %vm632_vm1 = vweird.f32 %v610_v58 }
 0x21d   :  { %v624_v39 = vor.u32 1.1754944e-38, %v623_v32  ;;  %vm622_vm4 = vcmp.eq.f32.partialorder %v621_v51, 8.507059e+37  ;;  %v669_v32 = vpop.permute.xlu1 %668 }
 0x21e   :  { %v639_v38 = vor.u32 1.1754944e-38, %v638_v33  ;;  %vm637_vm5 = vcmp.eq.f32.partialorder %v636_v52, 8.507059e+37  ;;  %vm670_vm10 = vcmp.eq.s32.totalorder %v669_v32, 1  ;;  %v938_v32 = vsel %vm937_vm11, 1, %v3050_v21 }
 0x21f   :  { %v2768_v8 = vpop.eup %2767  ;;  %940 = vperm.xlu2 %2730, %v938_v32  }
 0x220   :  { %v611_v11 = vadd.f32 1.0, %v2768_v8 }
 0x221   :  { %v2770_v26 = vpop.eup %2769 }
 0x222   :  { %v2772_v16 = vpop.eup %2771  ;;  %v613_v61 = vmul.f32 %v2770_v26, %v609_v1  ;;  %2773 = vrcp.f32 %v611_v11  ;;  %vm618_vm14 = vweird.f32 %v2770_v26  ;;  %vm647_vm7 = vweird.f32 %v611_v11 }
 0x223   :  { %v628_v57 = vmul.f32 %v2772_v16, %v610_v58  ;;  %2775 = vtanh.f32 %v599_v15  ;;  %vm633_vm15 = vweird.f32 %v2772_v16  ;;  %vm619_vm2 = vmor %vm617_vm0, %vm618_vm14 }
 0x224   :  { %v614_v17 = vsub.f32 1.0, %v613_v61  ;;  %vm634_vm3 = vmor %vm632_vm1, %vm633_vm15 }
 0x225   :  { %v629_v28 = vsub.f32 1.0, %v628_v57 }
 0x226   :  { %v615_v37 = vmul.f32 %v2770_v26, %v614_v17  ;;  %v653_v17 = vand.u32 2147483648, %v611_v11 }
 0x227   :  { %v630_v27 = vmul.f32 %v2772_v16, %v629_v28 }
 0x228   :  { %v2774_v42 = vpop.eup %2773  ;;  %v616_v50 = vadd.f32 %v2770_v26, %v615_v37  ;;  %v654_v33 = vor.u32 1.1754944e-38, %v653_v17 }
 0x229   :  { %v643_v54 = vmul.f32 %v2774_v42, %v611_v11  ;;  %v631_v63 = vadd.f32 %v2772_v16, %v630_v27  ;;  %v2776_v2 = vpop.eup %2775  ;;  %vm648_vm6 = vweird.f32 %v2774_v42 }
 0x22a   :  { %v620_v0 = vsel %vm619_vm2, %v2770_v26, %v616_v50  ;;  %v651_v26 = vand.u32 2147483647, %v611_v11  ;;  %vm649_vm8 = vmor %vm647_vm7, %vm648_vm6  ;;  %v676_v11 = vld [vmem:[#allocation8 + $0x68] sm:$0xff] }
 0x22b   :  { %v644_v3 = vsub.f32 1.0, %v643_v54  ;;  %v625_v62 = vsel %vm622_vm4, %v624_v39, %v620_v0  ;;  %v635_v7 = vsel %vm634_vm3, %v2772_v16, %v631_v63 }
 0x22c   :  { %v640_v8 = vsel %vm637_vm5, %v639_v38, %v635_v7  ;;  %v659_v15 = vmul.f32 %v2776_v2, %v625_v62  ;;  %vm652_vm9 = vcmp.eq.f32.partialorder %v651_v26, 8.507059e+37  ;;  %v677_v38 = vld [vmem:[#allocation8 + $0x70] sm:$0xff] }
 0x22d   :  { %v658_v61 = vmul.f32 %v640_v8, %v3312_v40  ;;  %v645_v57 = vmul.f32 %v2774_v42, %v644_v3 }
 0x22f   :  { %v3353_v1 = vadd.f32 %v659_v15, %v658_v61  ;;  %v646_v58 = vadd.f32 %v2774_v42, %v645_v57 }
 0x231   :  { %2777 = vtanh.f32 %v3353_v1  ;;  %v650_v28 = vsel %vm649_vm8, %v2774_v42, %v646_v58 }
 0x232   :  { %v655_v37 = vsel %vm652_vm9, %v654_v33, %v650_v28  ;;  %v678_v28 = vld [vmem:[#allocation8 + $0x78] sm:$0xff] }
 0x237   :  { %v2778_v16 = vpop.eup %2777 }
 0x238   :  { %v662_v51 = vmul.f32 %v2778_v16, %v655_v37 }
 0x23a   :  { %v3357_v40 = vsel %vm670_vm10, %v662_v51, %v3316_v20  ;;  %v679_v27 = vpack.c.bf16 %v662_v51, %v662_v51  ;;  %v675_v20 = vld [vmem:[#allocation8 + $0x60] sm:$0xff] }
 0x23c   :  { %688 = vmatmul.bf16.vlgmr.msrb.gmra.mxu0 %v679_v27  ;;  %701 = vmatmul.bf16.vlgmr.msrb.gmra.mxu1 %v679_v27 }
 0x23d   :  { %714 = vmatmul.bf16.vlgmr.msrb.gmra.mxu2 %v679_v27  ;;  %727 = vmatmul.bf16.vlgmr.msrb.gmra.mxu3 %v679_v27 }
 0x23e   :  { %952 = vmatpush.bf16.msrb.mxu0 %v3098_v5  ;;  %965 = vmatpush.bf16.msrb.mxu1 %v3100_v9 }
 0x23f   :  { %978 = vmatpush.bf16.msrb.mxu2 %v3102_v10  ;;  %991 = vmatpush.bf16.msrb.mxu3 %v3113_v23 }
 0x242   :  { %953 = vmatpush.bf16.msrb.mxu0 %v3105_v14  ;;  %966 = vmatpush.bf16.msrb.mxu1 %v3109_v18 }
 0x243   :  { %979 = vmatpush.bf16.msrb.mxu2 %v3111_v19  ;;  %992 = vmatpush.bf16.msrb.mxu3 %v3125_v36 }
 0x246   :  { %954 = vmatpush.bf16.msrb.mxu0 %v3117_v30  ;;  %967 = vmatpush.bf16.msrb.mxu1 %v3121_v34 }
 0x247   :  { %980 = vmatpush.bf16.msrb.mxu2 %v3123_v35  ;;  %993 = vmatpush.bf16.msrb.mxu3 %v3131_v44 }
 0x24a   :  { %955 = vmatpush.bf16.msrb.mxu0 %v3129_v43  ;;  %968 = vmatpush.bf16.msrb.mxu1 %v3135_v47 }
 0x24b   :  { %981 = vmatpush.bf16.msrb.mxu2 %v3137_v48  ;;  %994 = vmatpush.bf16.msrb.mxu3 %v3143_v56 }
 0x24e   :  { %956 = vmatpush.bf16.msrb.mxu0 %v3141_v55  ;;  %969 = vmatpush.bf16.msrb.mxu1 %v3147_v59 }
 0x24f   :  { %982 = vmatpush.bf16.msrb.mxu2 %v3149_v60  ;;  %995 = vmatpush.bf16.msrb.mxu3 %v3155_v6 }
 0x252   :  { %957 = vmatpush.bf16.msrb.mxu0 %v3153_v4  ;;  %970 = vmatpush.bf16.msrb.mxu1 %v3159_v12 }
 0x253   :  { %983 = vmatpush.bf16.msrb.mxu2 %v3161_v13  ;;  %996 = vmatpush.bf16.msrb.mxu3 %v3176_v25 }
 0x256   :  { %958 = vmatpush.bf16.msrb.mxu0 %v3174_v24  ;;  %971 = vmatpush.bf16.msrb.mxu1 %v3181_v29 }
 0x257   :  { %984 = vmatpush.bf16.msrb.mxu2 %v3183_v31  ;;  %997 = vmatpush.bf16.msrb.mxu3 %v3189_v45 }
 0x25a   :  { %959 = vmatpush.bf16.msrb.mxu0 %v3187_v41  ;;  %972 = vmatpush.bf16.msrb.mxu1 %v3193_v46 }
 0x25b   :  { %985 = vmatpush.bf16.msrb.mxu2 %v3195_v49  ;;  %998 = vmatpush.bf16.msrb.mxu3 %v3201_v53 }
 0x2b9   :  { %v689_v52 = vpop.f32.mrf.mxu0  ;;  %v702_v42 = vpop.f32.mrf.mxu1 }
 0x2ba   :  { %v732_v50 = vadd.f32 %v689_v52, %v675_v20  ;;  %v733_v54 = vadd.f32 %v702_v42, %v676_v11 }
 0x2bc   :  { %v2649_v39 = vmul.f32 -1.442695, %v732_v50  ;;  %v2650_v63 = vmul.f32 -1.442695, %v733_v54 }
 0x2be   :  { %2779 = vpow2.f32 %v2649_v39 }
 0x2bf   :  { %2781 = vpow2.f32 %v2650_v63 }
 0x2c0   :  { %v715_v0 = vpop.f32.mrf.mxu2  ;;  %v728_v2 = vpop.f32.mrf.mxu3 }
 0x2c1   :  { %v734_v3 = vadd.f32 %v715_v0, %v677_v38  ;;  %v691_v62 = vpop.f32.mrf.mxu0  ;;  %v704_v7 = vpop.f32.mrf.mxu1  ;;  %v735_v51 = vadd.f32 %v728_v2, %v678_v28 }
 0x2c3   :  { %v2651_v8 = vmul.f32 -1.442695, %v734_v3 }
 0x2c4   :  { %v2780_v15 = vpop.eup %2779 }
 0x2c5   :  { %v2782_v61 = vpop.eup %2781  ;;  %v745_v57 = vadd.f32 1.0, %v2780_v15  ;;  %2783 = vpow2.f32 %v2651_v8 }
 0x2c6   :  { %v746_v58 = vadd.f32 1.0, %v2782_v61 }
 0x2c7   :  { %2785 = vrcp.f32 %v745_v57  ;;  %v759_v50 = vand.u32 2147483648, %v745_v57  ;;  %v757_v22 = vand.u32 2147483647, %v745_v57  ;;  %vm753_vm14 = vweird.f32 %v745_v57 }
 0x2c8   :  { %2787 = vrcp.f32 %v746_v58  ;;  %v717_v17 = vpop.f32.mrf.mxu2  ;;  %v730_v26 = vpop.f32.mrf.mxu3  ;;  %v774_v54 = vand.u32 2147483648, %v746_v58  ;;  %v772_v38 = vand.u32 2147483647, %v746_v58  ;;  %vm768_vm15 = vweird.f32 %v746_v58 }
 0x2c9   :  { %v760_v62 = vor.u32 1.1754944e-38, %v759_v50  ;;  %vm758_vm2 = vcmp.eq.f32.partialorder %v757_v22, 8.507059e+37 }
 0x2ca   :  { %v775_v8 = vor.u32 1.1754944e-38, %v774_v54  ;;  %vm773_vm3 = vcmp.eq.f32.partialorder %v772_v38, 8.507059e+37 }
 0x2cb   :  { %v2784_v33 = vpop.eup %2783 }
 0x2cc   :  { %v747_v16 = vadd.f32 1.0, %v2784_v33 }
 0x2cd   :  { %v2786_v37 = vpop.eup %2785 }
 0x2ce   :  { %v2788_v27 = vpop.eup %2787  ;;  %v749_v20 = vmul.f32 %v2786_v37, %v745_v57  ;;  %2789 = vrcp.f32 %v747_v16  ;;  %vm754_vm12 = vweird.f32 %v2786_v37  ;;  %vm783_vm5 = vweird.f32 %v747_v16 }
 0x2cf   :  { %v764_v11 = vmul.f32 %v2788_v27, %v746_v58  ;;  %2791 = vtanh.f32 %v735_v51  ;;  %vm769_vm13 = vweird.f32 %v2788_v27  ;;  %vm755_vm0 = vmor %vm753_vm14, %vm754_vm12 }
 0x2d0   :  { %v750_v52 = vsub.f32 1.0, %v749_v20  ;;  %vm770_vm1 = vmor %vm768_vm15, %vm769_vm13 }
 0x2d1   :  { %v765_v42 = vsub.f32 1.0, %v764_v11  ;;  %v789_v11 = vand.u32 2147483648, %v747_v16 }
 0x2d2   :  { %v751_v39 = vmul.f32 %v2786_v37, %v750_v52 }
 0x2d3   :  { %v766_v63 = vmul.f32 %v2788_v27, %v765_v42  ;;  %v805_v42 = vpop.permute.xlu1 %804  ;;  %v790_v50 = vor.u32 1.1754944e-38, %v789_v11 }
 0x2d4   :  { %v2790_v0 = vpop.eup %2789  ;;  %v752_v3 = vadd.f32 %v2786_v37, %v751_v39  ;;  %vm806_vm8 = vcmp.eq.s32.totalorder %v805_v42, 1 }
 0x2d5   :  { %v779_v2 = vmul.f32 %v2790_v0, %v747_v16  ;;  %v767_v7 = vadd.f32 %v2788_v27, %v766_v63  ;;  %v2792_v61 = vpop.eup %2791  ;;  %vm784_vm4 = vweird.f32 %v2790_v0 }
 0x2d6   :  { %v756_v15 = vsel %vm755_vm0, %v2786_v37, %v752_v3  ;;  %v787_v37 = vand.u32 2147483647, %v747_v16  ;;  %vm785_vm6 = vmor %vm783_vm5, %vm784_vm4  ;;  %v812_v16 = vld [vmem:[#allocation8 + $0x88] sm:$0xff] }
 0x2d7   :  { %v780_v17 = vsub.f32 1.0, %v779_v2  ;;  %v761_v26 = vsel %vm758_vm2, %v760_v62, %v756_v15  ;;  %v771_v28 = vsel %vm770_vm1, %v2788_v27, %v767_v7  ;;  %v813_v7 = vld [vmem:[#allocation8 + $0x90] sm:$0xff] }
 0x2d8   :  { %v776_v32 = vsel %vm773_vm3, %v775_v8, %v771_v28  ;;  %v795_v33 = vmul.f32 %v2792_v61, %v761_v26  ;;  %vm788_vm7 = vcmp.eq.f32.partialorder %v787_v37, 8.507059e+37  ;;  %v3435_v37 = vld [vmem:[%s3885_s1] sm:$0xff] }
 0x2d9   :  { %v794_v51 = vmul.f32 %v776_v32, %v3353_v1  ;;  %v781_v20 = vmul.f32 %v2790_v0, %v780_v17  ;;  %vm1073_vm9 = vcmp.eq.s32.totalorder %v3435_v37, 5 }
 0x2da   :  { %v1074_v42 = vsel %vm1073_vm9, 1, %v3050_v21 }
 0x2db   :  { %v3394_v57 = vadd.f32 %v795_v33, %v794_v51  ;;  %v782_v58 = vadd.f32 %v2790_v0, %v781_v20  ;;  %1076 = vperm.xlu2 %2730, %v1074_v42  }
 0x2dd   :  { %2793 = vtanh.f32 %v3394_v57  ;;  %v786_v52 = vsel %vm785_vm6, %v2790_v0, %v782_v58 }
 0x2de   :  { %v791_v54 = vsel %vm788_vm7, %v790_v50, %v786_v52  ;;  %v814_v52 = vld [vmem:[#allocation8 + $0x98] sm:$0xff]  ;;  %vm1209_vm7 = vcmp.eq.s32.totalorder %v3435_v37, 6 }
 0x2e3   :  { %v2794_v27 = vpop.eup %2793 }
 0x2e4   :  { %v798_v39 = vmul.f32 %v2794_v27, %v791_v54 }
 0x2e6   :  { %v3398_v1 = vsel %vm806_vm8, %v798_v39, %v3357_v40  ;;  %v815_v22 = vpack.c.bf16 %v798_v39, %v798_v39  ;;  %v811_v40 = vld [vmem:[#allocation8 + $0x80] sm:$0xff] }
 0x2e8   :  { %824 = vmatmul.bf16.vlgmr.msra.gmra.mxu0 %v815_v22  ;;  %837 = vmatmul.bf16.vlgmr.msra.gmra.mxu1 %v815_v22 }
 0x2e9   :  { %850 = vmatmul.bf16.vlgmr.msra.gmra.mxu2 %v815_v22  ;;  %863 = vmatmul.bf16.vlgmr.msra.gmra.mxu3 %v815_v22 }
 0x2ea   :  { %1088 = vmatpush.bf16.msra.mxu0 %v3098_v5  ;;  %1101 = vmatpush.bf16.msra.mxu1 %v3100_v9 }
 0x2eb   :  { %1114 = vmatpush.bf16.msra.mxu2 %v3102_v10  ;;  %1127 = vmatpush.bf16.msra.mxu3 %v3113_v23 }
 0x2ee   :  { %1089 = vmatpush.bf16.msra.mxu0 %v3105_v14  ;;  %1102 = vmatpush.bf16.msra.mxu1 %v3109_v18 }
 0x2ef   :  { %1115 = vmatpush.bf16.msra.mxu2 %v3111_v19  ;;  %1128 = vmatpush.bf16.msra.mxu3 %v3125_v36 }
 0x2f2   :  { %1090 = vmatpush.bf16.msra.mxu0 %v3117_v30  ;;  %1103 = vmatpush.bf16.msra.mxu1 %v3121_v34 }
 0x2f3   :  { %1116 = vmatpush.bf16.msra.mxu2 %v3123_v35  ;;  %1129 = vmatpush.bf16.msra.mxu3 %v3131_v44 }
 0x2f6   :  { %1091 = vmatpush.bf16.msra.mxu0 %v3129_v43  ;;  %1104 = vmatpush.bf16.msra.mxu1 %v3135_v47 }
 0x2f7   :  { %1117 = vmatpush.bf16.msra.mxu2 %v3137_v48  ;;  %1130 = vmatpush.bf16.msra.mxu3 %v3143_v56 }
 0x2fa   :  { %1092 = vmatpush.bf16.msra.mxu0 %v3141_v55  ;;  %1105 = vmatpush.bf16.msra.mxu1 %v3147_v59 }
 0x2fb   :  { %1118 = vmatpush.bf16.msra.mxu2 %v3149_v60  ;;  %1131 = vmatpush.bf16.msra.mxu3 %v3155_v6 }
 0x2fe   :  { %1093 = vmatpush.bf16.msra.mxu0 %v3153_v4  ;;  %1106 = vmatpush.bf16.msra.mxu1 %v3159_v12 }
 0x2ff   :  { %1119 = vmatpush.bf16.msra.mxu2 %v3161_v13  ;;  %1132 = vmatpush.bf16.msra.mxu3 %v3176_v25 }
 0x302   :  { %1094 = vmatpush.bf16.msra.mxu0 %v3174_v24  ;;  %1107 = vmatpush.bf16.msra.mxu1 %v3181_v29 }
 0x303   :  { %1120 = vmatpush.bf16.msra.mxu2 %v3183_v31  ;;  %1133 = vmatpush.bf16.msra.mxu3 %v3189_v45 }
 0x306   :  { %1095 = vmatpush.bf16.msra.mxu0 %v3187_v41  ;;  %1108 = vmatpush.bf16.msra.mxu1 %v3193_v46 }
 0x307   :  { %1121 = vmatpush.bf16.msra.mxu2 %v3195_v49  ;;  %1134 = vmatpush.bf16.msra.mxu3 %v3201_v53 }
 0x365   :  { %v825_v63 = vpop.f32.mrf.mxu0  ;;  %v838_v38 = vpop.f32.mrf.mxu1 }
 0x366   :  { %v868_v0 = vadd.f32 %v825_v63, %v811_v40  ;;  %v869_v3 = vadd.f32 %v838_v38, %v812_v16 }
 0x368   :  { %v2652_v2 = vmul.f32 -1.442695, %v868_v0  ;;  %v2653_v62 = vmul.f32 -1.442695, %v869_v3 }
 0x36a   :  { %2795 = vpow2.f32 %v2652_v2 }
 0x36b   :  { %2797 = vpow2.f32 %v2653_v62 }
 0x36c   :  { %v851_v8 = vpop.f32.mrf.mxu2  ;;  %v864_v15 = vpop.f32.mrf.mxu3 }
 0x36d   :  { %v870_v61 = vadd.f32 %v851_v8, %v813_v7  ;;  %v827_v17 = vpop.f32.mrf.mxu0  ;;  %v840_v26 = vpop.f32.mrf.mxu1  ;;  %v871_v39 = vadd.f32 %v864_v15, %v814_v52 }
 0x36f   :  { %v2654_v28 = vmul.f32 -1.442695, %v870_v61 }
 0x370   :  { %v2796_v32 = vpop.eup %2795 }
 0x371   :  { %v2798_v33 = vpop.eup %2797  ;;  %v881_v51 = vadd.f32 1.0, %v2796_v32  ;;  %2799 = vpow2.f32 %v2654_v28 }
 0x372   :  { %v882_v20 = vadd.f32 1.0, %v2798_v33 }
 0x373   :  { %2801 = vrcp.f32 %v881_v51  ;;  %v895_v0 = vand.u32 2147483648, %v881_v51  ;;  %v893_v62 = vand.u32 2147483647, %v881_v51  ;;  %vm889_vm12 = vweird.f32 %v881_v51 }
 0x374   :  { %2803 = vrcp.f32 %v882_v20  ;;  %v853_v58 = vpop.f32.mrf.mxu2  ;;  %v866_v11 = vpop.f32.mrf.mxu3  ;;  %v910_v3 = vand.u32 2147483648, %v882_v20  ;;  %v908_v8 = vand.u32 2147483647, %v882_v20  ;;  %vm904_vm13 = vweird.f32 %v882_v20 }
 0x375   :  { %v896_v26 = vor.u32 1.1754944e-38, %v895_v0  ;;  %vm894_vm0 = vcmp.eq.f32.partialorder %v893_v62, 8.507059e+37  ;;  %v941_v0 = vpop.permute.xlu2 %940 }
 0x376   :  { %v911_v32 = vor.u32 1.1754944e-38, %v910_v3  ;;  %vm909_vm1 = vcmp.eq.f32.partialorder %v908_v8, 8.507059e+37  ;;  %vm942_vm6 = vcmp.eq.s32.totalorder %v941_v0, 1  ;;  %v1210_v0 = vsel %vm1209_vm7, 1, %v3050_v21 }
 0x377   :  { %v2800_v50 = vpop.eup %2799  ;;  %1212 = vperm.xlu0 %2728, %v1210_v0  }
 0x378   :  { %v883_v27 = vadd.f32 1.0, %v2800_v50 }
 0x379   :  { %v2802_v54 = vpop.eup %2801 }
 0x37a   :  { %v2804_v22 = vpop.eup %2803  ;;  %v885_v40 = vmul.f32 %v2802_v54, %v881_v51  ;;  %2805 = vrcp.f32 %v883_v27  ;;  %vm890_vm10 = vweird.f32 %v2802_v54  ;;  %vm919_vm3 = vweird.f32 %v883_v27 }
 0x37b   :  { %v900_v16 = vmul.f32 %v2804_v22, %v882_v20  ;;  %2807 = vtanh.f32 %v871_v39  ;;  %vm905_vm11 = vweird.f32 %v2804_v22  ;;  %vm891_vm14 = vmor %vm889_vm12, %vm890_vm10 }
 0x37c   :  { %v886_v63 = vsub.f32 1.0, %v885_v40  ;;  %vm906_vm15 = vmor %vm904_vm13, %vm905_vm11 }
 0x37d   :  { %v901_v38 = vsub.f32 1.0, %v900_v16 }
 0x37e   :  { %v887_v2 = vmul.f32 %v2802_v54, %v886_v63  ;;  %v925_v63 = vand.u32 2147483648, %v883_v27 }
 0x37f   :  { %v902_v7 = vmul.f32 %v2804_v22, %v901_v38 }
 0x380   :  { %v2806_v61 = vpop.eup %2805  ;;  %v888_v17 = vadd.f32 %v2802_v54, %v887_v2  ;;  %v926_v3 = vor.u32 1.1754944e-38, %v925_v63 }
 0x381   :  { %v915_v15 = vmul.f32 %v2806_v61, %v883_v27  ;;  %v903_v28 = vadd.f32 %v2804_v22, %v902_v7  ;;  %v2808_v58 = vpop.eup %2807  ;;  %vm920_vm2 = vweird.f32 %v2806_v61 }
 0x382   :  { %v892_v33 = vsel %vm891_vm14, %v2802_v54, %v888_v17  ;;  %v923_v54 = vand.u32 2147483647, %v883_v27  ;;  %vm921_vm4 = vmor %vm919_vm3, %vm920_vm2  ;;  %v948_v27 = vld [vmem:[#allocation8 + $0xa8] sm:$0xff] }
 0x383   :  { %v916_v11 = vsub.f32 1.0, %v915_v15  ;;  %v897_v52 = vsel %vm894_vm0, %v896_v26, %v892_v33  ;;  %v907_v42 = vsel %vm906_vm15, %v2804_v22, %v903_v28 }
 0x384   :  { %v912_v50 = vsel %vm909_vm1, %v911_v32, %v907_v42  ;;  %v931_v39 = vmul.f32 %v2808_v58, %v897_v52  ;;  %vm924_vm5 = vcmp.eq.f32.partialorder %v923_v54, 8.507059e+37  ;;  %v949_v32 = vld [vmem:[#allocation8 + $0xb0] sm:$0xff] }
 0x385   :  { %v930_v40 = vmul.f32 %v912_v50, %v3394_v57  ;;  %v917_v16 = vmul.f32 %v2806_v61, %v916_v11 }
 0x387   :  { %v3440_v51 = vadd.f32 %v931_v39, %v930_v40  ;;  %v918_v20 = vadd.f32 %v2806_v61, %v917_v16 }
 0x389   :  { %2809 = vtanh.f32 %v3440_v51  ;;  %v922_v38 = vsel %vm921_vm4, %v2806_v61, %v918_v20 }
 0x38a   :  { %v927_v2 = vsel %vm924_vm5, %v926_v3, %v922_v38  ;;  %v950_v38 = vld [vmem:[#allocation8 + $0xb8] sm:$0xff]  ;;  %vm1345_vm5 = vcmp.eq.s32.totalorder %v3435_v37, 7 }
 0x38f   :  { %v2810_v22 = vpop.eup %2809 }
 0x390   :  { %v934_v62 = vmul.f32 %v2810_v22, %v927_v2 }
 0x392   :  { %v3444_v57 = vsel %vm942_vm6, %v934_v62, %v3398_v1  ;;  %v951_v7 = vpack.c.bf16 %v934_v62, %v934_v62  ;;  %v947_v1 = vld [vmem:[#allocation8 + $0xa0] sm:$0xff] }
 0x394   :  { %960 = vmatmul.bf16.vlgmr.msrb.gmra.mxu0 %v951_v7  ;;  %973 = vmatmul.bf16.vlgmr.msrb.gmra.mxu1 %v951_v7 }
 0x395   :  { %986 = vmatmul.bf16.vlgmr.msrb.gmra.mxu2 %v951_v7  ;;  %999 = vmatmul.bf16.vlgmr.msrb.gmra.mxu3 %v951_v7 }
 0x396   :  { %1224 = vmatpush.bf16.msrb.mxu0 %v3098_v5  ;;  %1237 = vmatpush.bf16.msrb.mxu1 %v3100_v9 }
 0x397   :  { %1250 = vmatpush.bf16.msrb.mxu2 %v3102_v10  ;;  %1263 = vmatpush.bf16.msrb.mxu3 %v3113_v23 }
 0x39a   :  { %1225 = vmatpush.bf16.msrb.mxu0 %v3105_v14  ;;  %1238 = vmatpush.bf16.msrb.mxu1 %v3109_v18 }
 0x39b   :  { %1251 = vmatpush.bf16.msrb.mxu2 %v3111_v19  ;;  %1264 = vmatpush.bf16.msrb.mxu3 %v3125_v36 }
 0x39e   :  { %1226 = vmatpush.bf16.msrb.mxu0 %v3117_v30  ;;  %1239 = vmatpush.bf16.msrb.mxu1 %v3121_v34 }
 0x39f   :  { %1252 = vmatpush.bf16.msrb.mxu2 %v3123_v35  ;;  %1265 = vmatpush.bf16.msrb.mxu3 %v3131_v44 }
 0x3a2   :  { %1227 = vmatpush.bf16.msrb.mxu0 %v3129_v43  ;;  %1240 = vmatpush.bf16.msrb.mxu1 %v3135_v47 }
 0x3a3   :  { %1253 = vmatpush.bf16.msrb.mxu2 %v3137_v48  ;;  %1266 = vmatpush.bf16.msrb.mxu3 %v3143_v56 }
 0x3a6   :  { %1228 = vmatpush.bf16.msrb.mxu0 %v3141_v55  ;;  %1241 = vmatpush.bf16.msrb.mxu1 %v3147_v59 }
 0x3a7   :  { %1254 = vmatpush.bf16.msrb.mxu2 %v3149_v60  ;;  %1267 = vmatpush.bf16.msrb.mxu3 %v3155_v6 }
 0x3aa   :  { %1229 = vmatpush.bf16.msrb.mxu0 %v3153_v4  ;;  %1242 = vmatpush.bf16.msrb.mxu1 %v3159_v12 }
 0x3ab   :  { %1255 = vmatpush.bf16.msrb.mxu2 %v3161_v13  ;;  %1268 = vmatpush.bf16.msrb.mxu3 %v3176_v25 }
 0x3ae   :  { %1230 = vmatpush.bf16.msrb.mxu0 %v3174_v24  ;;  %1243 = vmatpush.bf16.msrb.mxu1 %v3181_v29 }
 0x3af   :  { %1256 = vmatpush.bf16.msrb.mxu2 %v3183_v31  ;;  %1269 = vmatpush.bf16.msrb.mxu3 %v3189_v45 }
 0x3b2   :  { %1231 = vmatpush.bf16.msrb.mxu0 %v3187_v41  ;;  %1244 = vmatpush.bf16.msrb.mxu1 %v3193_v46 }
 0x3b3   :  { %1257 = vmatpush.bf16.msrb.mxu2 %v3195_v49  ;;  %1270 = vmatpush.bf16.msrb.mxu3 %v3201_v53 }
 0x411   :  { %v961_v8 = vpop.f32.mrf.mxu0  ;;  %v974_v61 = vpop.f32.mrf.mxu1 }
 0x412   :  { %v1004_v17 = vadd.f32 %v961_v8, %v947_v1  ;;  %v1005_v15 = vadd.f32 %v974_v61, %v948_v27 }
 0x414   :  { %v2655_v26 = vmul.f32 -1.442695, %v1004_v17  ;;  %v2656_v28 = vmul.f32 -1.442695, %v1005_v15 }
 0x416   :  { %2811 = vpow2.f32 %v2655_v26 }
 0x417   :  { %2813 = vpow2.f32 %v2656_v28 }
 0x418   :  { %v987_v33 = vpop.f32.mrf.mxu2  ;;  %v1000_v58 = vpop.f32.mrf.mxu3 }
 0x419   :  { %v1006_v11 = vadd.f32 %v987_v33, %v949_v32  ;;  %v963_v52 = vpop.f32.mrf.mxu0  ;;  %v976_v42 = vpop.f32.mrf.mxu1  ;;  %v1007_v62 = vadd.f32 %v1000_v58, %v950_v38 }
 0x41b   :  { %v2657_v50 = vmul.f32 -1.442695, %v1006_v11 }
 0x41c   :  { %v2812_v39 = vpop.eup %2811 }
 0x41d   :  { %v2814_v40 = vpop.eup %2813  ;;  %v1017_v16 = vadd.f32 1.0, %v2812_v39  ;;  %2815 = vpow2.f32 %v2657_v50 }
 0x41e   :  { %v1018_v20 = vadd.f32 1.0, %v2814_v40 }
 0x41f   :  { %2817 = vrcp.f32 %v1017_v16  ;;  %v1031_v17 = vand.u32 2147483648, %v1017_v16  ;;  %v1029_v28 = vand.u32 2147483647, %v1017_v16  ;;  %vm1025_vm10 = vweird.f32 %v1017_v16 }
 0x420   :  { %2819 = vrcp.f32 %v1018_v20  ;;  %v989_v63 = vpop.f32.mrf.mxu2  ;;  %v1002_v54 = vpop.f32.mrf.mxu3  ;;  %v1046_v15 = vand.u32 2147483648, %v1018_v20  ;;  %v1044_v33 = vand.u32 2147483647, %v1018_v20  ;;  %vm1040_vm11 = vweird.f32 %v1018_v20 }
 0x421   :  { %v1032_v42 = vor.u32 1.1754944e-38, %v1031_v17  ;;  %vm1030_vm14 = vcmp.eq.f32.partialorder %v1029_v28, 8.507059e+37  ;;  %v1077_v17 = vpop.permute.xlu2 %1076 }
 0x422   :  { %v1047_v39 = vor.u32 1.1754944e-38, %v1046_v15  ;;  %vm1045_vm15 = vcmp.eq.f32.partialorder %v1044_v33, 8.507059e+37  ;;  %vm1078_vm4 = vcmp.eq.s32.totalorder %v1077_v17, 1  ;;  %v1346_v17 = vsel %vm1345_vm5, 1, %v3050_v21 }
 0x423   :  { %v2816_v3 = vpop.eup %2815  ;;  %1348 = vperm.xlu1 %2729, %v1346_v17  }
 0x424   :  { %v1019_v22 = vadd.f32 1.0, %v2816_v3 }
 0x425   :  { %v2818_v2 = vpop.eup %2817 }
 0x426   :  { %v2820_v7 = vpop.eup %2819  ;;  %v1021_v1 = vmul.f32 %v2818_v2, %v1017_v16  ;;  %2821 = vrcp.f32 %v1019_v22  ;;  %vm1026_vm8 = vweird.f32 %v2818_v2  ;;  %vm1055_vm1 = vweird.f32 %v1019_v22 }
 0x427   :  { %v1036_v27 = vmul.f32 %v2820_v7, %v1018_v20  ;;  %2823 = vtanh.f32 %v1007_v62  ;;  %vm1041_vm9 = vweird.f32 %v2820_v7  ;;  %vm1027_vm12 = vmor %vm1025_vm10, %vm1026_vm8 }
 0x428   :  { %v1022_v8 = vsub.f32 1.0, %v1021_v1  ;;  %vm1042_vm13 = vmor %vm1040_vm11, %vm1041_vm9 }
 0x429   :  { %v1037_v61 = vsub.f32 1.0, %v1036_v27 }
 0x42a   :  { %v1023_v26 = vmul.f32 %v2818_v2, %v1022_v8  ;;  %v1061_v8 = vand.u32 2147483648, %v1019_v22 }
 0x42b   :  { %v1038_v32 = vmul.f32 %v2820_v7, %v1037_v61 }
 0x42c   :  { %v2822_v11 = vpop.eup %2821  ;;  %v1024_v52 = vadd.f32 %v2818_v2, %v1023_v26  ;;  %v1062_v15 = vor.u32 1.1754944e-38, %v1061_v8 }
 0x42d   :  { %v1051_v58 = vmul.f32 %v2822_v11, %v1019_v22  ;;  %v1039_v50 = vadd.f32 %v2820_v7, %v1038_v32  ;;  %v2824_v63 = vpop.eup %2823  ;;  %vm1056_vm0 = vweird.f32 %v2822_v11 }
 0x42e   :  { %v1028_v40 = vsel %vm1027_vm12, %v2818_v2, %v1024_v52  ;;  %v1059_v2 = vand.u32 2147483647, %v1019_v22  ;;  %vm1057_vm2 = vmor %vm1055_vm1, %vm1056_vm0  ;;  %v1084_v22 = vld [vmem:[#allocation8 + $0xc8] sm:$0xff] }
 0x42f   :  { %v1052_v54 = vsub.f32 1.0, %v1051_v58  ;;  %v1033_v38 = vsel %vm1030_vm14, %v1032_v42, %v1028_v40  ;;  %v1043_v0 = vsel %vm1042_vm13, %v2820_v7, %v1039_v50 }
 0x430   :  { %v1048_v3 = vsel %vm1045_vm15, %v1047_v39, %v1043_v0  ;;  %v1067_v62 = vmul.f32 %v2824_v63, %v1033_v38  ;;  %vm1060_vm3 = vcmp.eq.f32.partialorder %v1059_v2, 8.507059e+37  ;;  %v1085_v39 = vld [vmem:[#allocation8 + $0xd0] sm:$0xff] }
 0x431   :  { %v1066_v1 = vmul.f32 %v1048_v3, %v3440_v51  ;;  %v1053_v27 = vmul.f32 %v2822_v11, %v1052_v54 }
 0x433   :  { %v3481_v16 = vadd.f32 %v1067_v62, %v1066_v1  ;;  %v1054_v20 = vadd.f32 %v2822_v11, %v1053_v27 }
 0x435   :  { %2825 = vtanh.f32 %v3481_v16  ;;  %v1058_v61 = vsel %vm1057_vm2, %v2822_v11, %v1054_v20 }
 0x436   :  { %v1063_v26 = vsel %vm1060_vm3, %v1062_v15, %v1058_v61  ;;  %v1086_v61 = vld [vmem:[#allocation8 + $0xd8] sm:$0xff]  ;;  %vm1481_vm3 = vcmp.eq.s32.totalorder %v3435_v37, 8 }
 0x43b   :  { %v2826_v7 = vpop.eup %2825 }
 0x43c   :  { %v1070_v28 = vmul.f32 %v2826_v7, %v1063_v26 }
 0x43e   :  { %v3485_v51 = vsel %vm1078_vm4, %v1070_v28, %v3444_v57  ;;  %v1087_v32 = vpack.c.bf16 %v1070_v28, %v1070_v28  ;;  %v1083_v57 = vld [vmem:[#allocation8 + $0xc0] sm:$0xff] }
 0x440   :  { %1096 = vmatmul.bf16.vlgmr.msra.gmra.mxu0 %v1087_v32  ;;  %1109 = vmatmul.bf16.vlgmr.msra.gmra.mxu1 %v1087_v32 }
 0x441   :  { %1122 = vmatmul.bf16.vlgmr.msra.gmra.mxu2 %v1087_v32  ;;  %1135 = vmatmul.bf16.vlgmr.msra.gmra.mxu3 %v1087_v32 }
 0x442   :  { %1360 = vmatpush.bf16.msra.mxu0 %v3098_v5  ;;  %1373 = vmatpush.bf16.msra.mxu1 %v3100_v9 }
 0x443   :  { %1386 = vmatpush.bf16.msra.mxu2 %v3102_v10  ;;  %1399 = vmatpush.bf16.msra.mxu3 %v3113_v23 }
 0x446   :  { %1361 = vmatpush.bf16.msra.mxu0 %v3105_v14  ;;  %1374 = vmatpush.bf16.msra.mxu1 %v3109_v18 }
 0x447   :  { %1387 = vmatpush.bf16.msra.mxu2 %v3111_v19  ;;  %1400 = vmatpush.bf16.msra.mxu3 %v3125_v36 }
 0x44a   :  { %1362 = vmatpush.bf16.msra.mxu0 %v3117_v30  ;;  %1375 = vmatpush.bf16.msra.mxu1 %v3121_v34 }
 0x44b   :  { %1388 = vmatpush.bf16.msra.mxu2 %v3123_v35  ;;  %1401 = vmatpush.bf16.msra.mxu3 %v3131_v44 }
 0x44e   :  { %1363 = vmatpush.bf16.msra.mxu0 %v3129_v43  ;;  %1376 = vmatpush.bf16.msra.mxu1 %v3135_v47 }
 0x44f   :  { %1389 = vmatpush.bf16.msra.mxu2 %v3137_v48  ;;  %1402 = vmatpush.bf16.msra.mxu3 %v3143_v56 }
 0x452   :  { %1364 = vmatpush.bf16.msra.mxu0 %v3141_v55  ;;  %1377 = vmatpush.bf16.msra.mxu1 %v3147_v59 }
 0x453   :  { %1390 = vmatpush.bf16.msra.mxu2 %v3149_v60  ;;  %1403 = vmatpush.bf16.msra.mxu3 %v3155_v6 }
 0x456   :  { %1365 = vmatpush.bf16.msra.mxu0 %v3153_v4  ;;  %1378 = vmatpush.bf16.msra.mxu1 %v3159_v12 }
 0x457   :  { %1391 = vmatpush.bf16.msra.mxu2 %v3161_v13  ;;  %1404 = vmatpush.bf16.msra.mxu3 %v3176_v25 }
 0x45a   :  { %1366 = vmatpush.bf16.msra.mxu0 %v3174_v24  ;;  %1379 = vmatpush.bf16.msra.mxu1 %v3181_v29 }
 0x45b   :  { %1392 = vmatpush.bf16.msra.mxu2 %v3183_v31  ;;  %1405 = vmatpush.bf16.msra.mxu3 %v3189_v45 }
 0x45e   :  { %1367 = vmatpush.bf16.msra.mxu0 %v3187_v41  ;;  %1380 = vmatpush.bf16.msra.mxu1 %v3193_v46 }
 0x45f   :  { %1393 = vmatpush.bf16.msra.mxu2 %v3195_v49  ;;  %1406 = vmatpush.bf16.msra.mxu3 %v3201_v53 }
 0x4bd   :  { %v1097_v33 = vpop.f32.mrf.mxu0  ;;  %v1110_v11 = vpop.f32.mrf.mxu1 }
 0x4be   :  { %v1140_v52 = vadd.f32 %v1097_v33, %v1083_v57  ;;  %v1141_v58 = vadd.f32 %v1110_v11, %v1084_v22 }
 0x4c0   :  { %v2658_v42 = vmul.f32 -1.442695, %v1140_v52  ;;  %v2659_v50 = vmul.f32 -1.442695, %v1141_v58 }
 0x4c2   :  { %2827 = vpow2.f32 %v2658_v42 }
 0x4c3   :  { %2829 = vpow2.f32 %v2659_v50 }
 0x4c4   :  { %v1123_v40 = vpop.f32.mrf.mxu2  ;;  %v1136_v63 = vpop.f32.mrf.mxu3 }
 0x4c5   :  { %v1142_v54 = vadd.f32 %v1123_v40, %v1085_v39  ;;  %v1099_v38 = vpop.f32.mrf.mxu0  ;;  %v1112_v0 = vpop.f32.mrf.mxu1  ;;  %v1143_v28 = vadd.f32 %v1136_v63, %v1086_v61 }
 0x4c7   :  { %v2660_v3 = vmul.f32 -1.442695, %v1142_v54 }
 0x4c8   :  { %v2828_v62 = vpop.eup %2827 }
 0x4c9   :  { %v2830_v1 = vpop.eup %2829  ;;  %v1153_v27 = vadd.f32 1.0, %v2828_v62  ;;  %2831 = vpow2.f32 %v2660_v3 }
 0x4ca   :  { %v1154_v20 = vadd.f32 1.0, %v2830_v1 }
 0x4cb   :  { %2833 = vrcp.f32 %v1153_v27  ;;  %v1167_v52 = vand.u32 2147483648, %v1153_v27  ;;  %v1165_v50 = vand.u32 2147483647, %v1153_v27  ;;  %vm1161_vm8 = vweird.f32 %v1153_v27 }
 0x4cc   :  { %2835 = vrcp.f32 %v1154_v20  ;;  %v1125_v8 = vpop.f32.mrf.mxu2  ;;  %v1138_v2 = vpop.f32.mrf.mxu3  ;;  %v1182_v58 = vand.u32 2147483648, %v1154_v20  ;;  %v1180_v40 = vand.u32 2147483647, %v1154_v20  ;;  %vm1176_vm9 = vweird.f32 %v1154_v20 }
 0x4cd   :  { %v1168_v0 = vor.u32 1.1754944e-38, %v1167_v52  ;;  %vm1166_vm12 = vcmp.eq.f32.partialorder %v1165_v50, 8.507059e+37  ;;  %v1213_v52 = vpop.permute.xlu0 %1212 }
 0x4ce   :  { %v1183_v62 = vor.u32 1.1754944e-38, %v1182_v58  ;;  %vm1181_vm13 = vcmp.eq.f32.partialorder %v1180_v40, 8.507059e+37  ;;  %vm1214_vm2 = vcmp.eq.s32.totalorder %v1213_v52, 1  ;;  %v1482_v52 = vsel %vm1481_vm3, 1, %v3050_v21 }
 0x4cf   :  { %v2832_v15 = vpop.eup %2831  ;;  %1484 = vperm.xlu2 %2730, %v1482_v52  }
 0x4d0   :  { %v1155_v7 = vadd.f32 1.0, %v2832_v15 }
 0x4d1   :  { %v2834_v26 = vpop.eup %2833 }
 0x4d2   :  { %v2836_v32 = vpop.eup %2835  ;;  %v1157_v57 = vmul.f32 %v2834_v26, %v1153_v27  ;;  %2837 = vrcp.f32 %v1155_v7  ;;  %vm1162_vm6 = vweird.f32 %v2834_v26  ;;  %vm1191_vm15 = vweird.f32 %v1155_v7 }
 0x4d3   :  { %v1172_v22 = vmul.f32 %v2836_v32, %v1154_v20  ;;  %2839 = vtanh.f32 %v1143_v28  ;;  %vm1177_vm7 = vweird.f32 %v2836_v32  ;;  %vm1163_vm10 = vmor %vm1161_vm8, %vm1162_vm6 }
 0x4d4   :  { %v1158_v33 = vsub.f32 1.0, %v1157_v57  ;;  %vm1178_vm11 = vmor %vm1176_vm9, %vm1177_vm7 }
 0x4d5   :  { %v1173_v11 = vsub.f32 1.0, %v1172_v22 }
 0x4d6   :  { %v1159_v42 = vmul.f32 %v2834_v26, %v1158_v33  ;;  %v1197_v33 = vand.u32 2147483648, %v1155_v7 }
 0x4d7   :  { %v1174_v39 = vmul.f32 %v2836_v32, %v1173_v11 }
 0x4d8   :  { %v2838_v54 = vpop.eup %2837  ;;  %v1160_v38 = vadd.f32 %v2834_v26, %v1159_v42  ;;  %v1198_v58 = vor.u32 1.1754944e-38, %v1197_v33 }
 0x4d9   :  { %v1187_v63 = vmul.f32 %v2838_v54, %v1155_v7  ;;  %v1175_v3 = vadd.f32 %v2836_v32, %v1174_v39  ;;  %v2840_v8 = vpop.eup %2839  ;;  %vm1192_vm14 = vweird.f32 %v2838_v54 }
 0x4da   :  { %v1164_v1 = vsel %vm1163_vm10, %v2834_v26, %v1160_v38  ;;  %v1195_v26 = vand.u32 2147483647, %v1155_v7  ;;  %vm1193_vm0 = vmor %vm1191_vm15, %vm1192_vm14  ;;  %v1220_v7 = vld [vmem:[#allocation8 + $0xe8] sm:$0xff] }
 0x4db   :  { %v1188_v2 = vsub.f32 1.0, %v1187_v63  ;;  %v1169_v61 = vsel %vm1166_vm12, %v1168_v0, %v1164_v1  ;;  %v1179_v17 = vsel %vm1178_vm11, %v2836_v32, %v1175_v3 }
 0x4dc   :  { %v1184_v15 = vsel %vm1181_vm13, %v1183_v62, %v1179_v17  ;;  %v1203_v28 = vmul.f32 %v2840_v8, %v1169_v61  ;;  %vm1196_vm1 = vcmp.eq.f32.partialorder %v1195_v26, 8.507059e+37  ;;  %v1221_v62 = vld [vmem:[#allocation8 + $0xf0] sm:$0xff] }
 0x4dd   :  { %v1202_v57 = vmul.f32 %v1184_v15, %v3481_v16  ;;  %v1189_v22 = vmul.f32 %v2838_v54, %v1188_v2 }
 0x4df   :  { %v3522_v27 = vadd.f32 %v1203_v28, %v1202_v57  ;;  %v1190_v20 = vadd.f32 %v2838_v54, %v1189_v22 }
 0x4e1   :  { %2841 = vtanh.f32 %v3522_v27  ;;  %v1194_v11 = vsel %vm1193_vm0, %v2838_v54, %v1190_v20 }
 0x4e2   :  { %v1199_v42 = vsel %vm1196_vm1, %v1198_v58, %v1194_v11  ;;  %v1222_v11 = vld [vmem:[#allocation8 + $0xf8] sm:$0xff]  ;;  %vm1617_vm1 = vcmp.eq.s32.totalorder %v3435_v37, 9 }
 0x4e7   :  { %v2842_v32 = vpop.eup %2841 }
 0x4e8   :  { %v1206_v50 = vmul.f32 %v2842_v32, %v1199_v42 }
 0x4ea   :  { %v3526_v16 = vsel %vm1214_vm2, %v1206_v50, %v3485_v51  ;;  %v1223_v39 = vpack.c.bf16 %v1206_v50, %v1206_v50  ;;  %v1219_v51 = vld [vmem:[#allocation8 + $0xe0] sm:$0xff] }
 0x4ec   :  { %1232 = vmatmul.bf16.vlgmr.msrb.gmra.mxu0 %v1223_v39  ;;  %1245 = vmatmul.bf16.vlgmr.msrb.gmra.mxu1 %v1223_v39 }
 0x4ed   :  { %1258 = vmatmul.bf16.vlgmr.msrb.gmra.mxu2 %v1223_v39  ;;  %1271 = vmatmul.bf16.vlgmr.msrb.gmra.mxu3 %v1223_v39 }
 0x4ee   :  { %1496 = vmatpush.bf16.msrb.mxu0 %v3098_v5  ;;  %1509 = vmatpush.bf16.msrb.mxu1 %v3100_v9 }
 0x4ef   :  { %1522 = vmatpush.bf16.msrb.mxu2 %v3102_v10  ;;  %1535 = vmatpush.bf16.msrb.mxu3 %v3113_v23 }
 0x4f2   :  { %1497 = vmatpush.bf16.msrb.mxu0 %v3105_v14  ;;  %1510 = vmatpush.bf16.msrb.mxu1 %v3109_v18 }
 0x4f3   :  { %1523 = vmatpush.bf16.msrb.mxu2 %v3111_v19  ;;  %1536 = vmatpush.bf16.msrb.mxu3 %v3125_v36 }
 0x4f6   :  { %1498 = vmatpush.bf16.msrb.mxu0 %v3117_v30  ;;  %1511 = vmatpush.bf16.msrb.mxu1 %v3121_v34 }
 0x4f7   :  { %1524 = vmatpush.bf16.msrb.mxu2 %v3123_v35  ;;  %1537 = vmatpush.bf16.msrb.mxu3 %v3131_v44 }
 0x4fa   :  { %1499 = vmatpush.bf16.msrb.mxu0 %v3129_v43  ;;  %1512 = vmatpush.bf16.msrb.mxu1 %v3135_v47 }
 0x4fb   :  { %1525 = vmatpush.bf16.msrb.mxu2 %v3137_v48  ;;  %1538 = vmatpush.bf16.msrb.mxu3 %v3143_v56 }
 0x4fe   :  { %1500 = vmatpush.bf16.msrb.mxu0 %v3141_v55  ;;  %1513 = vmatpush.bf16.msrb.mxu1 %v3147_v59 }
 0x4ff   :  { %1526 = vmatpush.bf16.msrb.mxu2 %v3149_v60  ;;  %1539 = vmatpush.bf16.msrb.mxu3 %v3155_v6 }
 0x502   :  { %1501 = vmatpush.bf16.msrb.mxu0 %v3153_v4  ;;  %1514 = vmatpush.bf16.msrb.mxu1 %v3159_v12 }
 0x503   :  { %1527 = vmatpush.bf16.msrb.mxu2 %v3161_v13  ;;  %1540 = vmatpush.bf16.msrb.mxu3 %v3176_v25 }
 0x506   :  { %1502 = vmatpush.bf16.msrb.mxu0 %v3174_v24  ;;  %1515 = vmatpush.bf16.msrb.mxu1 %v3181_v29 }
 0x507   :  { %1528 = vmatpush.bf16.msrb.mxu2 %v3183_v31  ;;  %1541 = vmatpush.bf16.msrb.mxu3 %v3189_v45 }
 0x50a   :  { %1503 = vmatpush.bf16.msrb.mxu0 %v3187_v41  ;;  %1516 = vmatpush.bf16.msrb.mxu1 %v3193_v46 }
 0x50b   :  { %1529 = vmatpush.bf16.msrb.mxu2 %v3195_v49  ;;  %1542 = vmatpush.bf16.msrb.mxu3 %v3201_v53 }
 0x569   :  { %v1233_v40 = vpop.f32.mrf.mxu0  ;;  %v1246_v54 = vpop.f32.mrf.mxu1 }
 0x56a   :  { %v1276_v38 = vadd.f32 %v1233_v40, %v1219_v51  ;;  %v1277_v63 = vadd.f32 %v1246_v54, %v1220_v7 }
 0x56c   :  { %v2661_v0 = vmul.f32 -1.442695, %v1276_v38  ;;  %v2662_v3 = vmul.f32 -1.442695, %v1277_v63 }
 0x56e   :  { %2843 = vpow2.f32 %v2661_v0 }
 0x56f   :  { %2845 = vpow2.f32 %v2662_v3 }
 0x570   :  { %v1259_v1 = vpop.f32.mrf.mxu2  ;;  %v1272_v8 = vpop.f32.mrf.mxu3 }
 0x571   :  { %v1278_v2 = vadd.f32 %v1259_v1, %v1221_v62  ;;  %v1235_v61 = vpop.f32.mrf.mxu0  ;;  %v1248_v17 = vpop.f32.mrf.mxu1  ;;  %v1279_v50 = vadd.f32 %v1272_v8, %v1222_v11 }
 0x573   :  { %v2663_v15 = vmul.f32 -1.442695, %v1278_v2 }
 0x574   :  { %v2844_v28 = vpop.eup %2843 }
 0x575   :  { %v2846_v57 = vpop.eup %2845  ;;  %v1289_v22 = vadd.f32 1.0, %v2844_v28  ;;  %2847 = vpow2.f32 %v2663_v15 }
 0x576   :  { %v1290_v20 = vadd.f32 1.0, %v2846_v57 }
 0x577   :  { %2849 = vrcp.f32 %v1289_v22  ;;  %v1303_v38 = vand.u32 2147483648, %v1289_v22  ;;  %v1301_v3 = vand.u32 2147483647, %v1289_v22  ;;  %vm1297_vm6 = vweird.f32 %v1289_v22 }
 0x578   :  { %2851 = vrcp.f32 %v1290_v20  ;;  %v1261_v33 = vpop.f32.mrf.mxu2  ;;  %v1274_v26 = vpop.f32.mrf.mxu3  ;;  %v1318_v63 = vand.u32 2147483648, %v1290_v20  ;;  %v1316_v1 = vand.u32 2147483647, %v1290_v20  ;;  %vm1312_vm7 = vweird.f32 %v1290_v20 }
 0x579   :  { %v1304_v17 = vor.u32 1.1754944e-38, %v1303_v38  ;;  %vm1302_vm10 = vcmp.eq.f32.partialorder %v1301_v3, 8.507059e+37  ;;  %v1349_v38 = vpop.permute.xlu1 %1348 }
 0x57a   :  { %v1319_v28 = vor.u32 1.1754944e-38, %v1318_v63  ;;  %vm1317_vm11 = vcmp.eq.f32.partialorder %v1316_v1, 8.507059e+37  ;;  %vm1350_vm0 = vcmp.eq.s32.totalorder %v1349_v38, 1  ;;  %v1618_v38 = vsel %vm1617_vm1, 1, %v3050_v21 }
 0x57b   :  { %v2848_v58 = vpop.eup %2847  ;;  %1620 = vperm.xlu0 %2728, %v1618_v38  }
 0x57c   :  { %v1291_v32 = vadd.f32 1.0, %v2848_v58 }
 0x57d   :  { %v2850_v42 = vpop.eup %2849 }
 0x57e   :  { %v2852_v39 = vpop.eup %2851  ;;  %v1293_v51 = vmul.f32 %v2850_v42, %v1289_v22  ;;  %2853 = vrcp.f32 %v1291_v32  ;;  %vm1298_vm4 = vweird.f32 %v2850_v42  ;;  %vm1327_vm13 = vweird.f32 %v1291_v32 }
 0x57f   :  { %v1308_v7 = vmul.f32 %v2852_v39, %v1290_v20  ;;  %2855 = vtanh.f32 %v1279_v50  ;;  %vm1313_vm5 = vweird.f32 %v2852_v39  ;;  %vm1299_vm8 = vmor %vm1297_vm6, %vm1298_vm4 }
 0x580   :  { %v1294_v40 = vsub.f32 1.0, %v1293_v51  ;;  %vm1314_vm9 = vmor %vm1312_vm7, %vm1313_vm5 }
 0x581   :  { %v1309_v54 = vsub.f32 1.0, %v1308_v7 }
 0x582   :  { %v1295_v0 = vmul.f32 %v2850_v42, %v1294_v40  ;;  %v1333_v40 = vand.u32 2147483648, %v1291_v32 }
 0x583   :  { %v1310_v62 = vmul.f32 %v2852_v39, %v1309_v54 }
 0x584   :  { %v2854_v2 = vpop.eup %2853  ;;  %v1296_v61 = vadd.f32 %v2850_v42, %v1295_v0  ;;  %v1334_v63 = vor.u32 1.1754944e-38, %v1333_v40 }
 0x585   :  { %v1323_v8 = vmul.f32 %v2854_v2, %v1291_v32  ;;  %v1311_v15 = vadd.f32 %v2852_v39, %v1310_v62  ;;  %v2856_v33 = vpop.eup %2855  ;;  %vm1328_vm12 = vweird.f32 %v2854_v2 }
 0x586   :  { %v1300_v57 = vsel %vm1299_vm8, %v2850_v42, %v1296_v61  ;;  %v1331_v42 = vand.u32 2147483647, %v1291_v32  ;;  %vm1329_vm14 = vmor %vm1327_vm13, %vm1328_vm12  ;;  %v1356_v32 = vld [vmem:[#allocation8 + $0x108] sm:$0xff] }
 0x587   :  { %v1324_v26 = vsub.f32 1.0, %v1323_v8  ;;  %v1305_v11 = vsel %vm1302_vm10, %v1304_v17, %v1300_v57  ;;  %v1315_v52 = vsel %vm1314_vm9, %v2852_v39, %v1311_v15 }
 0x588   :  { %v1320_v58 = vsel %vm1317_vm11, %v1319_v28, %v1315_v52  ;;  %v1339_v50 = vmul.f32 %v2856_v33, %v1305_v11  ;;  %vm1332_vm15 = vcmp.eq.f32.partialorder %v1331_v42, 8.507059e+37  ;;  %v1357_v28 = vld [vmem:[#allocation8 + $0x110] sm:$0xff] }
 0x589   :  { %v1338_v51 = vmul.f32 %v1320_v58, %v3522_v27  ;;  %v1325_v7 = vmul.f32 %v2854_v2, %v1324_v26 }
 0x58b   :  { %v3563_v22 = vadd.f32 %v1339_v50, %v1338_v51  ;;  %v1326_v20 = vadd.f32 %v2854_v2, %v1325_v7 }
 0x58d   :  { %2857 = vtanh.f32 %v3563_v22  ;;  %v1330_v54 = vsel %vm1329_vm14, %v2854_v2, %v1326_v20 }
 0x58e   :  { %v1335_v0 = vsel %vm1332_vm15, %v1334_v63, %v1330_v54  ;;  %v1358_v54 = vld [vmem:[#allocation8 + $0x118] sm:$0xff] }
 0x593   :  { %v2858_v39 = vpop.eup %2857 }
 0x594   :  { %v1342_v3 = vmul.f32 %v2858_v39, %v1335_v0 }
 0x596   :  { %v3567_v27 = vsel %vm1350_vm0, %v1342_v3, %v3526_v16  ;;  %v1359_v62 = vpack.c.bf16 %v1342_v3, %v1342_v3  ;;  %v1355_v16 = vld [vmem:[#allocation8 + $0x100] sm:$0xff] }
 0x598   :  { %1368 = vmatmul.bf16.vlgmr.msra.gmra.mxu0 %v1359_v62  ;;  %1381 = vmatmul.bf16.vlgmr.msra.gmra.mxu1 %v1359_v62 }
 0x599   :  { %1394 = vmatmul.bf16.vlgmr.msra.gmra.mxu2 %v1359_v62  ;;  %1407 = vmatmul.bf16.vlgmr.msra.gmra.mxu3 %v1359_v62 }
 0x59a   :  { %1632 = vmatpush.bf16.msra.mxu0 %v3098_v5  ;;  %1645 = vmatpush.bf16.msra.mxu1 %v3100_v9 }
 0x59b   :  { %1658 = vmatpush.bf16.msra.mxu2 %v3102_v10  ;;  %1671 = vmatpush.bf16.msra.mxu3 %v3113_v23 }
 0x59e   :  { %1633 = vmatpush.bf16.msra.mxu0 %v3105_v14  ;;  %1646 = vmatpush.bf16.msra.mxu1 %v3109_v18 }
 0x59f   :  { %1659 = vmatpush.bf16.msra.mxu2 %v3111_v19  ;;  %1672 = vmatpush.bf16.msra.mxu3 %v3125_v36 }
 0x5a2   :  { %1634 = vmatpush.bf16.msra.mxu0 %v3117_v30  ;;  %1647 = vmatpush.bf16.msra.mxu1 %v3121_v34 }
 0x5a3   :  { %1660 = vmatpush.bf16.msra.mxu2 %v3123_v35  ;;  %1673 = vmatpush.bf16.msra.mxu3 %v3131_v44 }
 0x5a6   :  { %1635 = vmatpush.bf16.msra.mxu0 %v3129_v43  ;;  %1648 = vmatpush.bf16.msra.mxu1 %v3135_v47 }
 0x5a7   :  { %1661 = vmatpush.bf16.msra.mxu2 %v3137_v48  ;;  %1674 = vmatpush.bf16.msra.mxu3 %v3143_v56 }
 0x5aa   :  { %1636 = vmatpush.bf16.msra.mxu0 %v3141_v55  ;;  %1649 = vmatpush.bf16.msra.mxu1 %v3147_v59 }
 0x5ab   :  { %1662 = vmatpush.bf16.msra.mxu2 %v3149_v60  ;;  %1675 = vmatpush.bf16.msra.mxu3 %v3155_v6 }
 0x5ae   :  { %1637 = vmatpush.bf16.msra.mxu0 %v3153_v4  ;;  %1650 = vmatpush.bf16.msra.mxu1 %v3159_v12 }
 0x5af   :  { %1663 = vmatpush.bf16.msra.mxu2 %v3161_v13  ;;  %1676 = vmatpush.bf16.msra.mxu3 %v3176_v25 }
 0x5b2   :  { %1638 = vmatpush.bf16.msra.mxu0 %v3174_v24  ;;  %1651 = vmatpush.bf16.msra.mxu1 %v3181_v29 }
 0x5b3   :  { %1664 = vmatpush.bf16.msra.mxu2 %v3183_v31  ;;  %1677 = vmatpush.bf16.msra.mxu3 %v3189_v45 }
 0x5b6   :  { %1639 = vmatpush.bf16.msra.mxu0 %v3187_v41  ;;  %1652 = vmatpush.bf16.msra.mxu1 %v3193_v46 }
 0x5b7   :  { %1665 = vmatpush.bf16.msra.mxu2 %v3195_v49  ;;  %1678 = vmatpush.bf16.msra.mxu3 %v3201_v53 }
 0x615   :  { %v1369_v1 = vpop.f32.mrf.mxu0  ;;  %v1382_v2 = vpop.f32.mrf.mxu1 }
 0x616   :  { %v1412_v61 = vadd.f32 %v1369_v1, %v1355_v16  ;;  %v1413_v8 = vadd.f32 %v1382_v2, %v1356_v32 }
 0x618   :  { %v2664_v17 = vmul.f32 -1.442695, %v1412_v61  ;;  %v2665_v15 = vmul.f32 -1.442695, %v1413_v8 }
 0x61a   :  { %2859 = vpow2.f32 %v2664_v17 }
 0x61b   :  { %2861 = vpow2.f32 %v2665_v15 }
 0x61c   :  { %v1395_v57 = vpop.f32.mrf.mxu2  ;;  %v1408_v33 = vpop.f32.mrf.mxu3 }
 0x61d   :  { %v1414_v26 = vadd.f32 %v1395_v57, %v1357_v28  ;;  %v1371_v11 = vpop.f32.mrf.mxu0  ;;  %v1384_v52 = vpop.f32.mrf.mxu1  ;;  %v1415_v3 = vadd.f32 %v1408_v33, %v1358_v54 }
 0x61f   :  { %v2666_v58 = vmul.f32 -1.442695, %v1414_v26 }
 0x620   :  { %v2860_v50 = vpop.eup %2859 }
 0x621   :  { %v2862_v51 = vpop.eup %2861  ;;  %v1425_v7 = vadd.f32 1.0, %v2860_v50  ;;  %2863 = vpow2.f32 %v2666_v58 }
 0x622   :  { %v1426_v20 = vadd.f32 1.0, %v2862_v51 }
 0x623   :  { %2865 = vrcp.f32 %v1425_v7  ;;  %v1439_v61 = vand.u32 2147483648, %v1425_v7  ;;  %v1437_v37 = vand.u32 2147483647, %v1425_v7  ;;  %vm1433_vm4 = vweird.f32 %v1425_v7 }
 0x624   :  { %2867 = vrcp.f32 %v1426_v20  ;;  %v1397_v40 = vpop.f32.mrf.mxu2  ;;  %v1410_v42 = vpop.f32.mrf.mxu3  ;;  %v1454_v8 = vand.u32 2147483648, %v1426_v20  ;;  %v1452_v28 = vand.u32 2147483647, %v1426_v20  ;;  %vm1448_vm5 = vweird.f32 %v1426_v20 }
 0x625   :  { %v1440_v11 = vor.u32 1.1754944e-38, %v1439_v61  ;;  %vm1438_vm8 = vcmp.eq.f32.partialorder %v1437_v37, 8.507059e+37 }
 0x626   :  { %v1455_v58 = vor.u32 1.1754944e-38, %v1454_v8  ;;  %vm1453_vm9 = vcmp.eq.f32.partialorder %v1452_v28, 8.507059e+37 }
 0x627   :  { %v2864_v63 = vpop.eup %2863 }
 0x628   :  { %v1427_v39 = vadd.f32 1.0, %v2864_v63 }
 0x629   :  { %v2866_v0 = vpop.eup %2865 }
 0x62a   :  { %v2868_v62 = vpop.eup %2867  ;;  %v1429_v16 = vmul.f32 %v2866_v0, %v1425_v7  ;;  %2869 = vrcp.f32 %v1427_v39  ;;  %vm1434_vm2 = vweird.f32 %v2866_v0  ;;  %vm1463_vm11 = vweird.f32 %v1427_v39 }
 0x62b   :  { %v1444_v32 = vmul.f32 %v2868_v62, %v1426_v20  ;;  %2871 = vtanh.f32 %v1415_v3  ;;  %vm1449_vm3 = vweird.f32 %v2868_v62  ;;  %vm1435_vm6 = vmor %vm1433_vm4, %vm1434_vm2 }
 0x62c   :  { %v1430_v1 = vsub.f32 1.0, %v1429_v16  ;;  %vm1450_vm7 = vmor %vm1448_vm5, %vm1449_vm3 }
 0x62d   :  { %v1445_v2 = vsub.f32 1.0, %v1444_v32  ;;  %v1469_v32 = vand.u32 2147483648, %v1427_v39 }
 0x62e   :  { %v1431_v17 = vmul.f32 %v2866_v0, %v1430_v1 }
 0x62f   :  { %v1446_v15 = vmul.f32 %v2868_v62, %v1445_v2  ;;  %v1485_v2 = vpop.permute.xlu2 %1484  ;;  %v1470_v61 = vor.u32 1.1754944e-38, %v1469_v32 }
 0x630   :  { %v2870_v57 = vpop.eup %2869  ;;  %v1432_v26 = vadd.f32 %v2866_v0, %v1431_v17  ;;  %vm1486_vm14 = vcmp.eq.s32.totalorder %v1485_v2, 1 }
 0x631   :  { %v1459_v33 = vmul.f32 %v2870_v57, %v1427_v39  ;;  %v1447_v52 = vadd.f32 %v2868_v62, %v1446_v15  ;;  %v2872_v51 = vpop.eup %2871  ;;  %vm1464_vm10 = vweird.f32 %v2870_v57 }
 0x632   :  { %v1436_v50 = vsel %vm1435_vm6, %v2866_v0, %v1432_v26  ;;  %v1467_v0 = vand.u32 2147483647, %v1427_v39  ;;  %vm1465_vm12 = vmor %vm1463_vm11, %vm1464_vm10  ;;  %v1492_v39 = vld [vmem:[#allocation8 + $0x128] sm:$0xff] }
 0x633   :  { %v1460_v40 = vsub.f32 1.0, %v1459_v33  ;;  %v1441_v42 = vsel %vm1438_vm8, %v1440_v11, %v1436_v50  ;;  %v1451_v54 = vsel %vm1450_vm7, %v2868_v62, %v1447_v52  ;;  %v1493_v52 = vld [vmem:[#allocation8 + $0x130] sm:$0xff] }
 0x634   :  { %v1456_v38 = vsel %vm1453_vm9, %v1455_v58, %v1451_v54  ;;  %v1475_v63 = vmul.f32 %v2872_v51, %v1441_v42  ;;  %vm1468_vm13 = vcmp.eq.f32.partialorder %v1467_v0, 8.507059e+37  ;;  %v3645_v0 = vld [vmem:[%s3885_s1] sm:$0xff] }
 0x635   :  { %v1474_v3 = vmul.f32 %v1456_v38, %v3563_v22  ;;  %v1461_v16 = vmul.f32 %v2870_v57, %v1460_v40  ;;  %vm1753_vm15 = vcmp.eq.s32.totalorder %v3645_v0, 10 }
 0x636   :  { %v1754_v2 = vsel %vm1753_vm15, 1, %v3050_v21 }
 0x637   :  { %v3604_v7 = vadd.f32 %v1475_v63, %v1474_v3  ;;  %v1462_v20 = vadd.f32 %v2870_v57, %v1461_v16  ;;  %1756 = vperm.xlu1 %2729, %v1754_v2  }
 0x639   :  { %2873 = vtanh.f32 %v3604_v7  ;;  %v1466_v1 = vsel %vm1465_vm12, %v2870_v57, %v1462_v20 }
 0x63a   :  { %v1471_v8 = vsel %vm1468_vm13, %v1470_v61, %v1466_v1  ;;  %v1494_v1 = vld [vmem:[#allocation8 + $0x138] sm:$0xff]  ;;  %vm1889_vm13 = vcmp.eq.s32.totalorder %v3645_v0, 11 }
 0x63f   :  { %v2874_v62 = vpop.eup %2873 }
 0x640   :  { %v1478_v17 = vmul.f32 %v2874_v62, %v1471_v8 }
 0x642   :  { %v3608_v22 = vsel %vm1486_vm14, %v1478_v17, %v3567_v27  ;;  %v1495_v37 = vpack.c.bf16 %v1478_v17, %v1478_v17  ;;  %v1491_v27 = vld [vmem:[#allocation8 + $0x120] sm:$0xff] }
 0x644   :  { %1504 = vmatmul.bf16.vlgmr.msrb.gmra.mxu0 %v1495_v37  ;;  %1517 = vmatmul.bf16.vlgmr.msrb.gmra.mxu1 %v1495_v37 }
 0x645   :  { %1530 = vmatmul.bf16.vlgmr.msrb.gmra.mxu2 %v1495_v37  ;;  %1543 = vmatmul.bf16.vlgmr.msrb.gmra.mxu3 %v1495_v37 }
 0x646   :  { %1768 = vmatpush.bf16.msrb.mxu0 %v3098_v5  ;;  %1781 = vmatpush.bf16.msrb.mxu1 %v3100_v9 }
 0x647   :  { %1794 = vmatpush.bf16.msrb.mxu2 %v3102_v10  ;;  %1807 = vmatpush.bf16.msrb.mxu3 %v3113_v23 }
 0x64a   :  { %1769 = vmatpush.bf16.msrb.mxu0 %v3105_v14  ;;  %1782 = vmatpush.bf16.msrb.mxu1 %v3109_v18 }
 0x64b   :  { %1795 = vmatpush.bf16.msrb.mxu2 %v3111_v19  ;;  %1808 = vmatpush.bf16.msrb.mxu3 %v3125_v36 }
 0x64e   :  { %1770 = vmatpush.bf16.msrb.mxu0 %v3117_v30  ;;  %1783 = vmatpush.bf16.msrb.mxu1 %v3121_v34 }
 0x64f   :  { %1796 = vmatpush.bf16.msrb.mxu2 %v3123_v35  ;;  %1809 = vmatpush.bf16.msrb.mxu3 %v3131_v44 }
 0x652   :  { %1771 = vmatpush.bf16.msrb.mxu0 %v3129_v43  ;;  %1784 = vmatpush.bf16.msrb.mxu1 %v3135_v47 }
 0x653   :  { %1797 = vmatpush.bf16.msrb.mxu2 %v3137_v48  ;;  %1810 = vmatpush.bf16.msrb.mxu3 %v3143_v56 }
 0x656   :  { %1772 = vmatpush.bf16.msrb.mxu0 %v3141_v55  ;;  %1785 = vmatpush.bf16.msrb.mxu1 %v3147_v59 }
 0x657   :  { %1798 = vmatpush.bf16.msrb.mxu2 %v3149_v60  ;;  %1811 = vmatpush.bf16.msrb.mxu3 %v3155_v6 }
 0x65a   :  { %1773 = vmatpush.bf16.msrb.mxu0 %v3153_v4  ;;  %1786 = vmatpush.bf16.msrb.mxu1 %v3159_v12 }
 0x65b   :  { %1799 = vmatpush.bf16.msrb.mxu2 %v3161_v13  ;;  %1812 = vmatpush.bf16.msrb.mxu3 %v3176_v25 }
 0x65e   :  { %1774 = vmatpush.bf16.msrb.mxu0 %v3174_v24  ;;  %1787 = vmatpush.bf16.msrb.mxu1 %v3181_v29 }
 0x65f   :  { %1800 = vmatpush.bf16.msrb.mxu2 %v3183_v31  ;;  %1813 = vmatpush.bf16.msrb.mxu3 %v3189_v45 }
 0x662   :  { %1775 = vmatpush.bf16.msrb.mxu0 %v3187_v41  ;;  %1788 = vmatpush.bf16.msrb.mxu1 %v3193_v46 }
 0x663   :  { %1801 = vmatpush.bf16.msrb.mxu2 %v3195_v49  ;;  %1814 = vmatpush.bf16.msrb.mxu3 %v3201_v53 }
 0x6c1   :  { %v1505_v15 = vpop.f32.mrf.mxu0  ;;  %v1518_v28 = vpop.f32.mrf.mxu1 }
 0x6c2   :  { %v1548_v57 = vadd.f32 %v1505_v15, %v1491_v27  ;;  %v1549_v26 = vadd.f32 %v1518_v28, %v1492_v39 }
 0x6c4   :  { %v2667_v33 = vmul.f32 -1.442695, %v1548_v57  ;;  %v2668_v11 = vmul.f32 -1.442695, %v1549_v26 }
 0x6c6   :  { %2875 = vpow2.f32 %v2667_v33 }
 0x6c7   :  { %2877 = vpow2.f32 %v2668_v11 }
 0x6c8   :  { %v1531_v58 = vpop.f32.mrf.mxu2  ;;  %v1544_v50 = vpop.f32.mrf.mxu3 }
 0x6c9   :  { %v1550_v51 = vadd.f32 %v1531_v58, %v1493_v52  ;;  %v1507_v40 = vpop.f32.mrf.mxu0  ;;  %v1520_v42 = vpop.f32.mrf.mxu1  ;;  %v1551_v17 = vadd.f32 %v1544_v50, %v1494_v1 }
 0x6cb   :  { %v2669_v54 = vmul.f32 -1.442695, %v1550_v51 }
 0x6cc   :  { %v2876_v38 = vpop.eup %2875 }
 0x6cd   :  { %v2878_v63 = vpop.eup %2877  ;;  %v1561_v3 = vadd.f32 1.0, %v2876_v38  ;;  %2879 = vpow2.f32 %v2669_v54 }
 0x6ce   :  { %v1562_v16 = vadd.f32 1.0, %v2878_v63 }
 0x6cf   :  { %2881 = vrcp.f32 %v1561_v3  ;;  %v1575_v57 = vand.u32 2147483648, %v1561_v3  ;;  %v1573_v11 = vand.u32 2147483647, %v1561_v3  ;;  %vm1569_vm2 = vweird.f32 %v1561_v3 }
 0x6d0   :  { %2883 = vrcp.f32 %v1562_v16  ;;  %v1533_v20 = vpop.f32.mrf.mxu2  ;;  %v1546_v32 = vpop.f32.mrf.mxu3  ;;  %v1590_v26 = vand.u32 2147483648, %v1562_v16  ;;  %v1588_v58 = vand.u32 2147483647, %v1562_v16  ;;  %vm1584_vm3 = vweird.f32 %v1562_v16 }
 0x6d1   :  { %v1576_v42 = vor.u32 1.1754944e-38, %v1575_v57  ;;  %vm1574_vm6 = vcmp.eq.f32.partialorder %v1573_v11, 8.507059e+37  ;;  %v1621_v57 = vpop.permute.xlu0 %1620 }
 0x6d2   :  { %v1591_v38 = vor.u32 1.1754944e-38, %v1590_v26  ;;  %vm1589_vm7 = vcmp.eq.f32.partialorder %v1588_v58, 8.507059e+37  ;;  %vm1622_vm12 = vcmp.eq.s32.totalorder %v1621_v57, 1  ;;  %v1890_v57 = vsel %vm1889_vm13, 1, %v3050_v21 }
 0x6d3   :  { %v2880_v61 = vpop.eup %2879  ;;  %1892 = vperm.xlu2 %2730, %v1890_v57  }
 0x6d4   :  { %v1563_v62 = vadd.f32 1.0, %v2880_v61 }
 0x6d5   :  { %v2882_v8 = vpop.eup %2881 }
 0x6d6   :  { %v2884_v37 = vpop.eup %2883  ;;  %v1565_v27 = vmul.f32 %v2882_v8, %v1561_v3  ;;  %2885 = vrcp.f32 %v1563_v62  ;;  %vm1570_vm0 = vweird.f32 %v2882_v8  ;;  %vm1599_vm9 = vweird.f32 %v1563_v62 }
 0x6d7   :  { %v1580_v39 = vmul.f32 %v2884_v37, %v1562_v16  ;;  %2887 = vtanh.f32 %v1551_v17  ;;  %vm1585_vm1 = vweird.f32 %v2884_v37  ;;  %vm1571_vm4 = vmor %vm1569_vm2, %vm1570_vm0 }
 0x6d8   :  { %v1566_v15 = vsub.f32 1.0, %v1565_v27  ;;  %vm1586_vm5 = vmor %vm1584_vm3, %vm1585_vm1 }
 0x6d9   :  { %v1581_v28 = vsub.f32 1.0, %v1580_v39 }
 0x6da   :  { %v1567_v33 = vmul.f32 %v2882_v8, %v1566_v15  ;;  %v1605_v15 = vand.u32 2147483648, %v1563_v62 }
 0x6db   :  { %v1582_v52 = vmul.f32 %v2884_v37, %v1581_v28 }
 0x6dc   :  { %v2886_v51 = vpop.eup %2885  ;;  %v1568_v40 = vadd.f32 %v2882_v8, %v1567_v33  ;;  %v1606_v26 = vor.u32 1.1754944e-38, %v1605_v15 }
 0x6dd   :  { %v1595_v50 = vmul.f32 %v2886_v51, %v1563_v62  ;;  %v1583_v54 = vadd.f32 %v2884_v37, %v1582_v52  ;;  %v2888_v20 = vpop.eup %2887  ;;  %vm1600_vm8 = vweird.f32 %v2886_v51 }
 0x6de   :  { %v1572_v63 = vsel %vm1571_vm4, %v2882_v8, %v1568_v40  ;;  %v1603_v8 = vand.u32 2147483647, %v1563_v62  ;;  %vm1601_vm10 = vmor %vm1599_vm9, %vm1600_vm8  ;;  %v1628_v62 = vld [vmem:[#allocation8 + $0x148] sm:$0xff] }
 0x6df   :  { %v1596_v32 = vsub.f32 1.0, %v1595_v50  ;;  %v1577_v1 = vsel %vm1574_vm6, %v1576_v42, %v1572_v63  ;;  %v1587_v2 = vsel %vm1586_vm5, %v2884_v37, %v1583_v54 }
 0x6e0   :  { %v1592_v61 = vsel %vm1589_vm7, %v1591_v38, %v1587_v2  ;;  %v1611_v17 = vmul.f32 %v2888_v20, %v1577_v1  ;;  %vm1604_vm11 = vcmp.eq.f32.partialorder %v1603_v8, 8.507059e+37  ;;  %v1629_v38 = vld [vmem:[#allocation8 + $0x150] sm:$0xff] }
 0x6e1   :  { %v1610_v27 = vmul.f32 %v1592_v61, %v3604_v7  ;;  %v1597_v39 = vmul.f32 %v2886_v51, %v1596_v32 }
 0x6e3   :  { %v3650_v3 = vadd.f32 %v1611_v17, %v1610_v27  ;;  %v1598_v16 = vadd.f32 %v2886_v51, %v1597_v39 }
 0x6e5   :  { %2889 = vtanh.f32 %v3650_v3  ;;  %v1602_v28 = vsel %vm1601_vm10, %v2886_v51, %v1598_v16 }
 0x6e6   :  { %v1607_v33 = vsel %vm1604_vm11, %v1606_v26, %v1602_v28  ;;  %v1630_v28 = vld [vmem:[#allocation8 + $0x158] sm:$0xff]  ;;  %vm2025_vm11 = vcmp.eq.s32.totalorder %v3645_v0, 12 }
 0x6eb   :  { %v2890_v37 = vpop.eup %2889 }
 0x6ec   :  { %v1614_v11 = vmul.f32 %v2890_v37, %v1607_v33 }
 0x6ee   :  { %v3654_v7 = vsel %vm1622_vm12, %v1614_v11, %v3608_v22  ;;  %v1631_v52 = vpack.c.bf16 %v1614_v11, %v1614_v11  ;;  %v1627_v22 = vld [vmem:[#allocation8 + $0x140] sm:$0xff] }
 0x6f0   :  { %1640 = vmatmul.bf16.vlgmr.msra.gmra.mxu0 %v1631_v52  ;;  %1653 = vmatmul.bf16.vlgmr.msra.gmra.mxu1 %v1631_v52 }
 0x6f1   :  { %1666 = vmatmul.bf16.vlgmr.msra.gmra.mxu2 %v1631_v52  ;;  %1679 = vmatmul.bf16.vlgmr.msra.gmra.mxu3 %v1631_v52 }
 0x6f2   :  { %1904 = vmatpush.bf16.msra.mxu0 %v3098_v5  ;;  %1917 = vmatpush.bf16.msra.mxu1 %v3100_v9 }
 0x6f3   :  { %1930 = vmatpush.bf16.msra.mxu2 %v3102_v10  ;;  %1943 = vmatpush.bf16.msra.mxu3 %v3113_v23 }
 0x6f6   :  { %1905 = vmatpush.bf16.msra.mxu0 %v3105_v14  ;;  %1918 = vmatpush.bf16.msra.mxu1 %v3109_v18 }
 0x6f7   :  { %1931 = vmatpush.bf16.msra.mxu2 %v3111_v19  ;;  %1944 = vmatpush.bf16.msra.mxu3 %v3125_v36 }
 0x6fa   :  { %1906 = vmatpush.bf16.msra.mxu0 %v3117_v30  ;;  %1919 = vmatpush.bf16.msra.mxu1 %v3121_v34 }
 0x6fb   :  { %1932 = vmatpush.bf16.msra.mxu2 %v3123_v35  ;;  %1945 = vmatpush.bf16.msra.mxu3 %v3131_v44 }
 0x6fe   :  { %1907 = vmatpush.bf16.msra.mxu0 %v3129_v43  ;;  %1920 = vmatpush.bf16.msra.mxu1 %v3135_v47 }
 0x6ff   :  { %1933 = vmatpush.bf16.msra.mxu2 %v3137_v48  ;;  %1946 = vmatpush.bf16.msra.mxu3 %v3143_v56 }
 0x702   :  { %1908 = vmatpush.bf16.msra.mxu0 %v3141_v55  ;;  %1921 = vmatpush.bf16.msra.mxu1 %v3147_v59 }
 0x703   :  { %1934 = vmatpush.bf16.msra.mxu2 %v3149_v60  ;;  %1947 = vmatpush.bf16.msra.mxu3 %v3155_v6 }
 0x706   :  { %1909 = vmatpush.bf16.msra.mxu0 %v3153_v4  ;;  %1922 = vmatpush.bf16.msra.mxu1 %v3159_v12 }
 0x707   :  { %1935 = vmatpush.bf16.msra.mxu2 %v3161_v13  ;;  %1948 = vmatpush.bf16.msra.mxu3 %v3176_v25 }
 0x70a   :  { %1910 = vmatpush.bf16.msra.mxu0 %v3174_v24  ;;  %1923 = vmatpush.bf16.msra.mxu1 %v3181_v29 }
 0x70b   :  { %1936 = vmatpush.bf16.msra.mxu2 %v3183_v31  ;;  %1949 = vmatpush.bf16.msra.mxu3 %v3189_v45 }
 0x70e   :  { %1911 = vmatpush.bf16.msra.mxu0 %v3187_v41  ;;  %1924 = vmatpush.bf16.msra.mxu1 %v3193_v46 }
 0x70f   :  { %1937 = vmatpush.bf16.msra.mxu2 %v3195_v49  ;;  %1950 = vmatpush.bf16.msra.mxu3 %v3201_v53 }
 0x76d   :  { %v1641_v58 = vpop.f32.mrf.mxu0  ;;  %v1654_v51 = vpop.f32.mrf.mxu1 }
 0x76e   :  { %v1684_v40 = vadd.f32 %v1641_v58, %v1627_v22  ;;  %v1685_v50 = vadd.f32 %v1654_v51, %v1628_v62 }
 0x770   :  { %v2670_v42 = vmul.f32 -1.442695, %v1684_v40  ;;  %v2671_v54 = vmul.f32 -1.442695, %v1685_v50 }
 0x772   :  { %2891 = vpow2.f32 %v2670_v42 }
 0x773   :  { %2893 = vpow2.f32 %v2671_v54 }
 0x774   :  { %v1667_v63 = vpop.f32.mrf.mxu2  ;;  %v1680_v20 = vpop.f32.mrf.mxu3 }
 0x775   :  { %v1686_v32 = vadd.f32 %v1667_v63, %v1629_v38  ;;  %v1643_v1 = vpop.f32.mrf.mxu0  ;;  %v1656_v2 = vpop.f32.mrf.mxu1  ;;  %v1687_v11 = vadd.f32 %v1680_v20, %v1630_v28 }
 0x777   :  { %v2672_v61 = vmul.f32 -1.442695, %v1686_v32 }
 0x778   :  { %v2892_v17 = vpop.eup %2891 }
 0x779   :  { %v2894_v27 = vpop.eup %2893  ;;  %v1697_v39 = vadd.f32 1.0, %v2892_v17  ;;  %2895 = vpow2.f32 %v2672_v61 }
 0x77a   :  { %v1698_v16 = vadd.f32 1.0, %v2894_v27 }
 0x77b   :  { %2897 = vrcp.f32 %v1697_v39  ;;  %v1711_v40 = vand.u32 2147483648, %v1697_v39  ;;  %v1709_v54 = vand.u32 2147483647, %v1697_v39  ;;  %vm1705_vm0 = vweird.f32 %v1697_v39 }
 0x77c   :  { %2899 = vrcp.f32 %v1698_v16  ;;  %v1669_v15 = vpop.f32.mrf.mxu2  ;;  %v1682_v8 = vpop.f32.mrf.mxu3  ;;  %v1726_v50 = vand.u32 2147483648, %v1698_v16  ;;  %v1724_v63 = vand.u32 2147483647, %v1698_v16  ;;  %vm1720_vm1 = vweird.f32 %v1698_v16 }
 0x77d   :  { %v1712_v2 = vor.u32 1.1754944e-38, %v1711_v40  ;;  %vm1710_vm4 = vcmp.eq.f32.partialorder %v1709_v54, 8.507059e+37  ;;  %v1757_v40 = vpop.permute.xlu1 %1756 }
 0x77e   :  { %v1727_v17 = vor.u32 1.1754944e-38, %v1726_v50  ;;  %vm1725_vm5 = vcmp.eq.f32.partialorder %v1724_v63, 8.507059e+37  ;;  %vm1758_vm10 = vcmp.eq.s32.totalorder %v1757_v40, 1  ;;  %v2026_v40 = vsel %vm2025_vm11, 1, %v3050_v21 }
 0x77f   :  { %v2896_v26 = vpop.eup %2895  ;;  %2028 = vperm.xlu0 %2728, %v2026_v40  }
 0x780   :  { %v1699_v37 = vadd.f32 1.0, %v2896_v26 }
 0x781   :  { %v2898_v33 = vpop.eup %2897 }
 0x782   :  { %v2900_v52 = vpop.eup %2899  ;;  %v1701_v22 = vmul.f32 %v2898_v33, %v1697_v39  ;;  %2901 = vrcp.f32 %v1699_v37  ;;  %vm1706_vm14 = vweird.f32 %v2898_v33  ;;  %vm1735_vm7 = vweird.f32 %v1699_v37 }
 0x783   :  { %v1716_v62 = vmul.f32 %v2900_v52, %v1698_v16  ;;  %2903 = vtanh.f32 %v1687_v11  ;;  %vm1721_vm15 = vweird.f32 %v2900_v52  ;;  %vm1707_vm2 = vmor %vm1705_vm0, %vm1706_vm14 }
 0x784   :  { %v1702_v58 = vsub.f32 1.0, %v1701_v22  ;;  %vm1722_vm3 = vmor %vm1720_vm1, %vm1721_vm15 }
 0x785   :  { %v1717_v51 = vsub.f32 1.0, %v1716_v62 }
 0x786   :  { %v1703_v42 = vmul.f32 %v2898_v33, %v1702_v58  ;;  %v1741_v58 = vand.u32 2147483648, %v1699_v37 }
 0x787   :  { %v1718_v38 = vmul.f32 %v2900_v52, %v1717_v51 }
 0x788   :  { %v2902_v32 = vpop.eup %2901  ;;  %v1704_v1 = vadd.f32 %v2898_v33, %v1703_v42  ;;  %v1742_v50 = vor.u32 1.1754944e-38, %v1741_v58 }
 0x789   :  { %v1731_v20 = vmul.f32 %v2902_v32, %v1699_v37  ;;  %v1719_v61 = vadd.f32 %v2900_v52, %v1718_v38  ;;  %v2904_v15 = vpop.eup %2903  ;;  %vm1736_vm6 = vweird.f32 %v2902_v32 }
 0x78a   :  { %v1708_v27 = vsel %vm1707_vm2, %v2898_v33, %v1704_v1  ;;  %v1739_v33 = vand.u32 2147483647, %v1699_v37  ;;  %vm1737_vm8 = vmor %vm1735_vm7, %vm1736_vm6  ;;  %v1764_v37 = vld [vmem:[#allocation8 + $0x168] sm:$0xff] }
 0x78b   :  { %v1732_v8 = vsub.f32 1.0, %v1731_v20  ;;  %v1713_v28 = vsel %vm1710_vm4, %v1712_v2, %v1708_v27  ;;  %v1723_v57 = vsel %vm1722_vm3, %v2900_v52, %v1719_v61 }
 0x78c   :  { %v1728_v26 = vsel %vm1725_vm5, %v1727_v17, %v1723_v57  ;;  %v1747_v11 = vmul.f32 %v2904_v15, %v1713_v28  ;;  %vm1740_vm9 = vcmp.eq.f32.partialorder %v1739_v33, 8.507059e+37  ;;  %v1765_v17 = vld [vmem:[#allocation8 + $0x170] sm:$0xff] }
 0x78d   :  { %v1746_v22 = vmul.f32 %v1728_v26, %v3650_v3  ;;  %v1733_v62 = vmul.f32 %v2902_v32, %v1732_v8 }
 0x78f   :  { %v3691_v39 = vadd.f32 %v1747_v11, %v1746_v22  ;;  %v1734_v16 = vadd.f32 %v2902_v32, %v1733_v62 }
 0x791   :  { %2905 = vtanh.f32 %v3691_v39  ;;  %v1738_v51 = vsel %vm1737_vm8, %v2902_v32, %v1734_v16 }
 0x792   :  { %v1743_v42 = vsel %vm1740_vm9, %v1742_v50, %v1738_v51  ;;  %v1766_v51 = vld [vmem:[#allocation8 + $0x178] sm:$0xff]  ;;  %vm2161_vm9 = vcmp.eq.s32.totalorder %v3645_v0, 13 }
 0x797   :  { %v2906_v52 = vpop.eup %2905 }
 0x798   :  { %v1750_v54 = vmul.f32 %v2906_v52, %v1743_v42 }
 0x79a   :  { %v3695_v3 = vsel %vm1758_vm10, %v1750_v54, %v3654_v7  ;;  %v1767_v38 = vpack.c.bf16 %v1750_v54, %v1750_v54  ;;  %v1763_v7 = vld [vmem:[#allocation8 + $0x160] sm:$0xff] }
 0x79c   :  { %1776 = vmatmul.bf16.vlgmr.msrb.gmra.mxu0 %v1767_v38  ;;  %1789 = vmatmul.bf16.vlgmr.msrb.gmra.mxu1 %v1767_v38 }
 0x79d   :  { %1802 = vmatmul.bf16.vlgmr.msrb.gmra.mxu2 %v1767_v38  ;;  %1815 = vmatmul.bf16.vlgmr.msrb.gmra.mxu3 %v1767_v38 }
 0x79e   :  { %2040 = vmatpush.bf16.msrb.mxu0 %v3098_v5  ;;  %2053 = vmatpush.bf16.msrb.mxu1 %v3100_v9 }
 0x79f   :  { %2066 = vmatpush.bf16.msrb.mxu2 %v3102_v10  ;;  %2079 = vmatpush.bf16.msrb.mxu3 %v3113_v23 }
 0x7a2   :  { %2041 = vmatpush.bf16.msrb.mxu0 %v3105_v14  ;;  %2054 = vmatpush.bf16.msrb.mxu1 %v3109_v18 }
 0x7a3   :  { %2067 = vmatpush.bf16.msrb.mxu2 %v3111_v19  ;;  %2080 = vmatpush.bf16.msrb.mxu3 %v3125_v36 }
 0x7a6   :  { %2042 = vmatpush.bf16.msrb.mxu0 %v3117_v30  ;;  %2055 = vmatpush.bf16.msrb.mxu1 %v3121_v34 }
 0x7a7   :  { %2068 = vmatpush.bf16.msrb.mxu2 %v3123_v35  ;;  %2081 = vmatpush.bf16.msrb.mxu3 %v3131_v44 }
 0x7aa   :  { %2043 = vmatpush.bf16.msrb.mxu0 %v3129_v43  ;;  %2056 = vmatpush.bf16.msrb.mxu1 %v3135_v47 }
 0x7ab   :  { %2069 = vmatpush.bf16.msrb.mxu2 %v3137_v48  ;;  %2082 = vmatpush.bf16.msrb.mxu3 %v3143_v56 }
 0x7ae   :  { %2044 = vmatpush.bf16.msrb.mxu0 %v3141_v55  ;;  %2057 = vmatpush.bf16.msrb.mxu1 %v3147_v59 }
 0x7af   :  { %2070 = vmatpush.bf16.msrb.mxu2 %v3149_v60  ;;  %2083 = vmatpush.bf16.msrb.mxu3 %v3155_v6 }
 0x7b2   :  { %2045 = vmatpush.bf16.msrb.mxu0 %v3153_v4  ;;  %2058 = vmatpush.bf16.msrb.mxu1 %v3159_v12 }
 0x7b3   :  { %2071 = vmatpush.bf16.msrb.mxu2 %v3161_v13  ;;  %2084 = vmatpush.bf16.msrb.mxu3 %v3176_v25 }
 0x7b6   :  { %2046 = vmatpush.bf16.msrb.mxu0 %v3174_v24  ;;  %2059 = vmatpush.bf16.msrb.mxu1 %v3181_v29 }
 0x7b7   :  { %2072 = vmatpush.bf16.msrb.mxu2 %v3183_v31  ;;  %2085 = vmatpush.bf16.msrb.mxu3 %v3189_v45 }
 0x7ba   :  { %2047 = vmatpush.bf16.msrb.mxu0 %v3187_v41  ;;  %2060 = vmatpush.bf16.msrb.mxu1 %v3193_v46 }
 0x7bb   :  { %2073 = vmatpush.bf16.msrb.mxu2 %v3195_v49  ;;  %2086 = vmatpush.bf16.msrb.mxu3 %v3201_v53 }
 0x819   :  { %v1777_v63 = vpop.f32.mrf.mxu0  ;;  %v1790_v32 = vpop.f32.mrf.mxu1 }
 0x81a   :  { %v1820_v1 = vadd.f32 %v1777_v63, %v1763_v7  ;;  %v1821_v20 = vadd.f32 %v1790_v32, %v1764_v37 }
 0x81c   :  { %v2673_v2 = vmul.f32 -1.442695, %v1820_v1  ;;  %v2674_v61 = vmul.f32 -1.442695, %v1821_v20 }
 0x81e   :  { %2907 = vpow2.f32 %v2673_v2 }
 0x81f   :  { %2909 = vpow2.f32 %v2674_v61 }
 0x820   :  { %v1803_v27 = vpop.f32.mrf.mxu2  ;;  %v1816_v15 = vpop.f32.mrf.mxu3 }
 0x821   :  { %v1822_v8 = vadd.f32 %v1803_v27, %v1765_v17  ;;  %v1779_v28 = vpop.f32.mrf.mxu0  ;;  %v1792_v57 = vpop.f32.mrf.mxu1  ;;  %v1823_v54 = vadd.f32 %v1816_v15, %v1766_v51 }
 0x823   :  { %v2675_v26 = vmul.f32 -1.442695, %v1822_v8 }
 0x824   :  { %v2908_v11 = vpop.eup %2907 }
 0x825   :  { %v2910_v22 = vpop.eup %2909  ;;  %v1833_v62 = vadd.f32 1.0, %v2908_v11  ;;  %2911 = vpow2.f32 %v2675_v26 }
 0x826   :  { %v1834_v16 = vadd.f32 1.0, %v2910_v22 }
 0x827   :  { %2913 = vrcp.f32 %v1833_v62  ;;  %v1847_v1 = vand.u32 2147483648, %v1833_v62  ;;  %v1845_v61 = vand.u32 2147483647, %v1833_v62  ;;  %vm1841_vm14 = vweird.f32 %v1833_v62 }
 0x828   :  { %2915 = vrcp.f32 %v1834_v16  ;;  %v1805_v58 = vpop.f32.mrf.mxu2  ;;  %v1818_v33 = vpop.f32.mrf.mxu3  ;;  %v1862_v20 = vand.u32 2147483648, %v1834_v16  ;;  %v1860_v27 = vand.u32 2147483647, %v1834_v16  ;;  %vm1856_vm15 = vweird.f32 %v1834_v16 }
 0x829   :  { %v1848_v57 = vor.u32 1.1754944e-38, %v1847_v1  ;;  %vm1846_vm2 = vcmp.eq.f32.partialorder %v1845_v61, 8.507059e+37  ;;  %v1893_v1 = vpop.permute.xlu2 %1892 }
 0x82a   :  { %v1863_v11 = vor.u32 1.1754944e-38, %v1862_v20  ;;  %vm1861_vm3 = vcmp.eq.f32.partialorder %v1860_v27, 8.507059e+37  ;;  %vm1894_vm8 = vcmp.eq.s32.totalorder %v1893_v1, 1  ;;  %v2162_v1 = vsel %vm2161_vm9, 1, %v3050_v21 }
 0x82b   :  { %v2912_v50 = vpop.eup %2911  ;;  %2164 = vperm.xlu1 %2729, %v2162_v1  }
 0x82c   :  { %v1835_v52 = vadd.f32 1.0, %v2912_v50 }
 0x82d   :  { %v2914_v42 = vpop.eup %2913 }
 0x82e   :  { %v2916_v38 = vpop.eup %2915  ;;  %v1837_v7 = vmul.f32 %v2914_v42, %v1833_v62  ;;  %2917 = vrcp.f32 %v1835_v52  ;;  %vm1842_vm12 = vweird.f32 %v2914_v42  ;;  %vm1871_vm5 = vweird.f32 %v1835_v52 }
 0x82f   :  { %v1852_v37 = vmul.f32 %v2916_v38, %v1834_v16  ;;  %2919 = vtanh.f32 %v1823_v54  ;;  %vm1857_vm13 = vweird.f32 %v2916_v38  ;;  %vm1843_vm0 = vmor %vm1841_vm14, %vm1842_vm12 }
 0x830   :  { %v1838_v63 = vsub.f32 1.0, %v1837_v7  ;;  %vm1858_vm1 = vmor %vm1856_vm15, %vm1857_vm13 }
 0x831   :  { %v1853_v32 = vsub.f32 1.0, %v1852_v37 }
 0x832   :  { %v1839_v2 = vmul.f32 %v2914_v42, %v1838_v63  ;;  %v1877_v63 = vand.u32 2147483648, %v1835_v52 }
 0x833   :  { %v1854_v17 = vmul.f32 %v2916_v38, %v1853_v32 }
 0x834   :  { %v2918_v8 = vpop.eup %2917  ;;  %v1840_v28 = vadd.f32 %v2914_v42, %v1839_v2  ;;  %v1878_v20 = vor.u32 1.1754944e-38, %v1877_v63 }
 0x835   :  { %v1867_v15 = vmul.f32 %v2918_v8, %v1835_v52  ;;  %v1855_v26 = vadd.f32 %v2916_v38, %v1854_v17  ;;  %v2920_v58 = vpop.eup %2919  ;;  %vm1872_vm4 = vweird.f32 %v2918_v8 }
 0x836   :  { %v1844_v22 = vsel %vm1843_vm0, %v2914_v42, %v1840_v28  ;;  %v1875_v42 = vand.u32 2147483647, %v1835_v52  ;;  %vm1873_vm6 = vmor %vm1871_vm5, %vm1872_vm4  ;;  %v1900_v52 = vld [vmem:[#allocation8 + $0x188] sm:$0xff] }
 0x837   :  { %v1868_v33 = vsub.f32 1.0, %v1867_v15  ;;  %v1849_v51 = vsel %vm1846_vm2, %v1848_v57, %v1844_v22  ;;  %v1859_v40 = vsel %vm1858_vm1, %v2916_v38, %v1855_v26 }
 0x838   :  { %v1864_v50 = vsel %vm1861_vm3, %v1863_v11, %v1859_v40  ;;  %v1883_v54 = vmul.f32 %v2920_v58, %v1849_v51  ;;  %vm1876_vm7 = vcmp.eq.f32.partialorder %v1875_v42, 8.507059e+37  ;;  %v1901_v11 = vld [vmem:[#allocation8 + $0x190] sm:$0xff] }
 0x839   :  { %v1882_v7 = vmul.f32 %v1864_v50, %v3691_v39  ;;  %v1869_v37 = vmul.f32 %v2918_v8, %v1868_v33 }
 0x83b   :  { %v3732_v62 = vadd.f32 %v1883_v54, %v1882_v7  ;;  %v1870_v16 = vadd.f32 %v2918_v8, %v1869_v37 }
 0x83d   :  { %2921 = vtanh.f32 %v3732_v62  ;;  %v1874_v32 = vsel %vm1873_vm6, %v2918_v8, %v1870_v16 }
 0x83e   :  { %v1879_v2 = vsel %vm1876_vm7, %v1878_v20, %v1874_v32  ;;  %v1902_v32 = vld [vmem:[#allocation8 + $0x198] sm:$0xff]  ;;  %vm2297_vm7 = vcmp.eq.s32.totalorder %v3645_v0, 14 }
 0x843   :  { %v2922_v38 = vpop.eup %2921 }
 0x844   :  { %v1886_v61 = vmul.f32 %v2922_v38, %v1879_v2 }
 0x846   :  { %v1903_v39 = vpack.c.bf16 %v1886_v61, %v1886_v61  ;;  %v3736_v17 = vsel %vm1894_vm8, %v1886_v61, %v3695_v3  ;;  %v1899_v3 = vld [vmem:[#allocation8 + $0x180] sm:$0xff] }
 0x848   :  { %1912 = vmatmul.bf16.vlgmr.msra.gmra.mxu0 %v1903_v39  ;;  %1925 = vmatmul.bf16.vlgmr.msra.gmra.mxu1 %v1903_v39 }
 0x849   :  { %1938 = vmatmul.bf16.vlgmr.msra.gmra.mxu2 %v1903_v39  ;;  %1951 = vmatmul.bf16.vlgmr.msra.gmra.mxu3 %v1903_v39 }
 0x84a   :  { %2176 = vmatpush.bf16.msra.mxu0 %v3098_v5  ;;  %2189 = vmatpush.bf16.msra.mxu1 %v3100_v9 }
 0x84b   :  { %2202 = vmatpush.bf16.msra.mxu2 %v3102_v10  ;;  %2215 = vmatpush.bf16.msra.mxu3 %v3113_v23 }
 0x84e   :  { %2177 = vmatpush.bf16.msra.mxu0 %v3105_v14  ;;  %2190 = vmatpush.bf16.msra.mxu1 %v3109_v18 }
 0x84f   :  { %2203 = vmatpush.bf16.msra.mxu2 %v3111_v19  ;;  %2216 = vmatpush.bf16.msra.mxu3 %v3125_v36 }
 0x852   :  { %2178 = vmatpush.bf16.msra.mxu0 %v3117_v30  ;;  %2191 = vmatpush.bf16.msra.mxu1 %v3121_v34 }
 0x853   :  { %2204 = vmatpush.bf16.msra.mxu2 %v3123_v35  ;;  %2217 = vmatpush.bf16.msra.mxu3 %v3131_v44 }
 0x856   :  { %2179 = vmatpush.bf16.msra.mxu0 %v3129_v43  ;;  %2192 = vmatpush.bf16.msra.mxu1 %v3135_v47 }
 0x857   :  { %2205 = vmatpush.bf16.msra.mxu2 %v3137_v48  ;;  %2218 = vmatpush.bf16.msra.mxu3 %v3143_v56 }
 0x85a   :  { %2180 = vmatpush.bf16.msra.mxu0 %v3141_v55  ;;  %2193 = vmatpush.bf16.msra.mxu1 %v3147_v59 }
 0x85b   :  { %2206 = vmatpush.bf16.msra.mxu2 %v3149_v60  ;;  %2219 = vmatpush.bf16.msra.mxu3 %v3155_v6 }
 0x85e   :  { %2181 = vmatpush.bf16.msra.mxu0 %v3153_v4  ;;  %2194 = vmatpush.bf16.msra.mxu1 %v3159_v12 }
 0x85f   :  { %2207 = vmatpush.bf16.msra.mxu2 %v3161_v13  ;;  %2220 = vmatpush.bf16.msra.mxu3 %v3176_v25 }
 0x862   :  { %2182 = vmatpush.bf16.msra.mxu0 %v3174_v24  ;;  %2195 = vmatpush.bf16.msra.mxu1 %v3181_v29 }
 0x863   :  { %2208 = vmatpush.bf16.msra.mxu2 %v3183_v31  ;;  %2221 = vmatpush.bf16.msra.mxu3 %v3189_v45 }
 0x866   :  { %2183 = vmatpush.bf16.msra.mxu0 %v3187_v41  ;;  %2196 = vmatpush.bf16.msra.mxu1 %v3193_v46 }
 0x867   :  { %2209 = vmatpush.bf16.msra.mxu2 %v3195_v49  ;;  %2222 = vmatpush.bf16.msra.mxu3 %v3201_v53 }
 0x8c5   :  { %v1913_v27 = vpop.f32.mrf.mxu0  ;;  %v1926_v8 = vpop.f32.mrf.mxu1 }
 0x8c6   :  { %v1956_v28 = vadd.f32 %v1913_v27, %v1899_v3  ;;  %v1957_v15 = vadd.f32 %v1926_v8, %v1900_v52 }
 0x8c8   :  { %v2676_v57 = vmul.f32 -1.442695, %v1956_v28  ;;  %v2677_v26 = vmul.f32 -1.442695, %v1957_v15 }
 0x8ca   :  { %2923 = vpow2.f32 %v2676_v57 }
 0x8cb   :  { %2925 = vpow2.f32 %v2677_v26 }
 0x8cc   :  { %v1939_v22 = vpop.f32.mrf.mxu2  ;;  %v1952_v58 = vpop.f32.mrf.mxu3 }
 0x8cd   :  { %v1958_v33 = vadd.f32 %v1939_v22, %v1901_v11  ;;  %v1915_v51 = vpop.f32.mrf.mxu0  ;;  %v1928_v40 = vpop.f32.mrf.mxu1  ;;  %v1959_v61 = vadd.f32 %v1952_v58, %v1902_v32 }
 0x8cf   :  { %v2678_v50 = vmul.f32 -1.442695, %v1958_v33 }
 0x8d0   :  { %v2924_v54 = vpop.eup %2923 }
 0x8d1   :  { %v2926_v7 = vpop.eup %2925  ;;  %v1969_v37 = vadd.f32 1.0, %v2924_v54  ;;  %2927 = vpow2.f32 %v2678_v50 }
 0x8d2   :  { %v1970_v16 = vadd.f32 1.0, %v2926_v7 }
 0x8d3   :  { %2929 = vrcp.f32 %v1969_v37  ;;  %v1983_v28 = vand.u32 2147483648, %v1969_v37  ;;  %v1981_v26 = vand.u32 2147483647, %v1969_v37  ;;  %vm1977_vm12 = vweird.f32 %v1969_v37 }
 0x8d4   :  { %2931 = vrcp.f32 %v1970_v16  ;;  %v1941_v63 = vpop.f32.mrf.mxu2  ;;  %v1954_v42 = vpop.f32.mrf.mxu3  ;;  %v1998_v15 = vand.u32 2147483648, %v1970_v16  ;;  %v1996_v22 = vand.u32 2147483647, %v1970_v16  ;;  %vm1992_vm13 = vweird.f32 %v1970_v16 }
 0x8d5   :  { %v1984_v40 = vor.u32 1.1754944e-38, %v1983_v28  ;;  %vm1982_vm0 = vcmp.eq.f32.partialorder %v1981_v26, 8.507059e+37  ;;  %v2029_v28 = vpop.permute.xlu0 %2028 }
 0x8d6   :  { %v1999_v54 = vor.u32 1.1754944e-38, %v1998_v15  ;;  %vm1997_vm1 = vcmp.eq.f32.partialorder %v1996_v22, 8.507059e+37  ;;  %vm2030_vm6 = vcmp.eq.s32.totalorder %v2029_v28, 1 }
 0x8d7   :  { %v2928_v20 = vpop.eup %2927 }
 0x8d8   :  { %v1971_v38 = vadd.f32 1.0, %v2928_v20 }
 0x8d9   :  { %v2930_v2 = vpop.eup %2929 }
 0x8da   :  { %v2932_v39 = vpop.eup %2931  ;;  %v1973_v3 = vmul.f32 %v2930_v2, %v1969_v37  ;;  %2933 = vrcp.f32 %v1971_v38  ;;  %vm1978_vm10 = vweird.f32 %v2930_v2  ;;  %vm2007_vm3 = vweird.f32 %v1971_v38 }
 0x8db   :  { %v1988_v52 = vmul.f32 %v2932_v39, %v1970_v16  ;;  %2935 = vtanh.f32 %v1959_v61  ;;  %vm1993_vm11 = vweird.f32 %v2932_v39  ;;  %vm1979_vm14 = vmor %vm1977_vm12, %vm1978_vm10 }
 0x8dc   :  { %v1974_v27 = vsub.f32 1.0, %v1973_v3  ;;  %vm1994_vm15 = vmor %vm1992_vm13, %vm1993_vm11 }
 0x8dd   :  { %v1989_v8 = vsub.f32 1.0, %v1988_v52 }
 0x8de   :  { %v1975_v57 = vmul.f32 %v2930_v2, %v1974_v27  ;;  %v2013_v27 = vand.u32 2147483648, %v1971_v38 }
 0x8df   :  { %v1990_v11 = vmul.f32 %v2932_v39, %v1989_v8 }
 0x8e0   :  { %v2934_v33 = vpop.eup %2933  ;;  %v1976_v51 = vadd.f32 %v2930_v2, %v1975_v57  ;;  %v2014_v15 = vor.u32 1.1754944e-38, %v2013_v27 }
 0x8e1   :  { %v2003_v58 = vmul.f32 %v2934_v33, %v1971_v38  ;;  %v1991_v50 = vadd.f32 %v2932_v39, %v1990_v11  ;;  %v2936_v63 = vpop.eup %2935  ;;  %vm2008_vm2 = vweird.f32 %v2934_v33 }
 0x8e2   :  { %v1980_v7 = vsel %vm1979_vm14, %v2930_v2, %v1976_v51  ;;  %v2011_v2 = vand.u32 2147483647, %v1971_v38  ;;  %vm2009_vm4 = vmor %vm2007_vm3, %vm2008_vm2 }
 0x8e3   :  { %v2004_v42 = vsub.f32 1.0, %v2003_v58  ;;  %v1985_v32 = vsel %vm1982_vm0, %v1984_v40, %v1980_v7  ;;  %v1995_v1 = vsel %vm1994_vm15, %v2932_v39, %v1991_v50 }
 0x8e4   :  { %v2000_v20 = vsel %vm1997_vm1, %v1999_v54, %v1995_v1  ;;  %v2019_v61 = vmul.f32 %v2936_v63, %v1985_v32  ;;  %vm2012_vm5 = vcmp.eq.f32.partialorder %v2011_v2, 8.507059e+37 }
 0x8e5   :  { %v2018_v3 = vmul.f32 %v2000_v20, %v3732_v62  ;;  %v2005_v52 = vmul.f32 %v2934_v33, %v2004_v42 }
 0x8e7   :  { %v3773_v37 = vadd.f32 %v2019_v61, %v2018_v3  ;;  %v2006_v16 = vadd.f32 %v2934_v33, %v2005_v52 }
 0x8e9   :  { %2937 = vtanh.f32 %v3773_v37  ;;  %v2010_v8 = vsel %vm2009_vm4, %v2934_v33, %v2006_v16 }
 0x8ea   :  { %v2015_v57 = vsel %vm2012_vm5, %v2014_v15, %v2010_v8 }
 0x8ef   :  { %v2938_v39 = vpop.eup %2937 }
 0x8f0   :  { %v2022_v26 = vmul.f32 %v2938_v39, %v2015_v57  ;;  %v2165_v57 = vpop.permute.xlu1 %2164 }
 0x8f1   :  { %vm2166_vm4 = vcmp.eq.s32.totalorder %v2165_v57, 1 }
 0x8f2   :  { %v2039_v62 = vpack.c.bf16 %v2022_v26, %v2022_v26  ;;  %v3777_v11 = vsel %vm2030_vm6, %v2022_v26, %v3736_v17 }
 0x8f4   :  { %2048 = vmatmul.bf16.vlgmr.msrb.gmra.mxu0 %v2039_v62  ;;  %2061 = vmatmul.bf16.vlgmr.msrb.gmra.mxu1 %v2039_v62 }
 0x8f5   :  { %2074 = vmatmul.bf16.vlgmr.msrb.gmra.mxu2 %v2039_v62  ;;  %2087 = vmatmul.bf16.vlgmr.msrb.gmra.mxu3 %v2039_v62 }
 0x8f6   :  { %2312 = vmatpush.bf16.msrb.mxu0 %v3098_v5  ;;  %2325 = vmatpush.bf16.msrb.mxu1 %v3100_v9  ;;  %v2035_v5 = vld [vmem:[#allocation8 + $0x1a0] sm:$0xff]  ;;  %v2036_v9 = vld [vmem:[#allocation8 + $0x1a8] sm:$0xff] }
 0x8f7   :  { %2338 = vmatpush.bf16.msrb.mxu2 %v3102_v10  ;;  %2351 = vmatpush.bf16.msrb.mxu3 %v3113_v23 }
 0x8fa   :  { %2313 = vmatpush.bf16.msrb.mxu0 %v3105_v14  ;;  %2326 = vmatpush.bf16.msrb.mxu1 %v3109_v18 }
 0x8fb   :  { %2339 = vmatpush.bf16.msrb.mxu2 %v3111_v19  ;;  %2352 = vmatpush.bf16.msrb.mxu3 %v3125_v36 }
 0x8fe   :  { %2314 = vmatpush.bf16.msrb.mxu0 %v3117_v30  ;;  %2327 = vmatpush.bf16.msrb.mxu1 %v3121_v34  ;;  %v2037_v34 = vld [vmem:[#allocation8 + $0x1b0] sm:$0xff] }
 0x8ff   :  { %2340 = vmatpush.bf16.msrb.mxu2 %v3123_v35  ;;  %2353 = vmatpush.bf16.msrb.mxu3 %v3131_v44 }
 0x902   :  { %2315 = vmatpush.bf16.msrb.mxu0 %v3129_v43  ;;  %2328 = vmatpush.bf16.msrb.mxu1 %v3135_v47 }
 0x903   :  { %2341 = vmatpush.bf16.msrb.mxu2 %v3137_v48  ;;  %2354 = vmatpush.bf16.msrb.mxu3 %v3143_v56 }
 0x906   :  { %2316 = vmatpush.bf16.msrb.mxu0 %v3141_v55  ;;  %2329 = vmatpush.bf16.msrb.mxu1 %v3147_v59 }
 0x907   :  { %2342 = vmatpush.bf16.msrb.mxu2 %v3149_v60  ;;  %2355 = vmatpush.bf16.msrb.mxu3 %v3155_v6 }
 0x90a   :  { %2317 = vmatpush.bf16.msrb.mxu0 %v3153_v4  ;;  %2330 = vmatpush.bf16.msrb.mxu1 %v3159_v12  ;;  %v2038_v12 = vld [vmem:[#allocation8 + $0x1b8] sm:$0xff] }
 0x90b   :  { %2343 = vmatpush.bf16.msrb.mxu2 %v3161_v13  ;;  %2356 = vmatpush.bf16.msrb.mxu3 %v3176_v25  ;;  %v2298_v13 = vsel %vm2297_vm7, 1, %v3050_v21 }
 0x90c   :  { %2300 = vperm.xlu2 %2730, %v2298_v13  }
 0x90e   :  { %2318 = vmatpush.bf16.msrb.mxu0 %v3174_v24  ;;  %2331 = vmatpush.bf16.msrb.mxu1 %v3181_v29 }
 0x90f   :  { %2344 = vmatpush.bf16.msrb.mxu2 %v3183_v31  ;;  %2357 = vmatpush.bf16.msrb.mxu3 %v3189_v45 }
 0x912   :  { %2319 = vmatpush.bf16.msrb.mxu0 %v3187_v41  ;;  %2332 = vmatpush.bf16.msrb.mxu1 %v3193_v46 }
 0x913   :  { %2345 = vmatpush.bf16.msrb.mxu2 %v3195_v49  ;;  %2358 = vmatpush.bf16.msrb.mxu3 %v3201_v53 }
 0x971   :  { %v2049_v10 = vpop.f32.mrf.mxu0  ;;  %v2062_v14 = vpop.f32.mrf.mxu1 }
 0x972   :  { %v2092_v18 = vadd.f32 %v2049_v10, %v2035_v5  ;;  %v2093_v19 = vadd.f32 %v2062_v14, %v2036_v9  ;;  %v2171_v14 = vld [vmem:[#allocation8 + $0x1c0] sm:$0xff] }
 0x974   :  { %v2679_v23 = vmul.f32 -1.442695, %v2092_v18  ;;  %v2680_v30 = vmul.f32 -1.442695, %v2093_v19  ;;  %v2172_v18 = vld [vmem:[#allocation8 + $0x1c8] sm:$0xff] }
 0x976   :  { %2939 = vpow2.f32 %v2679_v23 }
 0x977   :  { %2941 = vpow2.f32 %v2680_v30 }
 0x978   :  { %v2075_v35 = vpop.f32.mrf.mxu2  ;;  %v2088_v36 = vpop.f32.mrf.mxu3 }
 0x979   :  { %v2094_v43 = vadd.f32 %v2075_v35, %v2037_v34  ;;  %v2051_v44 = vpop.f32.mrf.mxu0  ;;  %v2064_v47 = vpop.f32.mrf.mxu1  ;;  %v2095_v31 = vadd.f32 %v2088_v36, %v2038_v12 }
 0x97b   :  { %v2681_v48 = vmul.f32 -1.442695, %v2094_v43  ;;  %v2173_v43 = vld [vmem:[#allocation8 + $0x1d0] sm:$0xff] }
 0x97c   :  { %v2940_v55 = vpop.eup %2939 }
 0x97d   :  { %v2942_v56 = vpop.eup %2941  ;;  %v2105_v59 = vadd.f32 1.0, %v2940_v55  ;;  %2943 = vpow2.f32 %v2681_v48 }
 0x97e   :  { %v2106_v60 = vadd.f32 1.0, %v2942_v56 }
 0x97f   :  { %2945 = vrcp.f32 %v2105_v59  ;;  %v2119_v17 = vand.u32 2147483648, %v2105_v59  ;;  %v2117_v0 = vand.u32 2147483647, %v2105_v59  ;;  %vm2113_vm10 = vweird.f32 %v2105_v59 }
 0x980   :  { %2947 = vrcp.f32 %v2106_v60  ;;  %v2077_v4 = vpop.f32.mrf.mxu2  ;;  %v2090_v6 = vpop.f32.mrf.mxu3  ;;  %v2134_v38 = vand.u32 2147483648, %v2106_v60  ;;  %v2132_v51 = vand.u32 2147483647, %v2106_v60  ;;  %vm2128_vm11 = vweird.f32 %v2106_v60 }
 0x981   :  { %v2120_v54 = vor.u32 1.1754944e-38, %v2119_v17  ;;  %vm2118_vm14 = vcmp.eq.f32.partialorder %v2117_v0, 8.507059e+37 }
 0x982   :  { %v2135_v63 = vor.u32 1.1754944e-38, %v2134_v38  ;;  %vm2133_vm15 = vcmp.eq.f32.partialorder %v2132_v51, 8.507059e+37 }
 0x983   :  { %v2944_v24 = vpop.eup %2943 }
 0x984   :  { %v2107_v25 = vadd.f32 1.0, %v2944_v24  ;;  %v2989_v24 = vld [vmem:[%s3885_s1] sm:$0xff] }
 0x985   :  { %v2946_v29 = vpop.eup %2945  ;;  %vm2433_vm5 = vcmp.eq.s32.totalorder %v2989_v24, 15 }
 0x986   :  { %v2948_v41 = vpop.eup %2947  ;;  %v2109_v45 = vmul.f32 %v2946_v29, %v2105_v59  ;;  %2949 = vrcp.f32 %v2107_v25  ;;  %vm2114_vm8 = vweird.f32 %v2946_v29  ;;  %v2149_v28 = vand.u32 2147483648, %v2107_v25 }
 0x987   :  { %v2124_v46 = vmul.f32 %v2948_v41, %v2106_v60  ;;  %2951 = vtanh.f32 %v2095_v31  ;;  %vm2129_vm9 = vweird.f32 %v2948_v41  ;;  %vm2115_vm12 = vmor %vm2113_vm10, %vm2114_vm8  ;;  %vm2143_vm1 = vweird.f32 %v2107_v25 }
 0x988   :  { %v2110_v49 = vsub.f32 1.0, %v2109_v45  ;;  %vm2130_vm13 = vmor %vm2128_vm11, %vm2129_vm9  ;;  %v2147_v15 = vand.u32 2147483647, %v2107_v25  ;;  %v2150_v26 = vor.u32 1.1754944e-38, %v2149_v28 }
 0x989   :  { %v2125_v53 = vsub.f32 1.0, %v2124_v46 }
 0x98a   :  { %v2111_v22 = vmul.f32 %v2946_v29, %v2110_v49  ;;  %vm2148_vm3 = vcmp.eq.f32.partialorder %v2147_v15, 8.507059e+37 }
 0x98b   :  { %v2126_v33 = vmul.f32 %v2948_v41, %v2125_v53 }
 0x98c   :  { %v2950_v58 = vpop.eup %2949  ;;  %v2112_v40 = vadd.f32 %v2946_v29, %v2111_v22 }
 0x98d   :  { %v2139_v50 = vmul.f32 %v2950_v58, %v2107_v25  ;;  %v2127_v7 = vadd.f32 %v2948_v41, %v2126_v33  ;;  %v2952_v32 = vpop.eup %2951  ;;  %vm2144_vm0 = vweird.f32 %v2950_v58  ;;  %v2174_v25 = vld [vmem:[#allocation8 + $0x1d8] sm:$0xff] }
 0x98e   :  { %v2116_v42 = vsel %vm2115_vm12, %v2946_v29, %v2112_v40  ;;  %vm2145_vm2 = vmor %vm2143_vm1, %vm2144_vm0  ;;  %v2434_v29 = vsel %vm2433_vm5, 1, %v3050_v21 }
 0x98f   :  { %v2140_v1 = vsub.f32 1.0, %v2139_v50  ;;  %v2121_v20 = vsel %vm2118_vm14, %v2120_v54, %v2116_v42  ;;  %v2131_v61 = vsel %vm2130_vm13, %v2948_v41, %v2127_v7  ;;  %2436 = vperm.xlu0 %2728, %v2434_v29   ;;  %v2310_v29 = vld [vmem:[#allocation8 + $0x1f8] sm:$0xff] }
 0x990   :  { %v2136_v3 = vsel %vm2133_vm15, %v2135_v63, %v2131_v61  ;;  %v2155_v52 = vmul.f32 %v2952_v32, %v2121_v20 }
 0x991   :  { %v2154_v16 = vmul.f32 %v2136_v3, %v3773_v37  ;;  %v2141_v27 = vmul.f32 %v2950_v58, %v2140_v1 }
 0x993   :  { %v3814_v2 = vadd.f32 %v2155_v52, %v2154_v16  ;;  %v2142_v8 = vadd.f32 %v2950_v58, %v2141_v27 }
 0x995   :  { %2953 = vtanh.f32 %v3814_v2  ;;  %v2146_v39 = vsel %vm2145_vm2, %v2950_v58, %v2142_v8 }
 0x996   :  { %v2151_v5 = vsel %vm2148_vm3, %v2150_v26, %v2146_v39 }
 0x99b   :  { %v2954_v62 = vpop.eup %2953 }
 0x99c   :  { %v2158_v9 = vmul.f32 %v2954_v62, %v2151_v5  ;;  %v2301_v5 = vpop.permute.xlu2 %2300 }
 0x99d   :  { %vm2302_vm2 = vcmp.eq.s32.totalorder %v2301_v5, 1 }
 0x99e   :  { %v2175_v37 = vpack.c.bf16 %v2158_v9, %v2158_v9  ;;  %v3818_v10 = vsel %vm2166_vm4, %v2158_v9, %v3777_v11 }
 0x9a0   :  { %2184 = vmatmul.bf16.vlgmr.msra.gmra.mxu0 %v2175_v37  ;;  %2197 = vmatmul.bf16.vlgmr.msra.gmra.mxu1 %v2175_v37 }
 0x9a1   :  { %2210 = vmatmul.bf16.vlgmr.msra.gmra.mxu2 %v2175_v37  ;;  %2223 = vmatmul.bf16.vlgmr.msra.gmra.mxu3 %v2175_v37 }
 0xa1d   :  { %v2185_v19 = vpop.f32.mrf.mxu0  ;;  %v2198_v23 = vpop.f32.mrf.mxu1 }
 0xa1e   :  { %v2228_v30 = vadd.f32 %v2185_v19, %v2171_v14  ;;  %v2229_v34 = vadd.f32 %v2198_v23, %v2172_v18  ;;  %v2307_v23 = vld [vmem:[#allocation8 + $0x1e0] sm:$0xff] }
 0xa20   :  { %v2682_v35 = vmul.f32 -1.442695, %v2228_v30  ;;  %v2683_v36 = vmul.f32 -1.442695, %v2229_v34  ;;  %v2308_v30 = vld [vmem:[#allocation8 + $0x1e8] sm:$0xff] }
 0xa22   :  { %2955 = vpow2.f32 %v2682_v35 }
 0xa23   :  { %2957 = vpow2.f32 %v2683_v36 }
 0xa24   :  { %v2211_v44 = vpop.f32.mrf.mxu2  ;;  %v2224_v47 = vpop.f32.mrf.mxu3 }
 0xa25   :  { %v2230_v48 = vadd.f32 %v2211_v44, %v2173_v43  ;;  %v2187_v11 = vpop.f32.mrf.mxu0  ;;  %v2200_v55 = vpop.f32.mrf.mxu1  ;;  %v2231_v46 = vadd.f32 %v2224_v47, %v2174_v25 }
 0xa27   :  { %v2684_v56 = vmul.f32 -1.442695, %v2230_v48  ;;  %v2309_v48 = vld [vmem:[#allocation8 + $0x1f0] sm:$0xff] }
 0xa28   :  { %v2956_v59 = vpop.eup %2955 }
 0xa29   :  { %v2958_v60 = vpop.eup %2957  ;;  %v2241_v4 = vadd.f32 1.0, %v2956_v59  ;;  %2959 = vpow2.f32 %v2684_v56 }
 0xa2a   :  { %v2242_v6 = vadd.f32 1.0, %v2958_v60 }
 0xa2b   :  { %2961 = vrcp.f32 %v2241_v4  ;;  %v2255_v0 = vand.u32 2147483648, %v2241_v4  ;;  %v2253_v58 = vand.u32 2147483647, %v2241_v4  ;;  %vm2249_vm8 = vweird.f32 %v2241_v4 }
 0xa2c   :  { %2963 = vrcp.f32 %v2242_v6  ;;  %v2213_v12 = vpop.f32.mrf.mxu2  ;;  %v2226_v13 = vpop.f32.mrf.mxu3  ;;  %v2270_v33 = vand.u32 2147483648, %v2242_v6  ;;  %v2268_v21 = vand.u32 2147483647, %v2242_v6  ;;  %vm2264_vm9 = vweird.f32 %v2242_v6 }
 0xa2d   :  { %v2256_v63 = vor.u32 1.1754944e-38, %v2255_v0  ;;  %vm2254_vm12 = vcmp.eq.f32.partialorder %v2253_v58, 8.507059e+37 }
 0xa2e   :  { %v2271_v32 = vor.u32 1.1754944e-38, %v2270_v33  ;;  %vm2269_vm13 = vcmp.eq.f32.partialorder %v2268_v21, 8.507059e+37 }
 0xa2f   :  { %v2960_v31 = vpop.eup %2959 }
 0xa30   :  { %v2243_v41 = vadd.f32 1.0, %v2960_v31 }
 0xa31   :  { %v2962_v45 = vpop.eup %2961 }
 0xa32   :  { %v2964_v49 = vpop.eup %2963  ;;  %v2245_v53 = vmul.f32 %v2962_v45, %v2241_v4  ;;  %2965 = vrcp.f32 %v2243_v41  ;;  %vm2250_vm6 = vweird.f32 %v2962_v45  ;;  %v2285_v57 = vand.u32 2147483648, %v2243_v41 }
 0xa33   :  { %v2260_v17 = vmul.f32 %v2964_v49, %v2242_v6  ;;  %2967 = vtanh.f32 %v2231_v46  ;;  %vm2265_vm7 = vweird.f32 %v2964_v49  ;;  %vm2251_vm10 = vmor %vm2249_vm8, %vm2250_vm6  ;;  %vm2279_vm15 = vweird.f32 %v2243_v41 }
 0xa34   :  { %v2246_v38 = vsub.f32 1.0, %v2245_v53  ;;  %vm2266_vm11 = vmor %vm2264_vm9, %vm2265_vm7  ;;  %v2283_v26 = vand.u32 2147483647, %v2243_v41  ;;  %v2286_v9 = vor.u32 1.1754944e-38, %v2285_v57 }
 0xa35   :  { %v2261_v22 = vsub.f32 1.0, %v2260_v17 }
 0xa36   :  { %v2247_v51 = vmul.f32 %v2962_v45, %v2246_v38  ;;  %vm2284_vm1 = vcmp.eq.f32.partialorder %v2283_v26, 8.507059e+37 }
 0xa37   :  { %v2262_v40 = vmul.f32 %v2964_v49, %v2261_v22 }
 0xa38   :  { %v2966_v50 = vpop.eup %2965  ;;  %v2248_v54 = vadd.f32 %v2962_v45, %v2247_v51 }
 0xa39   :  { %v2275_v7 = vmul.f32 %v2966_v50, %v2243_v41  ;;  %v2263_v42 = vadd.f32 %v2964_v49, %v2262_v40  ;;  %v2968_v20 = vpop.eup %2967  ;;  %vm2280_vm14 = vweird.f32 %v2966_v50 }
 0xa3a   :  { %v2252_v1 = vsel %vm2251_vm10, %v2962_v45, %v2248_v54  ;;  %vm2281_vm0 = vmor %vm2279_vm15, %vm2280_vm14 }
 0xa3b   :  { %v2276_v61 = vsub.f32 1.0, %v2275_v7  ;;  %v2257_v3 = vsel %vm2254_vm12, %v2256_v63, %v2252_v1  ;;  %v2267_v52 = vsel %vm2266_vm11, %v2964_v49, %v2263_v42 }
 0xa3c   :  { %v2272_v16 = vsel %vm2269_vm13, %v2271_v32, %v2267_v52  ;;  %v2291_v27 = vmul.f32 %v2968_v20, %v2257_v3 }
 0xa3d   :  { %v2290_v8 = vmul.f32 %v2272_v16, %v3814_v2  ;;  %v2277_v28 = vmul.f32 %v2966_v50, %v2276_v61 }
 0xa3f   :  { %v3825_v15 = vadd.f32 %v2291_v27, %v2290_v8  ;;  %v2278_v39 = vadd.f32 %v2966_v50, %v2277_v28 }
 0xa41   :  { %2969 = vtanh.f32 %v3825_v15  ;;  %v2282_v62 = vsel %vm2281_vm0, %v2966_v50, %v2278_v39 }
 0xa42   :  { %v2287_v14 = vsel %vm2284_vm1, %v2286_v9, %v2282_v62 }
 0xa47   :  { %v2970_v37 = vpop.eup %2969 }
 0xa48   :  { %v2294_v18 = vmul.f32 %v2970_v37, %v2287_v14  ;;  %v2437_v37 = vpop.permute.xlu0 %2436 }
 0xa49   :  { %vm2438_vm15 = vcmp.eq.s32.totalorder %v2437_v37, 1 }
 0xa4a   :  { %v2311_v2 = vpack.c.bf16 %v2294_v18, %v2294_v18  ;;  %v3829_v19 = vsel %vm2302_vm2, %v2294_v18, %v3818_v10 }
 0xa4c   :  { %2320 = vmatmul.bf16.vlgmr.msrb.gmra.mxu0 %v2311_v2  ;;  %2333 = vmatmul.bf16.vlgmr.msrb.gmra.mxu1 %v2311_v2 }
 0xa4d   :  { %2346 = vmatmul.bf16.vlgmr.msrb.gmra.mxu2 %v2311_v2  ;;  %2359 = vmatmul.bf16.vlgmr.msrb.gmra.mxu3 %v2311_v2 }
 0xac9   :  { %v2321_v34 = vpop.f32.mrf.mxu0  ;;  %v2334_v35 = vpop.f32.mrf.mxu1 }
 0xaca   :  { %v2364_v36 = vadd.f32 %v2321_v34, %v2307_v23  ;;  %v2365_v43 = vadd.f32 %v2334_v35, %v2308_v30 }
 0xacc   :  { %v2685_v44 = vmul.f32 -1.442695, %v2364_v36  ;;  %v2686_v47 = vmul.f32 -1.442695, %v2365_v43 }
 0xace   :  { %2971 = vpow2.f32 %v2685_v44 }
 0xacf   :  { %2973 = vpow2.f32 %v2686_v47 }
 0xad0   :  { %v2347_v11 = vpop.f32.mrf.mxu2  ;;  %v2360_v55 = vpop.f32.mrf.mxu3 }
 0xad1   :  { %v2366_v56 = vadd.f32 %v2347_v11, %v2309_v48  ;;  %v2323_v10 = vpop.f32.mrf.mxu0  ;;  %v2336_v59 = vpop.f32.mrf.mxu1  ;;  %v2367_v46 = vadd.f32 %v2360_v55, %v2310_v29 }
 0xad3   :  { %v2687_v60 = vmul.f32 -1.442695, %v2366_v56 }
 0xad4   :  { %v2972_v4 = vpop.eup %2971 }
 0xad5   :  { %v2974_v6 = vpop.eup %2973  ;;  %v2377_v12 = vadd.f32 1.0, %v2972_v4  ;;  %2975 = vpow2.f32 %v2687_v60 }
 0xad6   :  { %v2378_v13 = vadd.f32 1.0, %v2974_v6 }
 0xad7   :  { %2977 = vrcp.f32 %v2377_v12  ;;  %v2391_v0 = vand.u32 2147483648, %v2377_v12  ;;  %v2389_v58 = vand.u32 2147483647, %v2377_v12  ;;  %vm2385_vm5 = vweird.f32 %v2377_v12 }
 0xad8   :  { %2979 = vrcp.f32 %v2378_v13  ;;  %v2349_v24 = vpop.f32.mrf.mxu2  ;;  %v2362_v25 = vpop.f32.mrf.mxu3  ;;  %v2406_v33 = vand.u32 2147483648, %v2378_v13  ;;  %v2404_v21 = vand.u32 2147483647, %v2378_v13  ;;  %vm2400_vm6 = vweird.f32 %v2378_v13 }
 0xad9   :  { %v2392_v63 = vor.u32 1.1754944e-38, %v2391_v0  ;;  %vm2390_vm9 = vcmp.eq.f32.partialorder %v2389_v58, 8.507059e+37 }
 0xada   :  { %v2407_v32 = vor.u32 1.1754944e-38, %v2406_v33  ;;  %vm2405_vm10 = vcmp.eq.f32.partialorder %v2404_v21, 8.507059e+37 }
 0xadb   :  { %v2976_v31 = vpop.eup %2975 }
 0xadc   :  { %v2379_v41 = vadd.f32 1.0, %v2976_v31 }
 0xadd   :  { %v2978_v45 = vpop.eup %2977 }
 0xade   :  { %v2980_v49 = vpop.eup %2979  ;;  %v2381_v53 = vmul.f32 %v2978_v45, %v2377_v12  ;;  %2981 = vrcp.f32 %v2379_v41  ;;  %vm2386_vm3 = vweird.f32 %v2978_v45  ;;  %v2421_v26 = vand.u32 2147483648, %v2379_v41 }
 0xadf   :  { %v2396_v17 = vmul.f32 %v2980_v49, %v2378_v13  ;;  %2983 = vtanh.f32 %v2367_v46  ;;  %vm2401_vm4 = vweird.f32 %v2980_v49  ;;  %vm2387_vm7 = vmor %vm2385_vm5, %vm2386_vm3  ;;  %vm2415_vm12 = vweird.f32 %v2379_v41 }
 0xae0   :  { %v2382_v38 = vsub.f32 1.0, %v2381_v53  ;;  %vm2402_vm8 = vmor %vm2400_vm6, %vm2401_vm4  ;;  %v2419_v62 = vand.u32 2147483647, %v2379_v41  ;;  %v2422_v9 = vor.u32 1.1754944e-38, %v2421_v26 }
 0xae1   :  { %v2397_v22 = vsub.f32 1.0, %v2396_v17 }
 0xae2   :  { %v2383_v51 = vmul.f32 %v2978_v45, %v2382_v38  ;;  %vm2420_vm14 = vcmp.eq.f32.partialorder %v2419_v62, 8.507059e+37 }
 0xae3   :  { %v2398_v40 = vmul.f32 %v2980_v49, %v2397_v22 }
 0xae4   :  { %v2982_v50 = vpop.eup %2981  ;;  %v2384_v54 = vadd.f32 %v2978_v45, %v2383_v51 }
 0xae5   :  { %v2411_v7 = vmul.f32 %v2982_v50, %v2379_v41  ;;  %v2399_v42 = vadd.f32 %v2980_v49, %v2398_v40  ;;  %v2984_v20 = vpop.eup %2983  ;;  %vm2416_vm11 = vweird.f32 %v2982_v50 }
 0xae6   :  { %v2388_v1 = vsel %vm2387_vm7, %v2978_v45, %v2384_v54  ;;  %vm2417_vm13 = vmor %vm2415_vm12, %vm2416_vm11 }
 0xae7   :  { %v2412_v61 = vsub.f32 1.0, %v2411_v7  ;;  %v2393_v3 = vsel %vm2390_vm9, %v2392_v63, %v2388_v1  ;;  %v2403_v52 = vsel %vm2402_vm8, %v2980_v49, %v2399_v42 }
 0xae8   :  { %v2408_v16 = vsel %vm2405_vm10, %v2407_v32, %v2403_v52  ;;  %v2427_v27 = vmul.f32 %v2984_v20, %v2393_v3 }
 0xae9   :  { %v2413_v8 = vmul.f32 %v2982_v50, %v2412_v61  ;;  %v2426_v28 = vmul.f32 %v2408_v16, %v3825_v15 }
 0xaeb   :  { %v2428_v39 = vadd.f32 %v2427_v27, %v2426_v28  ;;  %v2414_v57 = vadd.f32 %v2982_v50, %v2413_v8 }
 0xaed   :  { %2985 = vtanh.f32 %v2428_v39  ;;  %2441 = vst [vmem:[#allocation3] sm:$0xff] %v2428_v39  ;;  %v2418_v5 = vsel %vm2417_vm13, %v2982_v50, %v2414_v57 }
 0xaee   :  { %v2423_v18 = vsel %vm2420_vm14, %v2422_v9, %v2418_v5 }
 0xaf3   :  { %v2986_v14 = vpop.eup %2985 }
 0xaf4   :  { %v2430_v2 = vmul.f32 %v2986_v14, %v2423_v18 }
 0xaf6   :  { %v2439_v23 = vsel %vm2438_vm15, %v2430_v2, %v3829_v19  ;;  %2440 = vst [vmem:[#allocation2] sm:$0xff] %v2430_v2 }
 0xaf7   :  { %2442 = vst [vmem:[#allocation4] sm:$0xff] %v2439_v23 }
 0xaf8 PF:  { %v2462_v15 = vld [vmem:[%s3888_s4 + $0x78] sm:$0xff]  ;;  %v2461_v30 = vld [vmem:[%s3888_s4 + $0x70] sm:$0xff]  ;;  %v2460_v34 = vld [vmem:[%s3888_s4 + $0x68] sm:$0xff]  ;;  %vm2487_vm0 = vcmask 7168  }
 0xaf9   :  { %2467 = vmatpush.msra.mxu0 %v2462_v15  ;;  %v2459_v19 = vld [vmem:[%s3888_s4 + $0x60] sm:$0xff]  ;;  %v2458_v35 = vld [vmem:[%s3888_s4 + $0x58] sm:$0xff]  ;;  %v2457_v36 = vld [vmem:[%s3888_s4 + $0x50] sm:$0xff] }
 0xafa   :  { %v2456_v43 = vld [vmem:[%s3888_s4 + $0x48] sm:$0xff]  ;;  %v2455_v44 = vld [vmem:[%s3888_s4 + $0x40] sm:$0xff]  ;;  %v2454_v47 = vld [vmem:[%s3888_s4 + $0x38] sm:$0xff] }
 0xafb   :  { %2468 = vmatpush.msra.mxu0 %v2461_v30  ;;  %v2453_v48 = vld [vmem:[%s3888_s4 + $0x30] sm:$0xff]  ;;  %v2452_v11 = vld [vmem:[%s3888_s4 + $0x28] sm:$0xff]  ;;  %v2451_v55 = vld [vmem:[%s3888_s4 + $0x20] sm:$0xff] }
 0xafc   :  { %v2450_v56 = vld [vmem:[%s3888_s4 + $0x18] sm:$0xff]  ;;  %v2449_v10 = vld [vmem:[%s3888_s4 + $0x10] sm:$0xff]  ;;  %v2448_v59 = vld [vmem:[%s3888_s4 + $0x8] sm:$0xff] }
 0xafd   :  { %2469 = vmatpush.msra.mxu0 %v2460_v34  ;;  %v2447_v60 = vld [vmem:[%s3888_s4] sm:$0xff]  ;;  %v2990_v6 = vld [vmem:[#allocation7] ss:$0 sm:$0xff] }
 0xafe   :  { %v2446_v4 = vld [vmem:[#allocation4] sm:$0xff] }
 0xaff   :  { %2470 = vmatpush.msra.mxu0 %v2459_v19 }
 0xb01   :  { %2471 = vmatpush.msra.mxu0 %v2458_v35 }
 0xb03   :  { %2472 = vmatpush.msra.mxu0 %v2457_v36 }
 0xb05   :  { %2473 = vmatpush.msra.mxu0 %v2456_v43 }
 0xb07   :  { %2474 = vmatpush.msra.mxu0 %v2455_v44 }
 0xb09   :  { %2475 = vmatpush.msra.mxu0 %v2454_v47 }
 0xb0b   :  { %2476 = vmatpush.msra.mxu0 %v2453_v48 }
 0xb0d   :  { %2477 = vmatpush.msra.mxu0 %v2452_v11 }
 0xb0f   :  { %2478 = vmatpush.msra.mxu0 %v2451_v55 }
 0xb11   :  { %2479 = vmatpush.msra.mxu0 %v2450_v56 }
 0xb13   :  { %2480 = vmatpush.msra.mxu0 %v2449_v10 }
 0xb15   :  { %2481 = vmatpush.msra.mxu0 %v2448_v59 }
 0xb17   :  { %2482 = vmatpush.msra.mxu0 %v2447_v60 }
 0xb18   :  { %2483 = vmatmul.f32.vlgmr.msra.gmra.mxu0 %v2446_v4 }
 0xb95   :  { %v2484_v12 = vpop.f32.mrf.mxu0 }
 0xb96   :  { %v2485_v13 = vadd.f32 %v2990_v6, %v2484_v12 }
 0xb98   :  { %2488 = vst.msk [vmem:[%s3890_s6] sm:$0xff] %vm2487_vm0, %v2485_v13 }
 0xb99   :  { %2493 = vsyncpa [#allocation9], 1 }
 0xb9a   :  { %2494 = vsyncpa [#allocation11], 1 }

</bundles_post_ra>
